<compile_context>
chip_gen: v6e
topology: v6e:2x2x1
jax: 0.10.0
libtpu: 0.0.40
codegen_flags: <defaults>
</compile_context>

<pallas_src>
import functools
import math

import jax
import jax.numpy as jnp
import numpy as np
from jax.experimental import pallas as pl
from jax.experimental.pallas import tpu as pltpu


def _round_up(x, m):
    return (x + m - 1) // m * m


def _neighbour_encoder_kernel(cand_ref, neigh_ref, wqkv_ref, wkv_ref,
                              bq_ref, bv_ref, seg_ref, o_ref,
                              *, n_neigh, inv_scale):
    # Per batch tile (packed layout, `lp` = pack * H * d_k = 128 lanes):
    #   cand  (bt, lp)        -- `pack` batch rows per 128-lane row
    #   neigh (bt * N, lp)    -- pre-flattened, same packing
    #   out   (bt, lp)
    bt, lp = cand_ref.shape
    n = n_neigh

    cand = cand_ref[...]                                   # (bt, lp)
    neigh = neigh_ref[...]                                  # (bt*N, lp)

    bq = bq_ref[...]                                        # (1, lp)
    bv = bv_ref[...]                                        # (1, lp)
    seg = seg_ref[...]                                      # (lp, lp) block-diag

    # Fused projections: candidate Q|K|V in one MXU matmul, neighbour K|V in
    # another.  Weights are pack-way block-diagonal, so each 32-lane batch
    # slot only sees its own features (W_K has no bias).
    cp = jnp.dot(cand, wqkv_ref[...], preferred_element_type=jnp.float32)    # (bt, 3*lp)
    q = cp[:, :lp] + bq                                      # (bt, lp)
    k_c = cp[:, lp:2 * lp]                                   # (bt, lp)
    v_c = cp[:, 2 * lp:] + bv                                # (bt, lp)

    kv = jnp.dot(neigh, wkv_ref[...], preferred_element_type=jnp.float32)    # (bt*N, 2*lp)
    k_n = kv[:, :lp]                                         # (bt*N, lp)
    v_n = kv[:, lp:] + bv                                    # (bt*N, lp)

    # Per-head scores via segmented reduce on the MXU: (q*k) @ seg sums each
    # head's d_k lanes and replicates the score across those lanes.
    prod = (k_n.reshape(bt, n, lp) * q[:, None, :]).reshape(bt * n, lp)
    s_n = (jnp.dot(prod, seg, preferred_element_type=jnp.float32)
           * inv_scale).reshape(bt, n, lp)                   # (bt, N, lp)
    s_c = jnp.dot(q * k_c, seg,
                  preferred_element_type=jnp.float32) * inv_scale            # (bt, lp)

    # Numerically stable softmax over S = N + 1 keys; the candidate (which the
    # torch module concatenates as the last key) is folded in as an extra term.
    m = jnp.maximum(jnp.max(s_n, axis=1), s_c)               # (bt, lp)
    e_n = jnp.exp(s_n - m[:, None, :])                       # (bt, N, lp)
    e_c = jnp.exp(s_c - m)                                   # (bt, lp)
    den = jnp.sum(e_n, axis=1) + e_c                         # (bt, lp)
    inv = pl.reciprocal(den, approx=True)                    # EUP slot
    inv = inv * (2.0 - den * inv)                            # 1 Newton step -> ~f32 exact

    # d_k == d_v, so the replicated score already lines up with each head's
    # d_v lanes of V: weighted sum is elementwise math + a sublane-axis reduce.
    # Normalisation is applied once at the end (saves N big multiplies).
    out = (jnp.sum(e_n * v_n.reshape(bt, n, lp), axis=1) + e_c * v_c) * inv
    o_ref[...] = out.astype(o_ref.dtype)


def neighbour_encoder(hidden_candidate, hidden_neighbour, params,
                      *, num_heads, head_dim, block_b=2048):
    """hidden_candidate: (B, D), hidden_neighbour: (B, N, D) -> (B, 1, H*head_dim)."""
    B, D = hidden_candidate.shape
    N = hidden_neighbour.shape[1]
    # The replicated-alpha trick requires d_k == d_v and D == H * d_k.
    assert D == num_heads * head_dim, "d_model must equal num_heads * head_dim"
    d_k = head_dim
    inv_scale = 1.0 / math.sqrt(float(d_k))

    # ---- lane packing: `pack` consecutive batch rows per 128-lane row -------
    pack = 128 // D if (D <= 128 and 128 % D == 0) else 1
    lp = pack * D

    cand = hidden_candidate
    neigh = hidden_neighbour
    b_pad = _round_up(B, pack)
    if b_pad != B:
        # Pad by at most pack-1 rows; this is folded into the packing copy
        # below (the old tile-granularity pad of up to block_b-1 rows is gone).
        cand = jnp.pad(cand, ((0, b_pad - B), (0, 0)))
        neigh = jnp.pad(neigh, ((0, b_pad - B), (0, 0), (0, 0)))
    bp = b_pad // pack

    # Candidate / output packing is a free row-major reshape; the neighbour
    # packing is the one real layout copy (done once, wrapper-side, so the
    # kernel only ever sees lane-dense 128-wide rows).
    cand_p = cand.reshape(bp, lp)
    neigh_p = (neigh.reshape(bp, pack, N, D)
                    .transpose(0, 2, 1, 3)
                    .reshape(bp * N, lp))

    # pack-way block-diagonal weights, fused Q|K|V (candidate) and K|V (neigh).
    eye_p = jnp.eye(pack, dtype=params["wq"].dtype)
    wq_p = jnp.kron(eye_p, params["wq"])
    wk_p = jnp.kron(eye_p, params["wk"])
    wv_p = jnp.kron(eye_p, params["wv"])
    w_qkv = jnp.concatenate([wq_p, wk_p, wv_p], axis=1)     # (lp, 3*lp)
    w_kv = jnp.concatenate([wk_p, wv_p], axis=1)            # (lp, 2*lp)
    bq_p = jnp.tile(params["bq"], (1, pack))                 # (1, lp)
    bv_p = jnp.tile(params["bv"], (1, pack))                 # (1, lp)

    # seg[i, j] = 1 iff lanes i, j belong to the same (batch-slot, head); with
    # contiguous d_k-lane head groups that is simply i//d_k == j//d_k.
    head_id = np.arange(lp) // d_k
    seg = jnp.asarray((head_id[:, None] == head_id[None, :]).astype(np.float32))

    # ---- batch tiling over packed rows --------------------------------------
    # No tile-granularity padding: grid = cdiv, last block may be partial
    # (garbage rows are per-row independent and dropped/sliced off).  When the
    # whole batch would fit in one tile we still split in two so both v7x
    # TensorCores get work via dimension_semantics=("parallel",).
    block_bp = max(_round_up(max(block_b // pack, 1), 8), 8)
    if bp <= 8:
        bt = bp                                   # block == full dim is allowed
    else:
        bt = min(block_bp, _round_up((bp + 1) // 2, 8))
    grid = (pl.cdiv(bp, bt),)

    kernel = functools.partial(_neighbour_encoder_kernel,
                               n_neigh=N, inv_scale=inv_scale)

    wfull = lambda i: (0, 0)
    out = pl.pallas_call(
        kernel,
        out_shape=jax.ShapeDtypeStruct((bp, lp), jnp.float32),
        grid=grid,
        in_specs=[
            pl.BlockSpec((bt, lp), lambda i: (i, 0)),         # packed candidate
            pl.BlockSpec((bt * N, lp), lambda i: (i, 0)),     # packed neighbours (flat)
            pl.BlockSpec((lp, 3 * lp), wfull),                # fused W_Q|W_K|W_V
            pl.BlockSpec((lp, 2 * lp), wfull),                # fused W_K|W_V
            pl.BlockSpec((1, lp), wfull),                     # b_Q (packed)
            pl.BlockSpec((1, lp), wfull),                     # b_V (packed)
            pl.BlockSpec((lp, lp), wfull),                    # head segment matrix
        ],
        out_specs=pl.BlockSpec((bt, lp), lambda i: (i, 0)),
        compiler_params=pltpu.CompilerParams(
            dimension_semantics=("parallel",),
            vmem_limit_bytes=32 * 1024 * 1024),
    )(cand_p, neigh_p, w_qkv, w_kv, bq_p, bv_p, seg)

    # Free unpack: (bp, pack*D) -> (b_pad, D) -> (B, 1, D).
    return out.reshape(b_pad, D)[:B].reshape(B, 1, D)


def neighbour_encoder_reference(hidden_candidate, hidden_neighbour, params,
                                *, num_heads, head_dim):
    """Pure-JAX reference mirroring the PyTorch NeighbourEncoder forward."""
    B, D = hidden_candidate.shape
    d_k = d_v = head_dim
    cand = hidden_candidate[:, None, :]                              # (B, 1, D)
    kv = jnp.concatenate([hidden_neighbour, cand], axis=1)           # (B, S, D)
    S = kv.shape[1]

    Q = cand @ params["wq"] + params["bq"]                           # (B, 1, H*d_k)
    K = kv @ params["wk"]                                            # (B, S, H*d_k)
    V = kv @ params["wv"] + params["bv"]                             # (B, S, H*d_v)

    Q = Q.reshape(B, 1, num_heads, d_k).transpose(0, 2, 1, 3)        # (B, H, 1, d_k)
    K = K.reshape(B, S, num_heads, d_k).transpose(0, 2, 1, 3)        # (B, H, S, d_k)
    V = V.reshape(B, S, num_heads, d_v).transpose(0, 2, 1, 3)        # (B, H, S, d_v)

    A = jnp.einsum("bhqd,bhkd->bhqk", Q, K) / math.sqrt(float(d_k))  # (B, H, 1, S)
    alpha = jax.nn.softmax(A, axis=-1)
    out = jnp.einsum("bhqk,bhkd->bhqd", alpha, V)                    # (B, H, 1, d_v)
    out = out.transpose(0, 2, 1, 3).reshape(B, 1, num_heads * d_v)
    return out


if __name__ == "__main__":
    # Full-precision f32 matmuls in the reference so the tightened tolerance
    # compares against a genuinely f32 baseline.
    jax.config.update("jax_default_matmul_precision", "highest")

    # Config implied by P_SHE's NeighbourEncoder: opt.num_head_c = 4,
    # opt.head_dim = 8 -> d_model = 32.  Batch = bs * K candidate news items.
    num_heads = 4
    head_dim = 8
    d_model = num_heads * head_dim
    bs, K, n_neigh = 2, 3, 8
    B = bs * K                       # 6 -> also exercises the pad-to-pack path

    key = jax.random.PRNGKey(0)
    k_cand, k_neigh, k_wq, k_bq, k_wk, k_wv, k_bv = jax.random.split(key, 7)

    hidden_candidate = jax.random.normal(k_cand, (B, d_model), dtype=jnp.float32)
    hidden_neighbour = jax.random.normal(k_neigh, (B, n_neigh, d_model),
                                         dtype=jnp.float32)

    # Deterministic synthetic parameters (weights stored as (in, out);
    # non-zero biases to exercise the W_Q / W_V bias paths).
    params = {
        "wq": 0.05 * jax.random.normal(k_wq, (d_model, num_heads * head_dim), jnp.float32),
        "bq": 0.10 * jax.random.normal(k_bq, (1, num_heads * head_dim), jnp.float32),
        "wk": 0.05 * jax.random.normal(k_wk, (d_model, num_heads * head_dim), jnp.float32),
        "wv": 0.05 * jax.random.normal(k_wv, (d_model, num_heads * head_dim), jnp.float32),
        "bv": 0.10 * jax.random.normal(k_bv, (1, num_heads * head_dim), jnp.float32),
    }

    out = neighbour_encoder(hidden_candidate, hidden_neighbour, params,
                            num_heads=num_heads, head_dim=head_dim)
    out = jax.block_until_ready(out)

    ref = neighbour_encoder_reference(hidden_candidate, hidden_neighbour, params,
                                      num_heads=num_heads, head_dim=head_dim)

    # Tolerance tightened from 2e-3: the approx reciprocal now gets one
    # Newton-Raphson refinement, so the kernel is ~f32-accurate end to end.
    np.testing.assert_allclose(np.asarray(out), np.asarray(ref),
                               atol=1e-4, rtol=1e-4)

    print("KERNEL_OK")
</pallas_src>

<mosaic_0001>
module attributes {stable_mosaic.version = 11 : i64} {
  func.func @_neighbour_encoder_kernel(%arg0: i32, %arg1: memref<2x128xf32, #tpu.memory_space<vmem>>, %arg2: memref<16x128xf32, #tpu.memory_space<vmem>>, %arg3: memref<128x384xf32, #tpu.memory_space<vmem>>, %arg4: memref<128x256xf32, #tpu.memory_space<vmem>>, %arg5: memref<1x128xf32, #tpu.memory_space<vmem>>, %arg6: memref<1x128xf32, #tpu.memory_space<vmem>>, %arg7: memref<128x128xf32, #tpu.memory_space<vmem>>, %arg8: memref<2x128xf32, #tpu.memory_space<vmem>>) attributes {dimension_semantics = [#tpu.dimension_semantics<parallel>], iteration_bounds = array<i64: 1>, scalar_prefetch = 0 : i64, scratch_operands = 0 : i64, tpu.core_type = #tpu.core_type<tc>, window_params = [{transform_indices = @transform_0, window_bounds = array<i64: 2, 128>}, {transform_indices = @transform_1, window_bounds = array<i64: 16, 128>}, {pipeline_mode = #tpu.pipeline_mode<synchronous>, transform_indices = @transform_2, window_bounds = array<i64: 128, 384>}, {pipeline_mode = #tpu.pipeline_mode<synchronous>, transform_indices = @transform_3, window_bounds = array<i64: 128, 256>}, {pipeline_mode = #tpu.pipeline_mode<synchronous>, transform_indices = @transform_4, window_bounds = array<i64: 1, 128>}, {pipeline_mode = #tpu.pipeline_mode<synchronous>, transform_indices = @transform_5, window_bounds = array<i64: 1, 128>}, {pipeline_mode = #tpu.pipeline_mode<synchronous>, transform_indices = @transform_6, window_bounds = array<i64: 128, 128>}, {transform_indices = @transform_7, window_bounds = array<i64: 2, 128>}]} {
    %c0 = arith.constant 0 : index
    %c0_0 = arith.constant 0 : index
    %0 = vector.load %arg1[%c0, %c0_0] : memref<2x128xf32, #tpu.memory_space<vmem>>, vector<2x128xf32>
    %c0_1 = arith.constant 0 : index
    %c0_2 = arith.constant 0 : index
    %1 = vector.load %arg2[%c0_1, %c0_2] : memref<16x128xf32, #tpu.memory_space<vmem>>, vector<16x128xf32>
    %c0_3 = arith.constant 0 : index
    %c0_4 = arith.constant 0 : index
    %2 = vector.load %arg5[%c0_3, %c0_4] : memref<1x128xf32, #tpu.memory_space<vmem>>, vector<1x128xf32>
    %c0_5 = arith.constant 0 : index
    %c0_6 = arith.constant 0 : index
    %3 = vector.load %arg6[%c0_5, %c0_6] : memref<1x128xf32, #tpu.memory_space<vmem>>, vector<1x128xf32>
    %c0_7 = arith.constant 0 : index
    %c0_8 = arith.constant 0 : index
    %4 = vector.load %arg7[%c0_7, %c0_8] : memref<128x128xf32, #tpu.memory_space<vmem>>, vector<128x128xf32>
    %c0_9 = arith.constant 0 : index
    %c0_10 = arith.constant 0 : index
    %5 = vector.load %arg3[%c0_9, %c0_10] : memref<128x384xf32, #tpu.memory_space<vmem>>, vector<128x384xf32>
    %cst = arith.constant dense<0.000000e+00> : vector<2x384xf32>
    %6 = tpu.matmul %0, %5, %cst {dimension_numbers = #tpu.dot_dimension_numbers<[1], [0], [0], [1], [0, 0, 1, 1], [], []>, precision = #tpu.contract_precision<fp32>} : vector<2x128xf32>, vector<128x384xf32>, vector<2x384xf32> -> vector<2x384xf32>
    %7 = vector.extract_strided_slice %6 {offsets = [0, 0], sizes = [2, 128], strides = [1, 1]} : vector<2x384xf32> to vector<2x128xf32>
    %8 = vector.broadcast %2 : vector<1x128xf32> to vector<2x128xf32>
    %9 = arith.addf %7, %8 : vector<2x128xf32>
    %10 = vector.extract_strided_slice %6 {offsets = [0, 128], sizes = [2, 128], strides = [1, 1]} : vector<2x384xf32> to vector<2x128xf32>
    %11 = vector.extract_strided_slice %6 {offsets = [0, 256], sizes = [2, 128], strides = [1, 1]} : vector<2x384xf32> to vector<2x128xf32>
    %12 = vector.broadcast %3 : vector<1x128xf32> to vector<2x128xf32>
    %13 = arith.addf %11, %12 : vector<2x128xf32>
    %c0_11 = arith.constant 0 : index
    %c0_12 = arith.constant 0 : index
    %14 = vector.load %arg4[%c0_11, %c0_12] : memref<128x256xf32, #tpu.memory_space<vmem>>, vector<128x256xf32>
    %cst_13 = arith.constant dense<0.000000e+00> : vector<16x256xf32>
    %15 = tpu.matmul %1, %14, %cst_13 {dimension_numbers = #tpu.dot_dimension_numbers<[1], [0], [0], [1], [0, 0, 1, 1], [], []>, precision = #tpu.contract_precision<fp32>} : vector<16x128xf32>, vector<128x256xf32>, vector<16x256xf32> -> vector<16x256xf32>
    %16 = vector.extract_strided_slice %15 {offsets = [0, 0], sizes = [16, 128], strides = [1, 1]} : vector<16x256xf32> to vector<16x128xf32>
    %17 = vector.extract_strided_slice %15 {offsets = [0, 128], sizes = [16, 128], strides = [1, 1]} : vector<16x256xf32> to vector<16x128xf32>
    %18 = vector.broadcast %3 : vector<1x128xf32> to vector<16x128xf32>
    %19 = arith.addf %17, %18 : vector<16x128xf32>
    %20 = vector.shape_cast %16 : vector<16x128xf32> to vector<2x8x128xf32>
    %21 = vector.shape_cast %9 : vector<2x128xf32> to vector<2x1x128xf32>
    %22 = vector.broadcast %21 : vector<2x1x128xf32> to vector<2x8x128xf32>
    %23 = arith.mulf %20, %22 : vector<2x8x128xf32>
    %24 = vector.shape_cast %23 : vector<2x8x128xf32> to vector<16x128xf32>
    %cst_14 = arith.constant dense<0.000000e+00> : vector<16x128xf32>
    %25 = tpu.matmul %24, %4, %cst_14 {dimension_numbers = #tpu.dot_dimension_numbers<[1], [0], [0], [1], [0, 0, 1, 1], [], []>, precision = #tpu.contract_precision<fp32>} : vector<16x128xf32>, vector<128x128xf32>, vector<16x128xf32> -> vector<16x128xf32>
    %cst_15 = arith.constant 0.353553385 : f32
    %26 = vector.broadcast %cst_15 : f32 to vector<16x128xf32>
    %27 = arith.mulf %25, %26 : vector<16x128xf32>
    %28 = vector.shape_cast %27 : vector<16x128xf32> to vector<2x8x128xf32>
    %29 = arith.mulf %9, %10 : vector<2x128xf32>
    %cst_16 = arith.constant dense<0.000000e+00> : vector<2x128xf32>
    %30 = tpu.matmul %29, %4, %cst_16 {dimension_numbers = #tpu.dot_dimension_numbers<[1], [0], [0], [1], [0, 0, 1, 1], [], []>, precision = #tpu.contract_precision<fp32>} : vector<2x128xf32>, vector<128x128xf32>, vector<2x128xf32> -> vector<2x128xf32>
    %cst_17 = arith.constant 0.353553385 : f32
    %31 = vector.broadcast %cst_17 : f32 to vector<2x128xf32>
    %32 = arith.mulf %30, %31 : vector<2x128xf32>
    %cst_18 = arith.constant dense<0xFF800000> : vector<2x128xf32>
    %33 = vector.multi_reduction <maximumf>, %28, %cst_18 [1] : vector<2x8x128xf32> to vector<2x128xf32>
    %34 = arith.maximumf %33, %32 : vector<2x128xf32>
    %35 = vector.shape_cast %34 : vector<2x128xf32> to vector<2x1x128xf32>
    %36 = vector.broadcast %35 : vector<2x1x128xf32> to vector<2x8x128xf32>
    %37 = arith.subf %28, %36 : vector<2x8x128xf32>
    %38 = math.exp %37 : vector<2x8x128xf32>
    %39 = arith.subf %32, %34 : vector<2x128xf32>
    %40 = math.exp %39 : vector<2x128xf32>
    %cst_19 = arith.constant dense<0.000000e+00> : vector<2x128xf32>
    %41 = vector.multi_reduction <add>, %38, %cst_19 [1] : vector<2x8x128xf32> to vector<2x128xf32>
    %42 = arith.addf %41, %40 : vector<2x128xf32>
    %43 = tpu.reciprocal %42 {approx = true} : vector<2x128xf32> -> vector<2x128xf32>
    %44 = arith.mulf %42, %43 : vector<2x128xf32>
    %cst_20 = arith.constant 2.000000e+00 : f32
    %45 = vector.broadcast %cst_20 : f32 to vector<2x128xf32>
    %46 = arith.subf %45, %44 : vector<2x128xf32>
    %47 = arith.mulf %43, %46 : vector<2x128xf32>
    %48 = vector.shape_cast %19 : vector<16x128xf32> to vector<2x8x128xf32>
    %49 = arith.mulf %38, %48 : vector<2x8x128xf32>
    %cst_21 = arith.constant dense<0.000000e+00> : vector<2x128xf32>
    %50 = vector.multi_reduction <add>, %49, %cst_21 [1] : vector<2x8x128xf32> to vector<2x128xf32>
    %51 = arith.mulf %40, %13 : vector<2x128xf32>
    %52 = arith.addf %50, %51 : vector<2x128xf32>
    %53 = arith.mulf %52, %47 : vector<2x128xf32>
    %c0_22 = arith.constant 0 : index
    %c0_23 = arith.constant 0 : index
    %54 = vector.load %arg8[%c0_22, %c0_23] : memref<2x128xf32, #tpu.memory_space<vmem>>, vector<2x128xf32>
    tpu.vector_store %arg8[%c0_22, %c0_23], %53 {strides = array<i32>} : memref<2x128xf32, #tpu.memory_space<vmem>>, vector<2x128xf32>,
    return
  }
  func.func @transform_0(%arg0: i32) -> (i32, i32) {
    %c0_i32 = arith.constant 0 : i32
    %c0_i32_0 = arith.constant 0 : i32
    return %arg0, %c0_i32 : i32, i32
  }
  func.func @transform_1(%arg0: i32) -> (i32, i32) {
    %c0_i32 = arith.constant 0 : i32
    %c0_i32_0 = arith.constant 0 : i32
    return %arg0, %c0_i32 : i32, i32
  }
  func.func @transform_2(%arg0: i32) -> (i32, i32) {
    %c0_i32 = arith.constant 0 : i32
    %c0_i32_0 = arith.constant 0 : i32
    %c0_i32_1 = arith.constant 0 : i32
    return %c0_i32, %c0_i32_0 : i32, i32
  }
  func.func @transform_3(%arg0: i32) -> (i32, i32) {
    %c0_i32 = arith.constant 0 : i32
    %c0_i32_0 = arith.constant 0 : i32
    %c0_i32_1 = arith.constant 0 : i32
    return %c0_i32, %c0_i32_0 : i32, i32
  }
  func.func @transform_4(%arg0: i32) -> (i32, i32) {
    %c0_i32 = arith.constant 0 : i32
    %c0_i32_0 = arith.constant 0 : i32
    %c0_i32_1 = arith.constant 0 : i32
    return %c0_i32, %c0_i32_0 : i32, i32
  }
  func.func @transform_5(%arg0: i32) -> (i32, i32) {
    %c0_i32 = arith.constant 0 : i32
    %c0_i32_0 = arith.constant 0 : i32
    %c0_i32_1 = arith.constant 0 : i32
    return %c0_i32, %c0_i32_0 : i32, i32
  }
  func.func @transform_6(%arg0: i32) -> (i32, i32) {
    %c0_i32 = arith.constant 0 : i32
    %c0_i32_0 = arith.constant 0 : i32
    %c0_i32_1 = arith.constant 0 : i32
    return %c0_i32, %c0_i32_0 : i32, i32
  }
  func.func @transform_7(%arg0: i32) -> (i32, i32) {
    %c0_i32 = arith.constant 0 : i32
    %c0_i32_0 = arith.constant 0 : i32
    return %arg0, %c0_i32 : i32, i32
  }
}

</mosaic_0001>

<bundles_post_ra>
// kernel: tpu_custom_call.1
= control target key start
LH: loop header
LB: loop body
LE: loop exit
PB: predicated region body
PF: predicated region fallthrough
CT: control target
= control target key end

     0   :  { %12 = vsyncpa [#allocation3], 0  ;;  %s7449_s0 = inlined_call_operand.hbm [shape: f32[2,128], index: 0, kind: input, shape index: {}]   ;;  %s7450_s1 = inlined_call_operand.hbm [shape: f32[16,128], index: 1, kind: input, shape index: {}]   ;;  %s7451_s2 = inlined_call_operand.hbm [shape: f32[128,384], index: 2, kind: input, shape index: {}]   ;;  %s7452_s3 = inlined_call_operand.hbm [shape: f32[128,256], index: 3, kind: input, shape index: {}]   ;;  %s7453_s4 = inlined_call_operand.vmem [shape: f32[1,128], index: 4, kind: input, shape index: {}]   ;;  %s7454_s5 = inlined_call_operand.vmem [shape: f32[1,128], index: 5, kind: input, shape index: {}]   ;;  %s7455_s6 = inlined_call_operand.hbm [shape: f32[128,128], index: 6, kind: input, shape index: {}]   ;;  %s7456_s7 = inlined_call_operand.hbm [shape: f32[2,128], index: 7, kind: output, shape index: {}]  }
   0x1   :  { %13 = vsyncpa [#allocation6], 0 }
   0x2   :  { %14 = vsyncpa [#allocation9], 0 }
   0x3   :  { %15 = vsyncpa [#allocation4], 0  ;;  %s5184_s24 = smov [#allocation5]  }
   0x4   :  { %s31_s25 = sshll.u32 %s5184_s24, 4  ;;  %s32_s25 = int_to_ptr.vmem [resolvable:$true] %s31_s25 }
   0x5   :  { %s5064_s26 = scalar_lea.vmem %s32_s25, 256  ;;  %p5069_p1 = scmp.lt.s32.totalorder %s32_s25, %s32_s25 }
   0x6   :  { %p5065_p0 = scmp.ne.s32.totalorder %s32_s25, %s5064_s26  ;;  %p5070_p2 = scmp.lt.s32.totalorder %s5064_s26, %s5064_s26 }
   0x8   :  { %p5071_p3 = por %p5070_p2, %p5069_p1 }
   0xa   :  { %p5072_p4 = pnand %p5071_p3, %p5065_p0 }
   0xc   :  { %5075 = shalt.err (!%p5072_p4)
}
   0xd   :  { %s5185_s27 = smov 128   ;;  %s5186_s28 = smov 8  }
   0xe   :  { %37 = dma.hbm_to_vmem [thread:$0]  %s7450_s1, 256, %s32_s25, [#allocation6], %s5185_s27, %s5185_s27, %s5186_s28  }
   0xf   :  { %s5187_s8 = smov [#allocation8]  }
  0x10   :  { %s55_s9 = sshll.u32 %s5187_s8, 4  ;;  %s56_s9 = int_to_ptr.vmem [resolvable:$true] %s55_s9 }
  0x11   :  { %s5084_s10 = scalar_lea.vmem %s56_s9, 4096  ;;  %p5089_p6 = scmp.lt.s32.totalorder %s56_s9, %s56_s9 }
  0x12   :  { %p5085_p5 = scmp.ne.s32.totalorder %s56_s9, %s5084_s10  ;;  %p5090_p7 = scmp.lt.s32.totalorder %s5084_s10, %s5084_s10 }
  0x14   :  { %p5091_p8 = por %p5090_p7, %p5089_p6 }
  0x16   :  { %p5092_p9 = pnand %p5091_p8, %p5085_p5 }
  0x18   :  { %5095 = shalt.err (!%p5092_p9)
}
  0x19   :  { %s5188_s11 = smov 256   ;;  %s5189_s12 = smov 16  }
  0x1a   :  { %61 = dma.hbm_to_vmem [thread:$0]  %s7452_s3, 4096, %s56_s9, [#allocation9], %s5188_s11, %s5188_s11, %s5189_s12  }
  0x1b   :  { %s5190_s15 = smov [#allocation2]   ;;  %s5191_s17 = smov [#allocation7]  }
  0x1c   :  { %s22_s16 = sshll.u32 %s5190_s15, 4  ;;  %s43_s1 = sshll.u32 %s5191_s17, 4  ;;  %s23_s16 = int_to_ptr.vmem [resolvable:$true] %s22_s16  ;;  %s44_s1 = int_to_ptr.vmem [resolvable:$true] %s43_s1 }
  0x1d   :  { %s5104_s18 = scalar_lea.vmem %s23_s16, 32  ;;  %p5109_p11 = scmp.lt.s32.totalorder %s23_s16, %s23_s16 }
  0x1e   :  { %p5105_p10 = scmp.ne.s32.totalorder %s23_s16, %s5104_s18  ;;  %p5110_p12 = scmp.lt.s32.totalorder %s5104_s18, %s5104_s18 }
  0x20   :  { %p5111_p13 = por %p5110_p12, %p5109_p11 }
  0x22   :  { %p5112_p0 = pnand %p5111_p13, %p5105_p10 }
  0x24   :  { %5115 = shalt.err (!%p5112_p0)
}
  0x25   :  { %25 = dma.hbm_to_vmem [thread:$0]  %s7449_s0, 32, %s23_s16, [#allocation3]  }
  0x26   :  { %s5124_s21 = scalar_lea.vmem %s44_s1, 6144  ;;  %p5129_p2 = scmp.lt.s32.totalorder %s44_s1, %s44_s1 }
  0x27   :  { %p5125_p1 = scmp.ne.s32.totalorder %s44_s1, %s5124_s21  ;;  %p5130_p3 = scmp.lt.s32.totalorder %s5124_s21, %s5124_s21 }
  0x29   :  { %p5131_p4 = por %p5130_p3, %p5129_p2 }
  0x2b   :  { %p5132_p5 = pnand %p5131_p4, %p5125_p1 }
  0x2d   :  { %5135 = shalt.err (!%p5132_p5)
}
  0x2e   :  { %s5192_s3 = smov 384   ;;  %s5193_s22 = smov 24  }
  0x2f   :  { %49 = dma.hbm_to_vmem [thread:$0]  %s7451_s2, 6144, %s44_s1, [#allocation6], %s5192_s3, %s5192_s3, %s5193_s22  }
  0x30   :  { %s5194_s25 = smov [#allocation10]  }
  0x31   :  { %s71_s26 = sshll.u32 %s5194_s25, 4  ;;  %s72_s26 = int_to_ptr.vmem [resolvable:$true] %s71_s26 }
  0x32   :  { %s5144_s29 = scalar_lea.vmem %s72_s26, 2048  ;;  %p5149_p7 = scmp.lt.s32.totalorder %s72_s26, %s72_s26 }
  0x33   :  { %p5145_p6 = scmp.ne.s32.totalorder %s72_s26, %s5144_s29  ;;  %p5150_p8 = scmp.lt.s32.totalorder %s5144_s29, %s5144_s29 }
  0x35   :  { %p5151_p9 = por %p5150_p8, %p5149_p7 }
  0x37   :  { %p5152_p10 = pnand %p5151_p9, %p5145_p6 }
  0x39   :  { %5155 = shalt.err (!%p5152_p10)
}
  0x3a   :  { %77 = dma.hbm_to_vmem [thread:$0]  %s7455_s6, 2048, %s72_s26, [#allocation9], %s5185_s27, %s5185_s27, %s5186_s28  }
  0x3b   :  { %5176 = dma.done.wait [#allocation3], 32  }
  0x3c   :  { %5177 = vsyncadd [#allocation3], 4294967264 }
  0x3d   :  { %5178 = dma.done.wait [#allocation6], 6400  }
  0x3e   :  { %5179 = vsyncadd [#allocation6], 4294960896 }
  0x3f   :  { %5180 = dma.done.wait [#allocation9], 6144  }
  0x40   :  { %5181 = vsyncadd [#allocation9], 4294961152  ;;  %v7471_v0 = vmov 0.0   ;;  %v160_v1 = vld [vmem:[#allocation7 + $0x170] sm:$0xff]  ;;  %v159_v2 = vld [vmem:[#allocation7 + $0x168] sm:$0xff]  ;;  %vm5196_vm0 = vmmov 0  }
  0x41   :  { %258 = vmatprep.mubr.f32.mxu0 %v7471_v0  ;;  %494 = vmatprep.mubr.f32.mxu1 %v7471_v0  ;;  %v157_v3 = vld [vmem:[#allocation7 + $0x158] sm:$0xff]  ;;  %v5262_v4 = vand.u32 4294901760, %v160_v1  ;;  %v5264_v5 = vand.u32 4294901760, %v159_v2  ;;  %v156_v7 = vld [vmem:[#allocation7 + $0x150] sm:$0xff]  ;;  %v154_v8 = vld [vmem:[#allocation7 + $0x140] sm:$0xff]  ;;  %vm4009_vm1 = vcmask 1041409  }
  0x42   :  { %v5266_v6 = vand.u32 4294901760, %v157_v3  ;;  %v153_v9 = vld [vmem:[#allocation7 + $0x138] sm:$0xff]  ;;  %v5268_v10 = vand.u32 4294901760, %v156_v7  ;;  %v5270_v11 = vand.u32 4294901760, %v154_v8  ;;  %v151_v13 = vld [vmem:[#allocation7 + $0x128] sm:$0xff]  ;;  %v150_v14 = vld [vmem:[#allocation7 + $0x120] sm:$0xff] }
  0x43   :  { %v5272_v12 = vand.u32 4294901760, %v153_v9  ;;  %v148_v15 = vld [vmem:[#allocation7 + $0x110] sm:$0xff]  ;;  %163 = vmatprep.subr.mxu0 %v5262_v4  ;;  %v5275_v16 = vand.u32 4294901760, %v151_v13  ;;  %v5277_v17 = vand.u32 4294901760, %v150_v14  ;;  %v5282_v19 = vsub.f32 %v160_v1, %v5262_v4  ;;  %v5284_v20 = vld [vmem:[#allocation7 + $0x108] sm:$0xff]  ;;  %v5286_v21 = vld [vmem:[#allocation7 + $0xf8] sm:$0xff] }
  0x44   :  { %v5279_v18 = vand.u32 4294901760, %v148_v15  ;;  %v5288_v22 = vld [vmem:[#allocation7 + $0xf0] sm:$0xff]  ;;  %165 = vmatpush1.msra.mxu0 %v5264_v5  ;;  %v5292_v23 = vand.u32 4294901760, %v5284_v20  ;;  %v5295_v24 = vsub.f32 %v159_v2, %v5264_v5  ;;  %v5298_v25 = vand.u32 4294901760, %v5286_v21  ;;  %v5303_v27 = vld [vmem:[#allocation7 + $0xe0] sm:$0xff]  ;;  %v5305_v28 = vld [vmem:[#allocation7 + $0xd8] sm:$0xff] }
  0x45   :  { %v5301_v26 = vsub.f32 %v157_v3, %v5266_v6  ;;  %v5307_v29 = vld [vmem:[#allocation7 + $0xc8] sm:$0xff]  ;;  %167 = vmatprep.subr.mxu0 %v5266_v6  ;;  %v7469_v30 = vand.u32 4294901760, %v5282_v19  ;;  %v5312_v31 = vand.u32 4294901760, %v5288_v22  ;;  %v5315_v32 = vsub.f32 %v156_v7, %v5268_v10  ;;  %v5329_v38 = vld [vmem:[#allocation7 + $0xc0] sm:$0xff]  ;;  %v5353_v47 = vld [vmem:[#allocation7 + $0xb0] sm:$0xff] }
  0x46   :  { %v5318_v33 = vand.u32 4294901760, %v5303_v27  ;;  %169 = vmatpush1.msra.mxu0 %v5268_v10  ;;  %v7468_v34 = vand.u32 4294901760, %v5295_v24  ;;  %v5324_v36 = vsub.f32 %v154_v8, %v5270_v11  ;;  %v5327_v37 = vand.u32 4294901760, %v5305_v28  ;;  %v5363_v52 = vld [vmem:[#allocation7 + $0xa8] sm:$0xff]  ;;  %v5370_v57 = vld [vmem:[#allocation7 + $0x98] sm:$0xff]  ;;  %v5382_v62 = vld [vmem:[#allocation7 + $0x90] sm:$0xff] }
  0x47   :  { %7637 = vst [vmem:[#allocation16_spill] sm:$0xff] %v5312_v31  ;;  %v7466_v35 = vand.u32 4294901760, %v5301_v26  ;;  %171 = vmatprep.subr.mxu0 %v5270_v11  ;;  %v273_v39 = vsub.f32 %v5282_v19, %v7469_v30  ;;  %v7464_v40 = vand.u32 4294901760, %v5315_v32  ;;  %v5337_v41 = vsub.f32 %v153_v9, %v5272_v12  ;;  %v5394_v7 = vld [vmem:[#allocation7 + $0x80] sm:$0xff] }
  0x48   :  { %7638 = vst [vmem:[#allocation17_spill] sm:$0xff] %v5318_v33  ;;  %7639 = vst [vmem:[#allocation18_spill] sm:$0xff] %v5327_v37  ;;  %v5340_v42 = vand.u32 4294901760, %v5307_v29  ;;  %173 = vmatpush1.msra.mxu0 %v5272_v12  ;;  %v279_v43 = vsub.f32 %v5295_v24, %v7468_v34  ;;  %v7463_v45 = vand.u32 4294901760, %v5324_v36  ;;  %v5351_v46 = vsub.f32 %v151_v13, %v5275_v16  ;;  %v5495_v34 = vld [vmem:[#allocation7 + $0x30] sm:$0xff] }
  0x49   :  { %v285_v44 = vsub.f32 %v5301_v26, %v7466_v35  ;;  %175 = vmatprep.subr.mxu0 %v5275_v16  ;;  %v274_v48 = vand.u32 4294901760, %v273_v39  ;;  %v291_v49 = vsub.f32 %v5315_v32, %v7464_v40  ;;  %v7461_v50 = vand.u32 4294901760, %v5337_v41  ;;  %v5485_v35 = vld [vmem:[#allocation7 + $0x38] sm:$0xff] }
  0x4a   :  { %7640 = vst [vmem:[#allocation19_spill] sm:$0xff] %v5340_v42  ;;  %v5361_v51 = vand.u32 4294901760, %v5329_v38  ;;  %177 = vmatpush1.msra.mxu0 %v5277_v17  ;;  %v280_v53 = vand.u32 4294901760, %v279_v43  ;;  %v297_v55 = vsub.f32 %v5324_v36, %v7463_v45  ;;  %v7459_v56 = vand.u32 4294901760, %v5351_v46  ;;  %v5472_v45 = vld [vmem:[#allocation7 + $0x48] sm:$0xff] }
  0x4b   :  { %v286_v54 = vand.u32 4294901760, %v285_v44  ;;  %179 = vmatprep.subr.mxu0 %v5279_v18  ;;  %275 = vmatprep.subr.mxu1 %v274_v48  ;;  %v292_v58 = vand.u32 4294901760, %v291_v49  ;;  %v303_v59 = vsub.f32 %v5337_v41, %v7461_v50  ;;  %v5377_v60 = vsub.f32 %v150_v14, %v5277_v17 }
  0x4c   :  { %7641 = vst [vmem:[#allocation20_spill] sm:$0xff] %v5361_v51  ;;  %v5380_v61 = vand.u32 4294901760, %v5353_v47  ;;  %181 = vmatpush1.msra.mxu0 %v5292_v23  ;;  %281 = vmatpush1.msra.mxu1 %v280_v53  ;;  %v298_v63 = vand.u32 4294901760, %v297_v55  ;;  %v309_v1 = vsub.f32 %v5351_v46, %v7459_v56  ;;  %v5389_v2 = vsub.f32 %v148_v15, %v5279_v18  ;;  %v5405_v15 = vld [vmem:[#allocation7 + $0x78] sm:$0xff] }
  0x4d   :  { %v5392_v3 = vand.u32 4294901760, %v5363_v52  ;;  %183 = vmatprep.subr.mxu0 %v5298_v25  ;;  %287 = vmatprep.subr.mxu1 %v286_v54  ;;  %v304_v8 = vand.u32 4294901760, %v303_v59  ;;  %v7458_v9 = vand.u32 4294901760, %v5377_v60  ;;  %v5400_v13 = vsub.f32 %v5284_v20, %v5292_v23 }
  0x4e   :  { %7642 = vst [vmem:[#allocation21_spill] sm:$0xff] %v5380_v61  ;;  %v5403_v14 = vand.u32 4294901760, %v5370_v57  ;;  %185 = vmatpush1.msra.mxu0 %v5312_v31  ;;  %293 = vmatpush1.msra.mxu1 %v292_v58  ;;  %v310_v39 = vand.u32 4294901760, %v309_v1  ;;  %v7457_v43 = vand.u32 4294901760, %v5389_v2  ;;  %v5411_v44 = vsub.f32 %v5286_v21, %v5298_v25  ;;  %v5428_v21 = vld [vmem:[#allocation7 + $0x68] sm:$0xff] }
  0x4f   :  { %7643 = vst [vmem:[#allocation22_spill] sm:$0xff] %v5392_v3  ;;  %v5414_v48 = vand.u32 4294901760, %v5382_v62  ;;  %187 = vmatprep.subr.mxu0 %v5318_v33  ;;  %299 = vmatprep.subr.mxu1 %v298_v63  ;;  %v315_v20 = vsub.f32 %v5377_v60, %v7458_v9  ;;  %v7460_v49 = vand.u32 4294901760, %v5400_v13  ;;  %v5423_v53 = vsub.f32 %v5288_v22, %v5312_v31  ;;  %v5451_v9 = vld [vmem:[#allocation7 + $0x60] sm:$0xff] }
  0x50   :  { %7644 = vst [vmem:[#allocation23_spill] sm:$0xff] %v5403_v14  ;;  %v5426_v54 = vand.u32 4294901760, %v5394_v7  ;;  %189 = vmatpush1.msra.mxu0 %v5327_v37  ;;  %305 = vmatpush1.msra.mxu1 %v304_v8  ;;  %v321_v55 = vsub.f32 %v5389_v2, %v7457_v43  ;;  %v7462_v58 = vand.u32 4294901760, %v5411_v44  ;;  %v5437_v59 = vsub.f32 %v5303_v27, %v5318_v33  ;;  %v93_v33 = vld [vmem:[#allocation2] sm:$0x3] }
  0x51   :  { %7645 = vst [vmem:[#allocation24_spill] sm:$0xff] %v5414_v48  ;;  %v5440_v22 = vand.u32 4294901760, %v5405_v15  ;;  %191 = vmatprep.subr.mxu0 %v5340_v42  ;;  %311 = vmatprep.subr.mxu1 %v310_v39  ;;  %v316_v63 = vand.u32 4294901760, %v315_v20  ;;  %v327_v1 = vsub.f32 %v5400_v13, %v7460_v49  ;;  %v7465_v8 = vand.u32 4294901760, %v5423_v53  ;;  %v5461_v49 = vld [vmem:[#allocation7 + $0x50] sm:$0xff] }
  0x52   :  { %7646 = vst [vmem:[#allocation25_spill] sm:$0xff] %v5426_v54  ;;  %v5449_v43 = vsub.f32 %v5305_v28, %v5327_v37  ;;  %193 = vmatpush1.msra.mxu0 %v5361_v51  ;;  %v322_v27 = vand.u32 4294901760, %v321_v55  ;;  %v333_v39 = vsub.f32 %v5411_v44, %v7462_v58  ;;  %v7467_v20 = vand.u32 4294901760, %v5437_v59 }
  0x53   :  { %7647 = vst [vmem:[#allocation26_spill] sm:$0xff] %v5440_v22  ;;  %v5459_v56 = vand.u32 4294901760, %v5428_v21  ;;  %317 = vmatpush1.msra.mxu1 %v316_v63  ;;  %195 = vmatprep.subr.mxu0 %v5380_v61  ;;  %v328_v28 = vand.u32 4294901760, %v327_v1  ;;  %v339_v50 = vsub.f32 %v5423_v53, %v7465_v8  ;;  %v5470_v58 = vsub.f32 %v5307_v29, %v5340_v42 }
  0x54   :  { %v7470_v55 = vand.u32 4294901760, %v5449_v43  ;;  %323 = vmatprep.subr.mxu1 %v322_v27  ;;  %197 = vmatpush1.msra.mxu0 %v5392_v3  ;;  %v334_v40 = vand.u32 4294901760, %v333_v39  ;;  %v345_v63 = vsub.f32 %v5437_v59, %v7467_v20  ;;  %v5479_v1 = vand.u32 4294901760, %v5451_v9 }
  0x55   :  { %7648 = vst [vmem:[#allocation27_spill] sm:$0xff] %v5459_v56  ;;  %v5483_v8 = vsub.f32 %v5329_v38, %v5361_v51  ;;  %329 = vmatpush1.msra.mxu1 %v328_v28  ;;  %199 = vmatprep.subr.mxu0 %v5403_v14  ;;  %v340_v29 = vand.u32 4294901760, %v339_v50  ;;  %v7475_v39 = vand.u32 4294901760, %v5470_v58  ;;  %v5493_v20 = vand.u32 4294901760, %v5461_v49 }
  0x56   :  { %7649 = vst [vmem:[#allocation28_spill] sm:$0xff] %v5479_v1  ;;  %v351_v27 = vsub.f32 %v5449_v43, %v7470_v55  ;;  %335 = vmatprep.subr.mxu1 %v334_v40  ;;  %201 = vmatpush1.msra.mxu0 %v5414_v48  ;;  %v346_v38 = vand.u32 4294901760, %v345_v63  ;;  %v5501_v50 = vsub.f32 %v5353_v47, %v5380_v61  ;;  %v5504_v30 = vand.u32 4294901760, %v5472_v45  ;;  %v5506_v55 = vld [vmem:[#allocation7 + $0x20] sm:$0xff] }
  0x57   :  { %7650 = vst [vmem:[#allocation29_spill] sm:$0xff] %v5493_v20  ;;  %v7478_v28 = vand.u32 4294901760, %v5483_v8  ;;  %341 = vmatpush1.msra.mxu1 %v340_v29  ;;  %203 = vmatprep.subr.mxu0 %v5426_v54  ;;  %v357_v40 = vsub.f32 %v5470_v58, %v7475_v39  ;;  %v5514_v63 = vsub.f32 %v5363_v52, %v5392_v3  ;;  %v5517_v47 = vand.u32 4294901760, %v5485_v35  ;;  %v5531_v52 = vld [vmem:[#allocation7 + $0x18] sm:$0xff] }
  0x58   :  { %7651 = vst [vmem:[#allocation30_spill] sm:$0xff] %v5504_v30  ;;  %v352_v0 = vand.u32 4294901760, %v351_v27  ;;  %347 = vmatprep.subr.mxu1 %v346_v38  ;;  %205 = vmatpush1.msra.mxu0 %v5440_v22  ;;  %v5526_v61 = vsub.f32 %v5370_v57, %v5403_v14  ;;  %v5529_v39 = vand.u32 4294901760, %v5495_v34  ;;  %v5540_v27 = vand.u32 4294901760, %v5506_v55  ;;  %v5542_v57 = vld [vmem:[#allocation7 + $0x8] sm:$0xff] }
  0x59   :  { %7652 = vst [vmem:[#allocation31_spill] sm:$0xff] %v5517_v47  ;;  %v363_v29 = vsub.f32 %v5483_v8, %v7478_v28  ;;  %207 = vmatprep.subr.mxu0 %v5459_v56  ;;  %v358_v38 = vand.u32 4294901760, %v357_v40  ;;  %v5537_v28 = vsub.f32 %v5382_v62, %v5414_v48  ;;  %v7655_v51 = vand.u32 4294901760, %v5501_v50  ;;  %v5565_v40 = vld [vmem:[#allocation7] sm:$0xff] }
  0x5a   :  { %7653 = vst [vmem:[#allocation32_spill] sm:$0xff] %v5529_v39  ;;  %353 = vmatpush1.msra.mxu1 %v352_v0  ;;  %7654 = vst [vmem:[#allocation33_spill] sm:$0xff] %v5540_v27  ;;  %209 = vmatpush1.msra.mxu0 %v5479_v1  ;;  %v5551_v3 = vsub.f32 %v5394_v7, %v5426_v54  ;;  %v7656_v62 = vand.u32 4294901760, %v5514_v63  ;;  %v5573_v42 = vand.u32 4294901760, %v5542_v57  ;;  %v5589_v31 = vand.u32 4294901760, %v5565_v40 }
  0x5b   :  { %v364_v14 = vand.u32 4294901760, %v363_v29  ;;  %v369_v0 = vsub.f32 %v5501_v50, %v7655_v51  ;;  %359 = vmatprep.subr.mxu1 %v358_v38  ;;  %211 = vmatprep.subr.mxu0 %v5493_v20  ;;  %v5559_v29 = vand.u32 4294901760, %v5531_v52  ;;  %v5563_v51 = vsub.f32 %v5405_v15, %v5440_v22 }
  0x5c   :  { %v375_v48 = vsub.f32 %v5514_v63, %v7656_v62  ;;  %213 = vmatpush1.msra.mxu0 %v5504_v30  ;;  %v7657_v38 = vand.u32 4294901760, %v5526_v61  ;;  %v7497_v62 = vand.u32 4294901760, %v5551_v3  ;;  %v7658_v15 = vand.u32 4294901760, %v5537_v28 }
  0x5d   :  { %365 = vmatpush1.msra.mxu1 %v364_v14  ;;  %v370_v7 = vand.u32 4294901760, %v369_v0  ;;  %215 = vmatprep.subr.mxu0 %v5517_v47  ;;  %v5582_v0 = vsub.f32 %v5428_v21, %v5459_v56  ;;  %v7659_v21 = vand.u32 4294901760, %v5563_v51 }
  0x5e   :  { %v381_v54 = vsub.f32 %v5526_v61, %v7657_v38  ;;  %v376_v37 = vand.u32 4294901760, %v375_v48  ;;  %v387_v22 = vsub.f32 %v5537_v28, %v7658_v15  ;;  %217 = vmatpush1.msra.mxu0 %v5529_v39  ;;  %v393_v48 = vsub.f32 %v5551_v3, %v7497_v62 }
  0x5f   :  { %371 = vmatprep.subr.mxu1 %v370_v7  ;;  %v5593_v15 = vsub.f32 %v5451_v9, %v5479_v1  ;;  %219 = vmatprep.subr.mxu0 %v5540_v27  ;;  %v7500_v7 = vand.u32 4294901760, %v5582_v0  ;;  %v5602_v62 = vsub.f32 %v5461_v49, %v5493_v20 }
  0x60   :  { %v382_v38 = vand.u32 4294901760, %v381_v54  ;;  %377 = vmatpush1.msra.mxu1 %v376_v37  ;;  %v388_v14 = vand.u32 4294901760, %v387_v22  ;;  %v399_v54 = vsub.f32 %v5563_v51, %v7659_v21  ;;  %v394_v56 = vand.u32 4294901760, %v393_v48  ;;  %221 = vmatpush1.msra.mxu0 %v5559_v29 }
  0x61   :  { %v7503_v9 = vand.u32 4294901760, %v5593_v15  ;;  %v5606_v37 = vand.u32 4294901760, %v93_v33  ;;  %v5610_v22 = vsub.f32 %v5472_v45, %v5504_v30  ;;  %223 = vmatprep.subr.mxu0 %v5573_v42  ;;  %v405_v49 = vsub.f32 %v5582_v0, %v7500_v7 }
  0x62   :  { %383 = vmatprep.subr.mxu1 %v382_v38  ;;  %v400_v21 = vand.u32 4294901760, %v399_v54  ;;  %v5619_v48 = vsub.f32 %v5485_v35, %v5517_v47  ;;  %225 = vmatpush1.msra.mxu0 %v5589_v31  ;;  %v5631_v7 = vsub.f32 %v5495_v34, %v5529_v39  ;;  %v7661_v35 = vand.u32 4294901760, %v5602_v62 }
  0x63   :  { %7660 = vst [vmem:[#allocation34_spill] sm:$0xff] %v5606_v37  ;;  %389 = vmatpush1.msra.mxu1 %v388_v14  ;;  %v411_v45 = vsub.f32 %v5593_v15, %v7503_v9  ;;  %v5626_v14 = vsub.f32 %v93_v33, %v5606_v37  ;;  %v406_v38 = vand.u32 4294901760, %v405_v49  ;;  %504 = vmatprep.subr.mxu0 %v5282_v19  ;;  %v7663_v34 = vand.u32 4294901760, %v5610_v22 }
  0x64   :  { %395 = vmatprep.subr.mxu1 %v394_v56  ;;  %v417_v56 = vsub.f32 %v5602_v62, %v7661_v35  ;;  %v7510_v47 = vand.u32 4294901760, %v5619_v48  ;;  %v5640_v33 = vsub.f32 %v5506_v55, %v5540_v27  ;;  %v7511_v49 = vand.u32 4294901760, %v5631_v7 }
  0x65   :  { %401 = vmatpush1.msra.mxu1 %v400_v21  ;;  %v412_v9 = vand.u32 4294901760, %v411_v45  ;;  %v5643_v54 = vand.u32 4294901760, %v5626_v14  ;;  %v423_v21 = vsub.f32 %v5610_v22, %v7663_v34  ;;  %v5655_v55 = vsub.f32 %v5531_v52, %v5559_v29 }
  0x66   :  { %407 = vmatprep.subr.mxu1 %v406_v38  ;;  %v418_v35 = vand.u32 4294901760, %v417_v56  ;;  %v429_v39 = vsub.f32 %v5619_v48, %v7510_v47  ;;  %v7517_v30 = vand.u32 4294901760, %v5640_v33  ;;  %v435_v38 = vsub.f32 %v5631_v7, %v7511_v49 }
  0x67   :  { %7662 = vst [vmem:[#allocation35_spill] sm:$0xff] %v5643_v54  ;;  %7664 = vst [vmem:[#allocation36_spill] sm:$0xff] %v5655_v55  ;;  %413 = vmatpush1.msra.mxu1 %v412_v9  ;;  %v262_v45 = vsub.f32 %v5626_v14, %v5643_v54  ;;  %v424_v27 = vand.u32 4294901760, %v423_v21  ;;  %v5664_v56 = vsub.f32 %v5542_v57, %v5573_v42  ;;  %v7516_v9 = vand.u32 4294901760, %v5655_v55 }
  0x68   :  { %419 = vmatprep.subr.mxu1 %v418_v35  ;;  %v430_v34 = vand.u32 4294901760, %v429_v39  ;;  %v441_v52 = vsub.f32 %v5640_v33, %v7517_v30  ;;  %v5672_v47 = vsub.f32 %v5565_v40, %v5589_v31  ;;  %v436_v49 = vand.u32 4294901760, %v435_v38  ;;  %v7679_v30 = vld [vmem:[#allocation27_spill] sm:$0xff] }
  0x69   :  { %v5674_v21 = vand.u32 4294901760, %v262_v45  ;;  %425 = vmatpush1.msra.mxu1 %v424_v27  ;;  %v7515_v54 = vand.u32 4294901760, %v5664_v56  ;;  %v447_v39 = vsub.f32 %v5655_v55, %v7516_v9  ;;  %v7678_v9 = vld [vmem:[#allocation26_spill] sm:$0xff] }
  0x6a   :  { %7665 = vst [vmem:[#allocation37_spill] sm:$0xff] %v5672_v47  ;;  %431 = vmatprep.subr.mxu1 %v430_v34  ;;  %v442_v57 = vand.u32 4294901760, %v441_v52  ;;  %v7514_v35 = vand.u32 4294901760, %v5672_v47  ;;  %v7667_v34 = vmov 0.0   ;;  %v7668_v52 = vld [vmem:[#allocation16_spill] sm:$0xff] }
  0x6b   :  { %7666 = vst [vmem:[#allocation38_spill] sm:$0xff] %v5674_v21  ;;  %264 = vmatmul.mubr.f32.vlgmr.msra.gmra.mxu0 %v5674_v21  ;;  %437 = vmatpush1.msra.mxu1 %v436_v49  ;;  %v453_v40 = vsub.f32 %v5664_v56, %v7515_v54  ;;  %v448_v27 = vand.u32 4294901760, %v447_v39  ;;  %v7670_v39 = vld [vmem:[#allocation18_spill] sm:$0xff]  ;;  %v7677_v54 = vld [vmem:[#allocation25_spill] sm:$0xff]  ;;  %v7680_v21 = vand.u32 4294901760, %v5282_v19  ;;  %v7688_v19 = vand.u32 4294901760, %v5324_v36 }
  0x6c   :  { %507 = vmatpush1.msra.mxu0 %v5295_v24  ;;  %443 = vmatprep.subr.mxu1 %v442_v57  ;;  %v459_v45 = vsub.f32 %v5672_v47, %v7514_v35  ;;  %v7669_v57 = vld [vmem:[#allocation17_spill] sm:$0xff]  ;;  %v7676_v35 = vld [vmem:[#allocation24_spill] sm:$0xff] }
  0x6d   :  { %510 = vmatprep.subr.mxu0 %v5301_v26  ;;  %v454_v38 = vand.u32 4294901760, %v453_v40  ;;  %630 = vmatprep.mubr.f32.mxu0 %v7667_v34  ;;  %v7671_v40 = vld [vmem:[#allocation19_spill] sm:$0xff] }
  0x6e   :  { %513 = vmatpush1.msra.mxu0 %v5315_v32  ;;  %449 = vmatpush1.msra.mxu1 %v448_v27  ;;  %v460_v49 = vand.u32 4294901760, %v459_v45  ;;  %v7672_v27 = vld [vmem:[#allocation20_spill] sm:$0xff]  ;;  %v7673_v45 = vld [vmem:[#allocation21_spill] sm:$0xff] }
  0x6f   :  { %516 = vmatprep.subr.mxu0 %v5324_v36  ;;  %455 = vmatprep.subr.mxu1 %v454_v38  ;;  %v7674_v38 = vld [vmem:[#allocation22_spill] sm:$0xff]  ;;  %v7693_v36 = vand.u32 4294901760, %v5389_v2 }
  0x70   :  { %519 = vmatpush1.msra.mxu0 %v5337_v41  ;;  %461 = vmatpush1.msra.mxu1 %v460_v49  ;;  %v7675_v49 = vld [vmem:[#allocation23_spill] sm:$0xff] }
  0x71   :  { %522 = vmatprep.subr.mxu0 %v5351_v46  ;;  %496 = vmatmul.mubr.f32.vlgmr.msra.gmra.mxu1 %v5606_v37  ;;  %v7681_v37 = vld [vmem:[#allocation30_spill] sm:$0xff] }
  0x72   :  { %525 = vmatpush1.msra.mxu0 %v5377_v60  ;;  %640 = vmatprep.subr.mxu1 %v5262_v4 }
  0x73   :  { %528 = vmatprep.subr.mxu0 %v5389_v2  ;;  %642 = vmatpush1.msra.mxu1 %v5264_v5  ;;  %v7697_v2 = vand.u32 4294901760, %v5437_v59 }
  0x74   :  { %531 = vmatpush1.msra.mxu0 %v5400_v13  ;;  %644 = vmatprep.subr.mxu1 %v5266_v6 }
  0x75   :  { %534 = vmatprep.subr.mxu0 %v5411_v44  ;;  %646 = vmatpush1.msra.mxu1 %v5268_v10 }
  0x76   :  { %537 = vmatpush1.msra.mxu0 %v5423_v53  ;;  %648 = vmatprep.subr.mxu1 %v5270_v11 }
  0x77   :  { %540 = vmatprep.subr.mxu0 %v5437_v59  ;;  %650 = vmatpush1.msra.mxu1 %v5272_v12  ;;  %v152_v59 = vld [vmem:[#allocation7 + $0x130] sm:$0xff] }
  0x78   :  { %543 = vmatpush1.msra.mxu0 %v5449_v43  ;;  %652 = vmatprep.subr.mxu1 %v5275_v16 }
  0x79   :  { %546 = vmatprep.subr.mxu0 %v5470_v58  ;;  %654 = vmatpush1.msra.mxu1 %v5277_v17 }
  0x7a   :  { %549 = vmatpush1.msra.mxu0 %v5483_v8  ;;  %656 = vmatprep.subr.mxu1 %v5279_v18 }
  0x7b   :  { %552 = vmatprep.subr.mxu0 %v5501_v50  ;;  %658 = vmatpush1.msra.mxu1 %v5292_v23 }
  0x7c   :  { %555 = vmatpush1.msra.mxu0 %v5514_v63  ;;  %660 = vmatprep.subr.mxu1 %v5298_v25 }
  0x7d   :  { %558 = vmatprep.subr.mxu0 %v5526_v61  ;;  %662 = vmatpush1.msra.mxu1 %v7668_v52 }
  0x7e   :  { %561 = vmatpush1.msra.mxu0 %v5537_v28  ;;  %664 = vmatprep.subr.mxu1 %v7669_v57 }
  0x7f   :  { %564 = vmatprep.subr.mxu0 %v5551_v3  ;;  %666 = vmatpush1.msra.mxu1 %v7670_v39 }
  0x80   :  { %567 = vmatpush1.msra.mxu0 %v5563_v51  ;;  %668 = vmatprep.subr.mxu1 %v7671_v40 }
  0x81   :  { %570 = vmatprep.subr.mxu0 %v5582_v0  ;;  %670 = vmatpush1.msra.mxu1 %v7672_v27 }
  0x82   :  { %573 = vmatpush1.msra.mxu0 %v5593_v15  ;;  %672 = vmatprep.subr.mxu1 %v7673_v45 }
  0x83   :  { %576 = vmatprep.subr.mxu0 %v5602_v62  ;;  %674 = vmatpush1.msra.mxu1 %v7674_v38 }
  0x84   :  { %579 = vmatpush1.msra.mxu0 %v5610_v22  ;;  %676 = vmatprep.subr.mxu1 %v7675_v49 }
  0x85   :  { %582 = vmatprep.subr.mxu0 %v5619_v48  ;;  %678 = vmatpush1.msra.mxu1 %v7676_v35 }
  0x86   :  { %585 = vmatpush1.msra.mxu0 %v5631_v7  ;;  %680 = vmatprep.subr.mxu1 %v7677_v54 }
  0x87   :  { %588 = vmatprep.subr.mxu0 %v5640_v33  ;;  %682 = vmatpush1.msra.mxu1 %v7678_v9  ;;  %v7682_v9 = vand.u32 4294901760, %v5295_v24  ;;  %v7689_v24 = vand.u32 4294901760, %v5337_v41  ;;  %v7694_v41 = vand.u32 4294901760, %v5400_v13  ;;  %v7706_v13 = vand.u32 4294901760, %v5563_v51 }
  0x88   :  { %591 = vmatpush1.msra.mxu0 %v5655_v55  ;;  %684 = vmatprep.subr.mxu1 %v7679_v30  ;;  %v7683_v55 = vld [vmem:[#allocation31_spill] sm:$0xff]  ;;  %v7684_v30 = vand.u32 4294901760, %v5301_v26  ;;  %v7690_v26 = vand.u32 4294901760, %v5351_v46  ;;  %v7695_v46 = vand.u32 4294901760, %v5411_v44  ;;  %v155_v44 = vld [vmem:[#allocation7 + $0x148] sm:$0xff]  ;;  %v5844_v51 = vand.u32 4294901760, %v152_v59 }
  0x89   :  { %594 = vmatprep.subr.mxu0 %v5664_v56  ;;  %686 = vmatpush1.msra.mxu1 %v5479_v1  ;;  %v7685_v1 = vld [vmem:[#allocation32_spill] sm:$0xff] }
  0x8a   :  { %597 = vmatpush1.msra.mxu0 %v5672_v47  ;;  %688 = vmatprep.subr.mxu1 %v5493_v20  ;;  %v7686_v47 = vand.u32 4294901760, %v5315_v32  ;;  %v7687_v20 = vld [vmem:[#allocation33_spill] sm:$0xff]  ;;  %v7692_v32 = vld [vmem:[#allocation35_spill] sm:$0xff] }
  0x8b   :  { %633 = vmatmul.mubr.f32.vlgmr.msra.gmra.mxu0 %v5626_v14  ;;  %748 = vmatprep.subr.mxu0 %v7680_v21  ;;  %v7719_v21 = vld [vmem:[#allocation37_spill] sm:$0xff] }
  0x8c   :  { %690 = vmatpush1.msra.mxu1 %v7681_v37  ;;  %752 = vmatpush1.msra.mxu0 %v7682_v9  ;;  %v7718_v9 = vld [vmem:[#allocation27_spill] sm:$0xff] }
  0x8d   :  { %692 = vmatprep.subr.mxu1 %v7683_v55  ;;  %756 = vmatprep.subr.mxu0 %v7684_v30  ;;  %v7691_v30 = vand.u32 4294901760, %v5377_v60  ;;  %v7696_v60 = vand.u32 4294901760, %v5423_v53  ;;  %v7710_v53 = vand.u32 4294901760, %v5610_v22 }
  0x8e   :  { %694 = vmatpush1.msra.mxu1 %v7685_v1  ;;  %760 = vmatpush1.msra.mxu0 %v7686_v47  ;;  %v7713_v47 = vand.u32 4294901760, %v5640_v33  ;;  %v146_v33 = vld [vmem:[#allocation7 + $0x100] sm:$0xff] }
  0x8f   :  { %696 = vmatprep.subr.mxu1 %v7687_v20  ;;  %764 = vmatprep.subr.mxu0 %v7688_v19  ;;  %v140_v19 = vld [vmem:[#allocation7 + $0xd0] sm:$0xff] }
  0x90   :  { %698 = vmatpush1.msra.mxu1 %v5559_v29  ;;  %768 = vmatpush1.msra.mxu0 %v7689_v24 }
  0x91   :  { %700 = vmatprep.subr.mxu1 %v5573_v42  ;;  %772 = vmatprep.subr.mxu0 %v7690_v26 }
  0x92   :  { %702 = vmatpush1.msra.mxu1 %v5589_v31  ;;  %735 = vmatprep.mubr.f32.mxu1 %v7667_v34 }
  0x93   :  { %776 = vmatpush1.msra.mxu0 %v7691_v30  ;;  %739 = vmatmul.mubr.f32.vlgmr.msra.gmra.mxu1 %v7692_v32 }
  0x94   :  { %780 = vmatprep.subr.mxu0 %v7693_v36  ;;  %914 = vmatprep.subr.mxu1 %v5262_v4  ;;  %v7698_v4 = vand.u32 4294901760, %v5449_v43  ;;  %v7709_v43 = vand.u32 4294901760, %v5602_v62  ;;  %v149_v62 = vld [vmem:[#allocation7 + $0x118] sm:$0xff] }
  0x95   :  { %784 = vmatpush1.msra.mxu0 %v7694_v41  ;;  %916 = vmatpush1.msra.mxu1 %v5264_v5  ;;  %v7699_v5 = vand.u32 4294901760, %v5470_v58  ;;  %v137_v41 = vld [vmem:[#allocation7 + $0xb8] sm:$0xff] }
  0x96   :  { %788 = vmatprep.subr.mxu0 %v7695_v46  ;;  %918 = vmatprep.subr.mxu1 %v5266_v6  ;;  %v7700_v6 = vand.u32 4294901760, %v5483_v8  ;;  %v7711_v8 = vand.u32 4294901760, %v5619_v48  ;;  %v7717_v48 = vand.u32 4294901760, %v5664_v56  ;;  %v5867_v56 = vsub.f32 %v152_v59, %v5844_v51 }
  0x97   :  { %792 = vmatpush1.msra.mxu0 %v7696_v60  ;;  %920 = vmatpush1.msra.mxu1 %v5268_v10  ;;  %v7701_v10 = vand.u32 4294901760, %v5501_v50  ;;  %v5898_v60 = vand.u32 4294901760, %v140_v19 }
  0x98   :  { %796 = vmatprep.subr.mxu0 %v7697_v2  ;;  %922 = vmatprep.subr.mxu1 %v5270_v11  ;;  %v7702_v11 = vand.u32 4294901760, %v5514_v63  ;;  %v5839_v63 = vand.u32 4294901760, %v155_v44  ;;  %v134_v2 = vld [vmem:[#allocation7 + $0xa0] sm:$0xff] }
  0x99   :  { %800 = vmatpush1.msra.mxu0 %v7698_v4  ;;  %924 = vmatpush1.msra.mxu1 %v5272_v12  ;;  %v7703_v12 = vand.u32 4294901760, %v5526_v61  ;;  %v7708_v61 = vand.u32 4294901760, %v5593_v15 }
  0x9a   :  { %804 = vmatprep.subr.mxu0 %v7699_v5  ;;  %926 = vmatprep.subr.mxu1 %v5275_v16  ;;  %v7704_v16 = vand.u32 4294901760, %v5537_v28  ;;  %v7712_v28 = vand.u32 4294901760, %v5631_v7  ;;  %v7716_v7 = vld [vmem:[#allocation26_spill] sm:$0xff] }
  0x9b   :  { %808 = vmatpush1.msra.mxu0 %v7700_v6  ;;  %928 = vmatpush1.msra.mxu1 %v5277_v17  ;;  %v7705_v17 = vand.u32 4294901760, %v5551_v3 }
  0x9c   :  { %812 = vmatprep.subr.mxu0 %v7701_v10  ;;  %930 = vmatprep.subr.mxu1 %v5279_v18  ;;  %v161_v18 = vld [vmem:[#allocation7 + $0x178] sm:$0xff] }
  0x9d   :  { %816 = vmatpush1.msra.mxu0 %v7702_v11  ;;  %932 = vmatpush1.msra.mxu1 %v5292_v23  ;;  %v7707_v23 = vand.u32 4294901760, %v5582_v0  ;;  %v5820_v3 = vand.u32 4294901760, %v161_v18  ;;  %v7714_v0 = vld [vmem:[#allocation36_spill] sm:$0xff]  ;;  %v5921_v11 = vsub.f32 %v140_v19, %v5898_v60 }
  0x9e   :  { %820 = vmatprep.subr.mxu0 %v7703_v12  ;;  %934 = vmatprep.subr.mxu1 %v5298_v25  ;;  %v158_v25 = vld [vmem:[#allocation7 + $0x160] sm:$0xff]  ;;  %v7715_v15 = vand.u32 4294901760, %v7714_v0  ;;  %v5923_v12 = vand.u32 4294901760, %v134_v2 }
  0x9f   :  { %824 = vmatpush1.msra.mxu0 %v7704_v16  ;;  %936 = vmatpush1.msra.mxu1 %v7668_v52  ;;  %v5828_v58 = vand.u32 4294901760, %v158_v25  ;;  %v5837_v50 = vsub.f32 %v161_v18, %v5820_v3  ;;  %v5861_v52 = vand.u32 4294901760, %v149_v62  ;;  %v1160_v59 = vand.u32 4294901760, %v5921_v11 }
  0xa0   :  { %828 = vmatprep.subr.mxu0 %v7705_v17  ;;  %938 = vmatprep.subr.mxu1 %v7669_v57  ;;  %v128_v17 = vld [vmem:[#allocation7 + $0x70] sm:$0xff] }
  0xa1   :  { %832 = vmatpush1.msra.mxu0 %v7706_v13  ;;  %940 = vmatpush1.msra.mxu1 %v7670_v39  ;;  %v5850_v22 = vsub.f32 %v158_v25, %v5828_v58  ;;  %v1111_v57 = vand.u32 4294901760, %v5837_v50  ;;  %v7721_v39 = vld [vmem:[#allocation28_spill] sm:$0xff]  ;;  %v5879_v24 = vsub.f32 %v149_v62, %v5861_v52 }
  0xa2   :  { %836 = vmatprep.subr.mxu0 %v7707_v23  ;;  %942 = vmatprep.subr.mxu1 %v7671_v40  ;;  %v7722_v40 = vld [vmem:[#allocation34_spill] sm:$0xff] }
  0xa3   :  { %840 = vmatpush1.msra.mxu0 %v7708_v61  ;;  %944 = vmatpush1.msra.mxu1 %v7672_v27  ;;  %v143_v27 = vld [vmem:[#allocation7 + $0xe8] sm:$0xff]  ;;  %v1112_v26 = vsub.f32 %v5837_v50, %v1111_v57  ;;  %v1139_v6 = vand.u32 4294901760, %v5879_v24 }
  0xa4   :  { %844 = vmatprep.subr.mxu0 %v7709_v43  ;;  %946 = vmatprep.subr.mxu1 %v7673_v45  ;;  %v7723_v45 = vld [vmem:[#allocation29_spill] sm:$0xff]  ;;  %v5884_v30 = vand.u32 4294901760, %v143_v27  ;;  %v5942_v43 = vsub.f32 %v134_v2, %v5923_v12 }
  0xa5   :  { %848 = vmatpush1.msra.mxu0 %v7710_v53  ;;  %948 = vmatpush1.msra.mxu1 %v7674_v38  ;;  %v5871_v38 = vand.u32 4294901760, %v146_v33  ;;  %v1140_v13 = vsub.f32 %v5879_v24, %v1139_v6  ;;  %v5947_v53 = vand.u32 4294901760, %v128_v17 }
  0xa6   :  { %852 = vmatprep.subr.mxu0 %v7711_v8  ;;  %950 = vmatprep.subr.mxu1 %v7675_v49  ;;  %v1118_v49 = vand.u32 4294901760, %v5850_v22  ;;  %v5907_v4 = vsub.f32 %v143_v27, %v5884_v30  ;;  %v125_v8 = vld [vmem:[#allocation7 + $0x58] sm:$0xff] }
  0xa7   :  { %856 = vmatpush1.msra.mxu0 %v7712_v28  ;;  %952 = vmatpush1.msra.mxu1 %v7676_v35  ;;  %v7720_v35 = vand.u32 4294901760, %v7719_v21  ;;  %v1141_v28 = vand.u32 4294901760, %v1140_v13  ;;  %v1174_v21 = vand.u32 4294901760, %v5942_v43 }
  0xa8   :  { %860 = vmatprep.subr.mxu0 %v7713_v47  ;;  %954 = vmatprep.subr.mxu1 %v7677_v54  ;;  %v5859_v54 = vsub.f32 %v155_v44, %v5839_v63  ;;  %v1119_v46 = vsub.f32 %v5850_v22, %v1118_v49  ;;  %v1153_v25 = vand.u32 4294901760, %v5907_v4 }
  0xa9   :  { %864 = vmatpush1.msra.mxu0 %v7715_v15  ;;  %956 = vmatpush1.msra.mxu1 %v7716_v7  ;;  %v122_v15 = vld [vmem:[#allocation7 + $0x40] sm:$0xff]  ;;  %v5962_v7 = vand.u32 4294901760, %v125_v8 }
  0xaa   :  { %868 = vmatprep.subr.mxu0 %v7717_v48  ;;  %958 = vmatprep.subr.mxu1 %v7718_v9  ;;  %v1125_v36 = vand.u32 4294901760, %v5859_v54  ;;  %v1120_v10 = vand.u32 4294901760, %v1119_v46  ;;  %v1154_v62 = vsub.f32 %v5907_v4, %v1153_v25  ;;  %v5966_v9 = vsub.f32 %v128_v17, %v5947_v53 }
  0xab   :  { %872 = vmatpush1.msra.mxu0 %v7720_v35  ;;  %905 = vmatprep.mubr.f32.mxu0 %v7667_v34  ;;  %v119_v35 = vld [vmem:[#allocation7 + $0x28] sm:$0xff] }
  0xac   :  { %960 = vmatpush1.msra.mxu1 %v7721_v39  ;;  %907 = vmatmul.mubr.f32.vlgmr.msra.gmra.mxu0 %v7722_v40  ;;  %v1126_v5 = vsub.f32 %v5859_v54, %v1125_v36  ;;  %v5974_v39 = vand.u32 4294901760, %v122_v15  ;;  %v1155_v27 = vand.u32 4294901760, %v1154_v62  ;;  %v5986_v46 = vand.u32 4294901760, %v119_v35 }
  0xad   :  { %962 = vmatprep.subr.mxu1 %v7723_v45  ;;  %4401 = vmatprep.subr.mxu0 %v7667_v34 }
  0xae   :  { %964 = vmatpush1.msra.mxu1 %v7681_v37  ;;  %4402 = vmatpush3.msra.mxu0 %v5820_v3  ;;  %v1132_v37 = vand.u32 4294901760, %v5867_v56  ;;  %v1127_v18 = vand.u32 4294901760, %v1126_v5  ;;  %v1188_v5 = vand.u32 4294901760, %v5966_v9 }
  0xaf   :  { %966 = vmatprep.subr.mxu1 %v7683_v55  ;;  %4403 = vmatprep.subr.mxu0 %v7667_v34  ;;  %v5893_v55 = vsub.f32 %v146_v33, %v5871_v38  ;;  %v1161_v33 = vsub.f32 %v5921_v11, %v1160_v59 }
  0xb0   :  { %968 = vmatpush1.msra.mxu1 %v7685_v1  ;;  %4404 = vmatpush3.msra.mxu0 %v5828_v58  ;;  %v5902_v1 = vand.u32 4294901760, %v137_v41 }
  0xb1   :  { %970 = vmatprep.subr.mxu1 %v7687_v20  ;;  %4405 = vmatprep.subr.mxu0 %v7667_v34  ;;  %v1113_v20 = vand.u32 4294901760, %v1112_v26  ;;  %v1146_v16 = vand.u32 4294901760, %v5893_v55  ;;  %v116_v26 = vld [vmem:[#allocation7 + $0x10] sm:$0xff]  ;;  %v1162_v2 = vand.u32 4294901760, %v1161_v33 }
  0xb2   :  { %972 = vmatpush1.msra.mxu1 %v5559_v29  ;;  %4406 = vmatpush3.msra.mxu0 %v5839_v63  ;;  %v131_v29 = vld [vmem:[#allocation7 + $0x88] sm:$0xff] }
  0xb3   :  { %974 = vmatprep.subr.mxu1 %v5573_v42  ;;  %4407 = vmatprep.subr.mxu0 %v7667_v34  ;;  %v1133_v42 = vsub.f32 %v5867_v56, %v1132_v37  ;;  %v5935_v23 = vand.u32 4294901760, %v131_v29  ;;  %v1147_v44 = vsub.f32 %v5893_v55, %v1146_v16 }
  0xb4   :  { %976 = vmatpush1.msra.mxu1 %v5589_v31  ;;  %1009 = vmatprep.mubr.f32.mxu1 %v7667_v34  ;;  %v5929_v31 = vsub.f32 %v137_v41, %v5902_v1  ;;  %v5984_v41 = vsub.f32 %v125_v8, %v5962_v7 }
  0xb5   :  { %4408 = vmatpush3.msra.mxu0 %v5844_v51  ;;  %1011 = vmatmul.mubr.f32.vlgmr.msra.gmra.mxu1 %v7722_v40  ;;  %v1134_v61 = vand.u32 4294901760, %v1133_v42  ;;  %v5954_v47 = vsub.f32 %v131_v29, %v5935_v23  ;;  %v1148_v48 = vand.u32 4294901760, %v1147_v44  ;;  %v5996_v42 = vsub.f32 %v122_v15, %v5974_v39 }
  0xb6   :  { %4409 = vmatprep.subr.mxu0 %v7667_v34  ;;  %4436 = vmatprep.subr.mxu1 %v7667_v34  ;;  %v1167_v0 = vand.u32 4294901760, %v5929_v31  ;;  %v5998_v29 = vand.u32 4294901760, %v116_v26  ;;  %v1195_v13 = vand.u32 4294901760, %v5984_v41  ;;  %v1189_v44 = vsub.f32 %v5966_v9, %v1188_v5 }
  0xb7   :  { %4410 = vmatpush3.msra.mxu0 %v5861_v52  ;;  %4437 = vmatpush3.msra.mxu1 %v1113_v20  ;;  %v1181_v19 = vand.u32 4294901760, %v5954_v47  ;;  %v1175_v20 = vsub.f32 %v5942_v43, %v1174_v21 }
  0xb8   :  { %4411 = vmatprep.subr.mxu0 %v7667_v34  ;;  %4438 = vmatprep.subr.mxu1 %v7667_v34  ;;  %v1168_v45 = vsub.f32 %v5929_v31, %v1167_v0  ;;  %v6017_v8 = vsub.f32 %v116_v26, %v5998_v29  ;;  %v1196_v15 = vsub.f32 %v5984_v41, %v1195_v13  ;;  %v1190_v33 = vand.u32 4294901760, %v1189_v44 }
  0xb9   :  { %4412 = vmatpush3.msra.mxu0 %v5871_v38  ;;  %4439 = vmatpush3.msra.mxu1 %v1120_v10  ;;  %v1182_v17 = vsub.f32 %v5954_v47, %v1181_v19 }
  0xba   :  { %4413 = vmatprep.subr.mxu0 %v7667_v34  ;;  %4440 = vmatprep.subr.mxu1 %v7667_v34  ;;  %v1169_v10 = vand.u32 4294901760, %v1168_v45  ;;  %v1197_v45 = vand.u32 4294901760, %v1196_v15 }
  0xbb   :  { %4414 = vmatpush3.msra.mxu0 %v5884_v30  ;;  %4441 = vmatpush3.msra.mxu1 %v1127_v18  ;;  %v6007_v18 = vsub.f32 %v119_v35, %v5986_v46  ;;  %v1183_v62 = vand.u32 4294901760, %v1182_v17 }
  0xbc   :  { %4415 = vmatprep.subr.mxu0 %v7667_v34  ;;  %4442 = vmatprep.subr.mxu1 %v7667_v34 }
  0xbd   :  { %4416 = vmatpush3.msra.mxu0 %v5898_v60  ;;  %4443 = vmatpush3.msra.mxu1 %v1134_v61  ;;  %v1176_v61 = vand.u32 4294901760, %v1175_v20 }
  0xbe   :  { %4417 = vmatprep.subr.mxu0 %v7667_v34  ;;  %4444 = vmatprep.subr.mxu1 %v7667_v34 }
  0xbf   :  { %4418 = vmatpush3.msra.mxu0 %v5902_v1  ;;  %4445 = vmatpush3.msra.mxu1 %v1141_v28  ;;  %v1202_v28 = vand.u32 4294901760, %v5996_v42 }
  0xc0   :  { %4419 = vmatprep.subr.mxu0 %v7667_v34  ;;  %4446 = vmatprep.subr.mxu1 %v7667_v34 }
  0xc1   :  { %4420 = vmatpush3.msra.mxu0 %v5923_v12  ;;  %4447 = vmatpush3.msra.mxu1 %v1148_v48  ;;  %v1209_v48 = vand.u32 4294901760, %v6007_v18  ;;  %v1203_v35 = vsub.f32 %v5996_v42, %v1202_v28 }
  0xc2   :  { %4421 = vmatprep.subr.mxu0 %v7667_v34  ;;  %4448 = vmatprep.subr.mxu1 %v7667_v34 }
  0xc3   :  { %4422 = vmatpush3.msra.mxu0 %v5935_v23  ;;  %4449 = vmatpush3.msra.mxu1 %v1155_v27  ;;  %v1216_v27 = vand.u32 4294901760, %v6017_v8  ;;  %v1210_v26 = vsub.f32 %v6007_v18, %v1209_v48 }
  0xc4   :  { %4423 = vmatprep.subr.mxu0 %v7667_v34  ;;  %4450 = vmatprep.subr.mxu1 %v7667_v34 }
  0xc5   :  { %4424 = vmatpush3.msra.mxu0 %v5947_v53  ;;  %4451 = vmatpush3.msra.mxu1 %v1162_v2  ;;  %v1204_v2 = vand.u32 4294901760, %v1203_v35  ;;  %v1217_v20 = vsub.f32 %v6017_v8, %v1216_v27  ;;  %v1211_v17 = vand.u32 4294901760, %v1210_v26 }
  0xc6   :  { %4425 = vmatprep.subr.mxu0 %v7667_v34  ;;  %4452 = vmatprep.subr.mxu1 %v7667_v34 }
  0xc7   :  { %4426 = vmatpush3.msra.mxu0 %v5962_v7  ;;  %4453 = vmatpush3.msra.mxu1 %v1169_v10  ;;  %v7724_v10 = vld [vmem:[#allocation38_spill] sm:$0xff] }
  0xc8   :  { %4427 = vmatprep.subr.mxu0 %v7667_v34  ;;  %4454 = vmatprep.subr.mxu1 %v7667_v34 }
  0xc9   :  { %4428 = vmatpush3.msra.mxu0 %v5974_v39  ;;  %4455 = vmatpush3.msra.mxu1 %v1176_v61  ;;  %v1218_v61 = vand.u32 4294901760, %v1217_v20 }
  0xca   :  { %4429 = vmatprep.subr.mxu0 %v7667_v34  ;;  %4456 = vmatprep.subr.mxu1 %v7667_v34 }
  0xcb   :  { %4430 = vmatpush3.msra.mxu0 %v5986_v46  ;;  %4457 = vmatpush3.msra.mxu1 %v1183_v62  ;;  %v1688_v62 = vld [vmem:[#allocation8 + $0x80] sm:$0xff] }
  0xcc   :  { %4431 = vmatprep.subr.mxu0 %v7667_v34  ;;  %4458 = vmatprep.subr.mxu1 %v7667_v34  ;;  %v6295_v20 = vand.u32 4294901760, %v1688_v62 }
  0xcd   :  { %4432 = vmatpush3.msra.mxu0 %v5998_v29  ;;  %4459 = vmatpush3.msra.mxu1 %v1190_v33 }
  0xce   :  { %4433 = vmatprep.mubr.msk.f32.mxu0 %vm5196_vm0, %v7667_v34  ;;  %4460 = vmatprep.subr.mxu1 %v7667_v34  ;;  %7734 = vst [vmem:[#allocation25_spill] sm:$0xff] %v6295_v20 }
  0xcf   :  { %4471 = vmatprep.subr.mxu0 %v7667_v34  ;;  %4434 = vmatmul.mubr.f32.vlgmr.msra.gmra.mxu0 %v7724_v10 }
  0xd0   :  { %4461 = vmatpush3.msra.mxu1 %v1197_v45  ;;  %4472 = vmatpush3.msra.mxu0 %v5837_v50  ;;  %v1689_v45 = vld [vmem:[#allocation8 + $0x88] sm:$0xff] }
  0xd1   :  { %4462 = vmatprep.subr.mxu1 %v7667_v34  ;;  %4473 = vmatprep.subr.mxu0 %v7667_v34 }
  0xd2   :  { %4463 = vmatpush3.msra.mxu1 %v1204_v2  ;;  %4474 = vmatpush3.msra.mxu0 %v5850_v22 }
  0xd3   :  { %4464 = vmatprep.subr.mxu1 %v7667_v34  ;;  %4475 = vmatprep.subr.mxu0 %v7667_v34 }
  0xd4   :  { %4465 = vmatpush3.msra.mxu1 %v1211_v17  ;;  %4476 = vmatpush3.msra.mxu0 %v5859_v54  ;;  %v1698_v54 = vld [vmem:[#allocation8 + $0xd0] sm:$0xff] }
  0xd5   :  { %4466 = vmatprep.subr.mxu1 %v7667_v34  ;;  %4477 = vmatprep.subr.mxu0 %v7667_v34 }
  0xd6   :  { %4467 = vmatpush3.msra.mxu1 %v1218_v61  ;;  %4468 = vmatprep.mubr.msk.f32.mxu1 %vm5196_vm0, %v7667_v34 }
  0xd7   :  { %4478 = vmatpush3.msra.mxu0 %v5867_v56  ;;  %4469 = vmatmul.mubr.f32.vlgmr.msra.gmra.mxu1 %v7722_v40  ;;  %v1697_v56 = vld [vmem:[#allocation8 + $0xc8] sm:$0xff] }
  0xd8   :  { %4479 = vmatprep.subr.mxu0 %v7667_v34  ;;  %4506 = vmatprep.subr.mxu1 %v7667_v34 }
  0xd9   :  { %4480 = vmatpush3.msra.mxu0 %v5879_v24  ;;  %4507 = vmatpush3.msra.mxu1 %v5820_v3  ;;  %v6186_v24 = vand.u32 4294901760, %v1698_v54 }
  0xda   :  { %4481 = vmatprep.subr.mxu0 %v7667_v34  ;;  %4508 = vmatprep.subr.mxu1 %v7667_v34 }
  0xdb   :  { %4482 = vmatpush3.msra.mxu0 %v5893_v55  ;;  %4509 = vmatpush3.msra.mxu1 %v5828_v58  ;;  %7725 = vst [vmem:[#allocation16_spill] sm:$0xff] %v6186_v24 }
  0xdc   :  { %4483 = vmatprep.subr.mxu0 %v7667_v34  ;;  %4510 = vmatprep.subr.mxu1 %v7667_v34 }
  0xdd   :  { %4484 = vmatpush3.msra.mxu0 %v5907_v4  ;;  %4511 = vmatpush3.msra.mxu1 %v5839_v63  ;;  %v6202_v4 = vand.u32 4294901760, %v1697_v56 }
  0xde   :  { %4485 = vmatprep.subr.mxu0 %v7667_v34  ;;  %4512 = vmatprep.subr.mxu1 %v7667_v34 }
  0xdf   :  { %4486 = vmatpush3.msra.mxu0 %v5921_v11  ;;  %4513 = vmatpush3.msra.mxu1 %v5844_v51  ;;  %7726 = vst [vmem:[#allocation17_spill] sm:$0xff] %v6202_v4  ;;  %v1694_v11 = vld [vmem:[#allocation8 + $0xb0] sm:$0xff] }
  0xe0   :  { %4487 = vmatprep.subr.mxu0 %v7667_v34  ;;  %4514 = vmatprep.subr.mxu1 %v7667_v34 }
  0xe1   :  { %4488 = vmatpush3.msra.mxu0 %v5929_v31  ;;  %4515 = vmatpush3.msra.mxu1 %v5861_v52 }
  0xe2   :  { %4489 = vmatprep.subr.mxu0 %v7667_v34  ;;  %4516 = vmatprep.subr.mxu1 %v7667_v34 }
  0xe3   :  { %4490 = vmatpush3.msra.mxu0 %v5942_v43  ;;  %4517 = vmatpush3.msra.mxu1 %v5871_v38 }
  0xe4   :  { %4491 = vmatprep.subr.mxu0 %v7667_v34  ;;  %4518 = vmatprep.subr.mxu1 %v7667_v34 }
  0xe5   :  { %4492 = vmatpush3.msra.mxu0 %v5954_v47  ;;  %4519 = vmatpush3.msra.mxu1 %v5884_v30  ;;  %v1693_v47 = vld [vmem:[#allocation8 + $0xa8] sm:$0xff] }
  0xe6   :  { %4493 = vmatprep.subr.mxu0 %v7667_v34  ;;  %4520 = vmatprep.subr.mxu1 %v7667_v34 }
  0xe7   :  { %4494 = vmatpush3.msra.mxu0 %v5966_v9  ;;  %4521 = vmatpush3.msra.mxu1 %v5898_v60 }
  0xe8   :  { %4495 = vmatprep.subr.mxu0 %v7667_v34  ;;  %4522 = vmatprep.subr.mxu1 %v7667_v34 }
  0xe9   :  { %4496 = vmatpush3.msra.mxu0 %v5984_v41  ;;  %4523 = vmatpush3.msra.mxu1 %v5902_v1  ;;  %v1691_v41 = vld [vmem:[#allocation8 + $0x98] sm:$0xff] }
  0xea   :  { %4497 = vmatprep.subr.mxu0 %v7667_v34  ;;  %4524 = vmatprep.subr.mxu1 %v7667_v34  ;;  %v6272_v33 = vand.u32 4294901760, %v1691_v41 }
  0xeb   :  { %4498 = vmatpush3.msra.mxu0 %v5996_v42  ;;  %4525 = vmatpush3.msra.mxu1 %v5923_v12  ;;  %v6236_v42 = vsub.f32 %v1697_v56, %v6202_v4 }
  0xec   :  { %4499 = vmatprep.subr.mxu0 %v7667_v34  ;;  %4526 = vmatprep.subr.mxu1 %v7667_v34  ;;  %7732 = vst [vmem:[#allocation23_spill] sm:$0xff] %v6272_v33 }
  0xed   :  { %4500 = vmatpush3.msra.mxu0 %v6007_v18  ;;  %4527 = vmatpush3.msra.mxu1 %v5935_v23  ;;  %v7526_v26 = vand.u32 4294901760, %v6236_v42 }
  0xee   :  { %4501 = vmatprep.subr.mxu0 %v7667_v34  ;;  %4528 = vmatprep.subr.mxu1 %v7667_v34 }
  0xef   :  { %4502 = vmatpush3.msra.mxu0 %v6017_v8  ;;  %4503 = vmatprep.mubr.msk.f32.mxu0 %vm5196_vm0, %v7667_v34 }
  0xf0   :  { %4529 = vmatpush3.msra.mxu1 %v5947_v53  ;;  %4504 = vmatmul.mubr.f32.vlgmr.msra.gmra.mxu0 %v5626_v14  ;;  %v1703_v14 = vld [vmem:[#allocation8 + $0xf8] sm:$0xff] }
  0xf1   :  { %4530 = vmatprep.subr.mxu1 %v7667_v34  ;;  %4541 = vmatprep.subr.mxu0 %v7667_v34  ;;  %v6163_v50 = vand.u32 4294901760, %v1703_v14 }
  0xf2   :  { %4531 = vmatpush3.msra.mxu1 %v5962_v7  ;;  %4542 = vmatpush3.msra.mxu0 %v1111_v57 }
  0xf3   :  { %4532 = vmatprep.subr.mxu1 %v7667_v34  ;;  %4543 = vmatprep.subr.mxu0 %v7667_v34 }
  0xf4   :  { %4533 = vmatpush3.msra.mxu1 %v5974_v39  ;;  %4544 = vmatpush3.msra.mxu0 %v1118_v49  ;;  %v1696_v49 = vld [vmem:[#allocation8 + $0xc0] sm:$0xff] }
  0xf5   :  { %4534 = vmatprep.subr.mxu1 %v7667_v34  ;;  %4545 = vmatprep.subr.mxu0 %v7667_v34 }
  0xf6   :  { %4535 = vmatpush3.msra.mxu1 %v5986_v46  ;;  %4546 = vmatpush3.msra.mxu0 %v1125_v36  ;;  %v1695_v36 = vld [vmem:[#allocation8 + $0xb8] sm:$0xff] }
  0xf7   :  { %4536 = vmatprep.subr.mxu1 %v7667_v34  ;;  %4547 = vmatprep.subr.mxu0 %v7667_v34 }
  0xf8   :  { %4537 = vmatpush3.msra.mxu1 %v5998_v29  ;;  %4538 = vmatprep.mubr.msk.f32.mxu1 %vm5196_vm0, %v7667_v34 }
  0xf9   :  { %4548 = vmatpush3.msra.mxu0 %v1132_v37  ;;  %4539 = vmatmul.mubr.f32.vlgmr.msra.gmra.mxu1 %v7692_v32  ;;  %v1702_v32 = vld [vmem:[#allocation8 + $0xf0] sm:$0xff]  ;;  %v6189_v37 = vsub.f32 %v1703_v14, %v6163_v50 }
  0xfa   :  { %4549 = vmatprep.subr.mxu0 %v7667_v34  ;;  %4576 = vmatprep.subr.mxu1 %v7667_v34 }
  0xfb   :  { %4550 = vmatpush3.msra.mxu0 %v1139_v6  ;;  %4577 = vmatpush3.msra.mxu1 %v5820_v3  ;;  %v1701_v3 = vld [vmem:[#allocation8 + $0xe8] sm:$0xff]  ;;  %v6204_v6 = vand.u32 4294901760, %v1696_v49  ;;  %v7534_v43 = vand.u32 4294901760, %v6189_v37 }
  0xfc   :  { %4551 = vmatprep.subr.mxu0 %v7667_v34  ;;  %4578 = vmatprep.subr.mxu1 %v7667_v34  ;;  %v6170_v22 = vand.u32 4294901760, %v1701_v3 }
  0xfd   :  { %4552 = vmatpush3.msra.mxu0 %v1146_v16  ;;  %4579 = vmatpush3.msra.mxu1 %v5828_v58  ;;  %v1700_v58 = vld [vmem:[#allocation8 + $0xe0] sm:$0xff]  ;;  %7727 = vst [vmem:[#allocation18_spill] sm:$0xff] %v6204_v6  ;;  %v6230_v9 = vsub.f32 %v1696_v49, %v6204_v6  ;;  %v6320_v49 = vsub.f32 %v1691_v41, %v6272_v33 }
  0xfe   :  { %4553 = vmatprep.subr.mxu0 %v7667_v34  ;;  %4580 = vmatprep.subr.mxu1 %v7667_v34  ;;  %v1692_v16 = vld [vmem:[#allocation8 + $0xa0] sm:$0xff] }
  0xff   :  { %4554 = vmatpush3.msra.mxu0 %v1153_v25  ;;  %4581 = vmatpush3.msra.mxu1 %v5839_v63  ;;  %v6165_v63 = vand.u32 4294901760, %v1702_v32  ;;  %v6217_v25 = vsub.f32 %v1698_v54, %v6186_v24  ;;  %v7525_v2 = vand.u32 4294901760, %v6230_v9  ;;  %v1686_v54 = vld [vmem:[#allocation8 + $0x70] sm:$0xff] }
 0x100   :  { %4555 = vmatprep.subr.mxu0 %v7667_v34  ;;  %4582 = vmatprep.subr.mxu1 %v7667_v34 }
 0x101   :  { %4556 = vmatpush3.msra.mxu0 %v1160_v59  ;;  %4583 = vmatpush3.msra.mxu1 %v5844_v51  ;;  %v1699_v51 = vld [vmem:[#allocation8 + $0xd8] sm:$0xff]  ;;  %v7528_v18 = vand.u32 4294901760, %v6217_v25 }
 0x102   :  { %4557 = vmatprep.subr.mxu0 %v7667_v34  ;;  %4584 = vmatprep.subr.mxu1 %v7667_v34  ;;  %v6179_v57 = vand.u32 4294901760, %v1699_v51 }
 0x103   :  { %4558 = vmatpush3.msra.mxu0 %v1167_v0  ;;  %4585 = vmatpush3.msra.mxu1 %v5861_v52  ;;  %v6174_v52 = vand.u32 4294901760, %v1700_v58 }
 0x104   :  { %4559 = vmatprep.subr.mxu0 %v7667_v34  ;;  %4586 = vmatprep.subr.mxu1 %v7667_v34  ;;  %v6212_v31 = vsub.f32 %v1699_v51, %v6179_v57  ;;  %v1687_v51 = vld [vmem:[#allocation8 + $0x78] sm:$0xff] }
 0x105   :  { %4560 = vmatpush3.msra.mxu0 %v1174_v21  ;;  %4587 = vmatpush3.msra.mxu1 %v5871_v38  ;;  %v6184_v38 = vsub.f32 %v1702_v32, %v6165_v63  ;;  %v6200_v55 = vsub.f32 %v1700_v58, %v6174_v52  ;;  %v6232_v21 = vand.u32 4294901760, %v1692_v16  ;;  %v6308_v32 = vsub.f32 %v6217_v25, %v7528_v18 }
 0x106   :  { %4561 = vmatprep.subr.mxu0 %v7667_v34  ;;  %4588 = vmatprep.subr.mxu1 %v7667_v34 }
 0x107   :  { %4562 = vmatpush3.msra.mxu0 %v1181_v19  ;;  %4589 = vmatpush3.msra.mxu1 %v5884_v30  ;;  %v6195_v30 = vsub.f32 %v1701_v3, %v6170_v22  ;;  %v7533_v59 = vand.u32 4294901760, %v6184_v38  ;;  %7730 = vst [vmem:[#allocation21_spill] sm:$0xff] %v6232_v21  ;;  %v7530_v19 = vand.u32 4294901760, %v6200_v55  ;;  %v6279_v8 = vsub.f32 %v1692_v16, %v6232_v21 }
 0x108   :  { %4563 = vmatprep.subr.mxu0 %v7667_v34  ;;  %4590 = vmatprep.subr.mxu1 %v7667_v34  ;;  %v6310_v3 = vand.u32 4294901760, %v1689_v45  ;;  %v6333_v16 = vsub.f32 %v6230_v9, %v7525_v2  ;;  %v6351_v2 = vand.u32 4294901760, %v1687_v51 }
 0x109   :  { %4564 = vmatpush3.msra.mxu0 %v1188_v5  ;;  %4591 = vmatpush3.msra.mxu1 %v5898_v60  ;;  %v6209_v60 = vand.u32 4294901760, %v1695_v36  ;;  %v7531_v0 = vand.u32 4294901760, %v6195_v30  ;;  %v1690_v5 = vld [vmem:[#allocation8 + $0x90] sm:$0xff]  ;;  %v7535_v41 = vand.u32 4294901760, %v6279_v8 }
 0x10a   :  { %4565 = vmatprep.subr.mxu0 %v7667_v34  ;;  %4592 = vmatprep.subr.mxu1 %v7667_v34  ;;  %v6274_v35 = vand.u32 4294901760, %v1690_v5  ;;  %7735 = vst [vmem:[#allocation30_spill] sm:$0xff] %v6310_v3  ;;  %7738 = vst [vmem:[#allocation33_spill] sm:$0xff] %v6351_v2  ;;  %v6400_v18 = vsub.f32 %v1687_v51, %v6351_v2  ;;  %v1679_v51 = vld [vmem:[#allocation8 + $0x38] sm:$0xff] }
 0x10b   :  { %4566 = vmatpush3.msra.mxu0 %v1195_v13  ;;  %4593 = vmatpush3.msra.mxu1 %v5902_v1  ;;  %7728 = vst [vmem:[#allocation19_spill] sm:$0xff] %v6209_v60  ;;  %v6224_v1 = vand.u32 4294901760, %v1694_v11  ;;  %v7529_v13 = vand.u32 4294901760, %v6212_v31  ;;  %v6245_v44 = vsub.f32 %v1695_v36, %v6209_v60 }
 0x10c   :  { %4567 = vmatprep.subr.mxu0 %v7667_v34  ;;  %4594 = vmatprep.subr.mxu1 %v7667_v34  ;;  %7733 = vst [vmem:[#allocation24_spill] sm:$0xff] %v6274_v35 }
 0x10d   :  { %4568 = vmatpush3.msra.mxu0 %v1202_v28  ;;  %4595 = vmatpush3.msra.mxu1 %v5923_v12  ;;  %7729 = vst [vmem:[#allocation20_spill] sm:$0xff] %v6224_v1  ;;  %v6241_v12 = vand.u32 4294901760, %v1693_v47  ;;  %v6252_v28 = vsub.f32 %v6189_v37, %v7534_v43  ;;  %v6265_v15 = vsub.f32 %v1694_v11, %v6224_v1  ;;  %v7527_v10 = vand.u32 4294901760, %v6245_v44  ;;  %v1680_v43 = vld [vmem:[#allocation8 + $0x40] sm:$0xff] }
 0x10e   :  { %4569 = vmatprep.subr.mxu0 %v7667_v34  ;;  %4596 = vmatprep.subr.mxu1 %v7667_v34  ;;  %v6328_v11 = vsub.f32 %v6236_v42, %v7526_v26  ;;  %v6356_v26 = vsub.f32 %v1689_v45, %v6310_v3 }
 0x10f   :  { %4570 = vmatpush3.msra.mxu0 %v1209_v48  ;;  %4597 = vmatpush3.msra.mxu1 %v5935_v23  ;;  %7731 = vst [vmem:[#allocation22_spill] sm:$0xff] %v6241_v12  ;;  %v6257_v23 = vsub.f32 %v6184_v38, %v7533_v59  ;;  %v6270_v48 = vsub.f32 %v6195_v30, %v7531_v0  ;;  %v1827_v61 = vand.u32 4294901760, %v6252_v28  ;;  %v7532_v56 = vand.u32 4294901760, %v6265_v15 }
 0x110   :  { %4571 = vmatprep.subr.mxu0 %v7667_v34  ;;  %4598 = vmatprep.subr.mxu1 %v7667_v34  ;;  %v6299_v17 = vsub.f32 %v1693_v47, %v6241_v12  ;;  %v1684_v47 = vld [vmem:[#allocation8 + $0x60] sm:$0xff]  ;;  %v6345_v28 = vsub.f32 %v6245_v44, %v7527_v10  ;;  %v1863_v45 = vand.u32 4294901760, %v6328_v11 }
 0x111   :  { %4572 = vmatpush3.msra.mxu0 %v1216_v27  ;;  %4573 = vmatprep.mubr.msk.f32.mxu0 %vm5196_vm0, %v7667_v34  ;;  %v6284_v27 = vsub.f32 %v6200_v55, %v7530_v19  ;;  %v1833_v14 = vand.u32 4294901760, %v6257_v23  ;;  %v1839_v58 = vand.u32 4294901760, %v6270_v48  ;;  %v1685_v23 = vld [vmem:[#allocation8 + $0x68] sm:$0xff]  ;;  %v6365_v10 = vand.u32 4294901760, %v1684_v47 }
 0x112   :  { %4599 = vmatpush3.msra.mxu1 %v5947_v53  ;;  %4574 = vmatmul.mubr.f32.vlgmr.msra.gmra.mxu0 %v7722_v40  ;;  %v6293_v53 = vsub.f32 %v6212_v31, %v7529_v13  ;;  %v7536_v48 = vand.u32 4294901760, %v6299_v17  ;;  %v1869_v19 = vand.u32 4294901760, %v6333_v16  ;;  %v6374_v0 = vand.u32 4294901760, %v1685_v23  ;;  %v1681_v16 = vld [vmem:[#allocation8 + $0x48] sm:$0xff] }
 0x113   :  { %4600 = vmatprep.subr.mxu1 %v7667_v34  ;;  %1705 = vmatprep.subr.mxu0 %v6163_v50  ;;  %v1845_v36 = vand.u32 4294901760, %v6284_v27  ;;  %v1857_v27 = vand.u32 4294901760, %v6308_v32  ;;  %7740 = vst [vmem:[#allocation36_spill] sm:$0xff] %v6365_v10  ;;  %v1683_v32 = vld [vmem:[#allocation8 + $0x58] sm:$0xff]  ;;  %v6405_v13 = vsub.f32 %v1684_v47, %v6365_v10  ;;  %v6421_v47 = vand.u32 4294901760, %v1680_v43 }
 0x114   :  { %4601 = vmatpush3.msra.mxu1 %v5962_v7  ;;  %1707 = vmatpush1.msra.mxu0 %v6165_v63  ;;  %v6316_v7 = vsub.f32 %v1690_v5, %v6274_v35  ;;  %v6340_v5 = vsub.f32 %v1688_v62, %v6295_v20  ;;  %v1682_v62 = vld [vmem:[#allocation8 + $0x50] sm:$0xff]  ;;  %7741 = vst [vmem:[#allocation26_spill] sm:$0xff] %v6374_v0 }
 0x115   :  { %4602 = vmatprep.subr.mxu1 %v7667_v34  ;;  %1709 = vmatprep.subr.mxu0 %v6170_v22  ;;  %v6387_v59 = vsub.f32 %v6299_v17, %v7536_v48  ;;  %v6389_v11 = vand.u32 4294901760, %v1682_v62  ;;  %v1678_v48 = vld [vmem:[#allocation8 + $0x30] sm:$0xff]  ;;  %7743 = vst [vmem:[#allocation37_spill] sm:$0xff] %v6405_v13 }
 0x116   :  { %7736 = vst [vmem:[#allocation31_spill] sm:$0xff] %v6316_v7  ;;  %4603 = vmatpush3.msra.mxu1 %v5974_v39  ;;  %1711 = vmatpush1.msra.mxu0 %v6174_v52  ;;  %v1851_v39 = vand.u32 4294901760, %v6293_v53  ;;  %7737 = vst [vmem:[#allocation32_spill] sm:$0xff] %v6340_v5  ;;  %v6353_v53 = vand.u32 4294901760, %v1686_v54 }
 0x117   :  { %4604 = vmatprep.subr.mxu1 %v7667_v34  ;;  %1713 = vmatprep.subr.mxu0 %v6179_v57 }
 0x118   :  { %4605 = vmatpush3.msra.mxu1 %v5986_v46  ;;  %1715 = vmatpush1.msra.mxu0 %v6186_v24  ;;  %7739 = vst [vmem:[#allocation35_spill] sm:$0xff] %v6353_v53  ;;  %v6363_v46 = vsub.f32 %v6265_v15, %v7532_v56  ;;  %v6379_v56 = vsub.f32 %v6279_v8, %v7535_v41  ;;  %v1676_v24 = vld [vmem:[#allocation8 + $0x20] sm:$0xff] }
 0x119   :  { %4606 = vmatprep.subr.mxu1 %v7667_v34  ;;  %1717 = vmatprep.subr.mxu0 %v6202_v4  ;;  %v6394_v41 = vsub.f32 %v1686_v54, %v6353_v53  ;;  %v6429_v4 = vsub.f32 %v1682_v62, %v6389_v11  ;;  %v6461_v62 = vand.u32 4294901760, %v1676_v24 }
 0x11a   :  { %4607 = vmatpush3.msra.mxu1 %v5998_v29  ;;  %4608 = vmatprep.mubr.msk.f32.mxu1 %vm5196_vm0, %v7667_v34  ;;  %v1875_v29 = vand.u32 4294901760, %v6345_v28 }
 0x11b   :  { %1719 = vmatpush1.msra.mxu0 %v6204_v6  ;;  %4609 = vmatmul.mubr.f32.vlgmr.msra.gmra.mxu1 %v7722_v40  ;;  %v6396_v40 = vand.u32 4294901760, %v1683_v32  ;;  %v1881_v6 = vand.u32 4294901760, %v6363_v46  ;;  %v6419_v46 = vand.u32 4294901760, %v1681_v16  ;;  %7747 = vst [vmem:[#allocation34_spill] sm:$0xff] %v6429_v4  ;;  %7754 = vst [vmem:[#allocation41_spill] sm:$0xff] %v6461_v62 }
 0x11c   :  { %1721 = vmatprep.subr.mxu0 %v6209_v60  ;;  %1828 = vmatprep.subr.mxu1 %v1827_v61  ;;  %v7744_v61 = vand.u32 4294901760, %v6320_v49  ;;  %v7745_v60 = vand.u32 4294901760, %v6316_v7 }
 0x11d   :  { %7742 = vst [vmem:[#allocation27_spill] sm:$0xff] %v6396_v40  ;;  %1723 = vmatpush1.msra.mxu0 %v6224_v1  ;;  %1834 = vmatpush1.msra.mxu1 %v1833_v14  ;;  %v1893_v14 = vand.u32 4294901760, %v6379_v56  ;;  %v6424_v1 = vsub.f32 %v1685_v23, %v6374_v0  ;;  %v7750_v23 = vand.u32 4294901760, %v6356_v26 }
 0x11e   :  { %v6410_v54 = vsub.f32 %v6320_v49, %v7744_v61  ;;  %v6415_v28 = vsub.f32 %v6316_v7, %v7745_v60  ;;  %1725 = vmatprep.subr.mxu0 %v6241_v12  ;;  %1840 = vmatprep.subr.mxu1 %v1839_v58  ;;  %v94_v61 = vld [vmem:[#allocation5] sm:$0xff]  ;;  %v1887_v60 = vand.u32 4294901760, %v6387_v59  ;;  %v7748_v58 = vand.u32 4294901760, %v6340_v5 }
 0x11f   :  { %7746 = vst [vmem:[#allocation28_spill] sm:$0xff] %v6424_v1  ;;  %1727 = vmatpush1.msra.mxu0 %v6232_v21  ;;  %1846 = vmatpush1.msra.mxu1 %v1845_v36  ;;  %v6436_v12 = vand.u32 4294901760, %v1678_v48  ;;  %v6442_v36 = vsub.f32 %v6356_v26, %v7750_v23  ;;  %v6444_v59 = vand.u32 4294901760, %v1679_v51  ;;  %v1677_v21 = vld [vmem:[#allocation8 + $0x28] sm:$0xff]  ;;  %v6448_v7 = vsub.f32 %v1683_v32, %v6396_v40 }
 0x120   :  { %v6434_v56 = vsub.f32 %v6340_v5, %v7748_v58  ;;  %1729 = vmatprep.subr.mxu0 %v6272_v33  ;;  %1852 = vmatprep.subr.mxu1 %v1851_v39  ;;  %v1899_v58 = vand.u32 4294901760, %v6410_v54  ;;  %v1905_v39 = vand.u32 4294901760, %v6415_v28  ;;  %v6454_v5 = vand.u32 4294901760, %v94_v61  ;;  %v1674_v33 = vld [vmem:[#allocation8 + $0x10] sm:$0xff] }
 0x121   :  { %7749 = vst [vmem:[#allocation29_spill] sm:$0xff] %v6436_v12  ;;  %7751 = vst [vmem:[#allocation38_spill] sm:$0xff] %v6444_v59  ;;  %1731 = vmatpush1.msra.mxu0 %v6274_v35  ;;  %1858 = vmatpush1.msra.mxu1 %v1857_v27  ;;  %v6458_v23 = vsub.f32 %v1680_v43, %v6421_v47  ;;  %v1675_v35 = vld [vmem:[#allocation8 + $0x18] sm:$0xff]  ;;  %v6464_v27 = vsub.f32 %v1681_v16, %v6419_v46  ;;  %v1911_v32 = vand.u32 4294901760, %v6442_v36 }
 0x122   :  { %7752 = vst [vmem:[#allocation39_spill] sm:$0xff] %v6448_v7  ;;  %7753 = vst [vmem:[#allocation40_spill] sm:$0xff] %v6454_v5  ;;  %1733 = vmatprep.subr.mxu0 %v6310_v3  ;;  %1864 = vmatprep.subr.mxu1 %v1863_v45  ;;  %v1917_v28 = vand.u32 4294901760, %v6434_v56  ;;  %v6469_v54 = vsub.f32 %v1678_v48, %v6436_v12  ;;  %v6471_v45 = vand.u32 4294901760, %v1677_v21  ;;  %v7755_v16 = vand.u32 4294901760, %v6400_v18  ;;  %v1673_v56 = vld [vmem:[#allocation8 + $0x8] sm:$0xff] }
 0x123   :  { %1735 = vmatpush1.msra.mxu0 %v6295_v20  ;;  %1870 = vmatpush1.msra.mxu1 %v1869_v19  ;;  %v6481_v48 = vsub.f32 %v1679_v51, %v6444_v59  ;;  %v7756_v43 = vand.u32 4294901760, %v6394_v41  ;;  %v1672_v3 = vld [vmem:[#allocation8] sm:$0xff]  ;;  %v7757_v51 = vand.u32 4294901760, %v6424_v1 }
 0x124   :  { %1737 = vmatprep.subr.mxu0 %v6351_v2  ;;  %1876 = vmatprep.subr.mxu1 %v1875_v29  ;;  %v1922_v20 = vsub.f32 %v6400_v18, %v7755_v16  ;;  %v6487_v29 = vand.u32 4294901760, %v1675_v35  ;;  %v6491_v16 = vsub.f32 %v94_v61, %v6454_v5  ;;  %v7759_v61 = vand.u32 4294901760, %v6405_v13 }
 0x125   :  { %1739 = vmatpush1.msra.mxu0 %v6353_v53  ;;  %1882 = vmatpush1.msra.mxu1 %v1881_v6  ;;  %v1928_v2 = vsub.f32 %v6394_v41, %v7756_v43  ;;  %v1934_v19 = vsub.f32 %v6424_v1, %v7757_v51  ;;  %v6498_v6 = vsub.f32 %v1676_v24, %v6461_v62  ;;  %v6500_v53 = vand.u32 4294901760, %v1674_v33 }
 0x126   :  { %1741 = vmatprep.subr.mxu0 %v6374_v0  ;;  %1888 = vmatprep.subr.mxu1 %v1887_v60  ;;  %v1940_v36 = vsub.f32 %v6405_v13, %v7759_v61  ;;  %v6507_v0 = vand.u32 4294901760, %v1673_v56  ;;  %v6511_v51 = vsub.f32 %v1677_v21, %v6471_v45  ;;  %v1923_v24 = vand.u32 4294901760, %v1922_v20 }
 0x127   :  { %7758 = vst [vmem:[#allocation42_spill] sm:$0xff] %v6500_v53  ;;  %1743 = vmatpush1.msra.mxu0 %v6365_v10  ;;  %1894 = vmatpush1.msra.mxu1 %v1893_v14  ;;  %v7760_v43 = vand.u32 4294901760, %v6448_v7  ;;  %v6517_v14 = vand.u32 4294901760, %v1672_v3  ;;  %v1929_v61 = vand.u32 4294901760, %v1928_v2  ;;  %v7761_v60 = vand.u32 4294901760, %v6429_v4 }
 0x128   :  { %1745 = vmatprep.subr.mxu0 %v6396_v40  ;;  %1900 = vmatprep.subr.mxu1 %v1899_v58  ;;  %v6526_v20 = vsub.f32 %v1675_v35, %v6487_v29  ;;  %v1935_v58 = vand.u32 4294901760, %v1934_v19  ;;  %v7762_v1 = vand.u32 4294901760, %v6464_v27  ;;  %v7763_v35 = vand.u32 4294901760, %v6458_v23 }
 0x129   :  { %v1946_v10 = vsub.f32 %v6448_v7, %v7760_v43  ;;  %1747 = vmatpush1.msra.mxu0 %v6389_v11  ;;  %1906 = vmatpush1.msra.mxu1 %v1905_v39  ;;  %v1952_v21 = vsub.f32 %v6429_v4, %v7761_v60  ;;  %v6530_v43 = vsub.f32 %v1674_v33, %v6500_v53  ;;  %v1941_v60 = vand.u32 4294901760, %v1940_v36 }
 0x12a   :  { %1749 = vmatprep.subr.mxu0 %v6419_v46  ;;  %1912 = vmatprep.subr.mxu1 %v1911_v32  ;;  %v1958_v2 = vsub.f32 %v6464_v27, %v7762_v1  ;;  %v1964_v40 = vsub.f32 %v6458_v23, %v7763_v35  ;;  %v6542_v19 = vsub.f32 %v1673_v56, %v6507_v0  ;;  %v7765_v39 = vand.u32 4294901760, %v6481_v48 }
 0x12b   :  { %1751 = vmatpush1.msra.mxu0 %v6421_v47  ;;  %1918 = vmatpush1.msra.mxu1 %v1917_v28  ;;  %v1947_v33 = vand.u32 4294901760, %v1946_v10  ;;  %v6546_v1 = vsub.f32 %v1672_v3, %v6517_v14  ;;  %v1953_v35 = vand.u32 4294901760, %v1952_v21  ;;  %v7766_v56 = vand.u32 4294901760, %v6491_v16 }
 0x12c   :  { %1753 = vmatprep.subr.mxu0 %v6444_v59  ;;  %1924 = vmatprep.subr.mxu1 %v1923_v24  ;;  %v1970_v28 = vsub.f32 %v6481_v48, %v7765_v39  ;;  %v1959_v10 = vand.u32 4294901760, %v1958_v2  ;;  %v7767_v3 = vand.u32 4294901760, %v6469_v54  ;;  %v7768_v21 = vand.u32 4294901760, %v6511_v51 }
 0x12d   :  { %7764 = vst [vmem:[#allocation43_spill] sm:$0xff] %v6546_v1  ;;  %1755 = vmatpush1.msra.mxu0 %v6436_v12  ;;  %1930 = vmatpush1.msra.mxu1 %v1929_v61  ;;  %v1804_v32 = vsub.f32 %v6491_v16, %v7766_v56  ;;  %v1965_v61 = vand.u32 4294901760, %v1964_v40  ;;  %v265_v12 = vpop.f32.mrf.mxu0  ;;  %v7769_v2 = vand.u32 4294901760, %v6498_v6 }
 0x12e   :  { %1757 = vmatprep.subr.mxu0 %v6471_v45  ;;  %1936 = vmatprep.subr.mxu1 %v1935_v58  ;;  %v1976_v39 = vsub.f32 %v6469_v54, %v7767_v3  ;;  %v1982_v56 = vsub.f32 %v6511_v51, %v7768_v21  ;;  %v1971_v58 = vand.u32 4294901760, %v1970_v28  ;;  %v7771_v28 = vand.u32 4294901760, %v6530_v43 }
 0x12f   :  { %1759 = vmatpush1.msra.mxu0 %v6461_v62  ;;  %1942 = vmatpush1.msra.mxu1 %v1941_v60  ;;  %v1988_v3 = vsub.f32 %v6498_v6, %v7769_v2  ;;  %v1805_v40 = vand.u32 4294901760, %v1804_v32  ;;  %v7770_v60 = vand.u32 4294901760, %v6526_v20  ;;  %v7772_v32 = vand.u32 4294901760, %v6542_v19 }
 0x130   :  { %1761 = vmatprep.subr.mxu0 %v6487_v29  ;;  %1948 = vmatprep.subr.mxu1 %v1947_v33  ;;  %v1977_v33 = vand.u32 4294901760, %v1976_v39  ;;  %v2000_v24 = vsub.f32 %v6530_v43, %v7771_v28  ;;  %v7773_v39 = vand.u32 4294901760, %v6546_v1 }
 0x131   :  { %1763 = vmatpush1.msra.mxu0 %v6500_v53  ;;  %1954 = vmatpush1.msra.mxu1 %v1953_v35  ;;  %v1994_v21 = vsub.f32 %v6526_v20, %v7770_v60  ;;  %v497_v62 = vpop.f32.mrf.mxu1  ;;  %v1983_v35 = vand.u32 4294901760, %v1982_v56  ;;  %v2006_v36 = vsub.f32 %v6542_v19, %v7772_v32  ;;  %v267_v60 = vpop.f32.mrf.mxu0  ;;  %v7779_v32 = vld [vmem:[#allocation19_spill] sm:$0xff] }
 0x132   :  { %1765 = vmatprep.subr.mxu0 %v6507_v0  ;;  %1960 = vmatprep.subr.mxu1 %v1959_v10  ;;  %v6580_v2 = vadd.f32 %v497_v62, %v265_v12  ;;  %v1989_v10 = vand.u32 4294901760, %v1988_v3  ;;  %v2012_v28 = vsub.f32 %v6546_v1, %v7773_v39  ;;  %v7774_v3 = vld [vmem:[#allocation31_spill] sm:$0xff]  ;;  %v7781_v39 = vld [vmem:[#allocation28_spill] sm:$0xff] }
 0x133   :  { %1767 = vmatpush1.msra.mxu0 %v6517_v14  ;;  %1966 = vmatpush1.msra.mxu1 %v1965_v61  ;;  %v499_v53 = vpop.f32.mrf.mxu1  ;;  %v1995_v62 = vand.u32 4294901760, %v1994_v21  ;;  %v2001_v61 = vand.u32 4294901760, %v2000_v24  ;;  %v2007_v56 = vand.u32 4294901760, %v2006_v36  ;;  %v7776_v21 = vld [vmem:[#allocation17_spill] sm:$0xff] }
 0x134   :  { %1800 = vmatprep.mubr.f32.mxu0 %v7667_v34  ;;  %1972 = vmatprep.subr.mxu1 %v1971_v58  ;;  %v6590_v12 = vadd.f32 %v499_v53, %v267_v60  ;;  %v2013_v58 = vand.u32 4294901760, %v2012_v28  ;;  %v95_v53 = vld [vmem:[#allocation5 + $0x8] sm:$0xff] }
 0x135   :  { %2064 = vmatprep.subr.mxu0 %v6189_v37  ;;  %1806 = vmatmul.mubr.f32.vlgmr.msra.gmra.mxu0 %v1805_v40  ;;  %v6604_v36 = vand.u32 4294901760, %v95_v53  ;;  %v7775_v40 = vld [vmem:[#allocation16_spill] sm:$0xff]  ;;  %v7782_v28 = vld [vmem:[#allocation22_spill] sm:$0xff] }
 0x136   :  { %1978 = vmatpush1.msra.mxu1 %v1977_v33  ;;  %2067 = vmatpush1.msra.mxu0 %v6184_v38  ;;  %v7777_v33 = vld [vmem:[#allocation32_spill] sm:$0xff] }
 0x137   :  { %1984 = vmatprep.subr.mxu1 %v1983_v35  ;;  %2070 = vmatprep.subr.mxu0 %v6195_v30  ;;  %v6615_v24 = vsub.f32 %v95_v53, %v6604_v36  ;;  %v7778_v35 = vld [vmem:[#allocation18_spill] sm:$0xff] }
 0x138   :  { %1990 = vmatpush1.msra.mxu1 %v1989_v10  ;;  %2073 = vmatpush1.msra.mxu0 %v6200_v55  ;;  %v7780_v10 = vld [vmem:[#allocation20_spill] sm:$0xff] }
 0x139   :  { %1996 = vmatprep.subr.mxu1 %v1995_v62  ;;  %2076 = vmatprep.subr.mxu0 %v6212_v31  ;;  %v7585_v60 = vand.u32 4294901760, %v6615_v24  ;;  %v7783_v62 = vld [vmem:[#allocation21_spill] sm:$0xff] }
 0x13a   :  { %2002 = vmatpush1.msra.mxu1 %v2001_v61  ;;  %2079 = vmatpush1.msra.mxu0 %v6217_v25  ;;  %v7784_v61 = vld [vmem:[#allocation23_spill] sm:$0xff] }
 0x13b   :  { %2008 = vmatprep.subr.mxu1 %v2007_v56  ;;  %2082 = vmatprep.subr.mxu0 %v6236_v42  ;;  %v1815_v56 = vsub.f32 %v6615_v24, %v7585_v60 }
 0x13c   :  { %2014 = vmatpush1.msra.mxu1 %v2013_v58  ;;  %2047 = vmatprep.mubr.f32.mxu1 %v7667_v34  ;;  %v7785_v58 = vld [vmem:[#allocation24_spill] sm:$0xff] }
 0x13d   :  { %2085 = vmatpush1.msra.mxu0 %v6230_v9  ;;  %2049 = vmatmul.mubr.f32.vlgmr.msra.gmra.mxu1 %v6454_v5  ;;  %v7786_v5 = vld [vmem:[#allocation30_spill] sm:$0xff]  ;;  %v1816_v60 = vand.u32 4294901760, %v1815_v56  ;;  %v7792_v56 = vld [vmem:[#allocation27_spill] sm:$0xff] }
 0x13e   :  { %2088 = vmatprep.subr.mxu0 %v6245_v44  ;;  %2208 = vmatprep.subr.mxu1 %v6163_v50 }
 0x13f   :  { %2091 = vmatpush1.msra.mxu0 %v6265_v15  ;;  %2210 = vmatpush1.msra.mxu1 %v6165_v63 }
 0x140   :  { %2094 = vmatprep.subr.mxu0 %v6299_v17  ;;  %2212 = vmatprep.subr.mxu1 %v6170_v22 }
 0x141   :  { %2097 = vmatpush1.msra.mxu0 %v6279_v8  ;;  %2214 = vmatpush1.msra.mxu1 %v6174_v52 }
 0x142   :  { %2100 = vmatprep.subr.mxu0 %v6320_v49  ;;  %2216 = vmatprep.subr.mxu1 %v6179_v57 }
 0x143   :  { %2103 = vmatpush1.msra.mxu0 %v7774_v3  ;;  %2218 = vmatpush1.msra.mxu1 %v7775_v40 }
 0x144   :  { %2106 = vmatprep.subr.mxu0 %v6356_v26  ;;  %2220 = vmatprep.subr.mxu1 %v7776_v21 }
 0x145   :  { %2109 = vmatpush1.msra.mxu0 %v7777_v33  ;;  %2222 = vmatpush1.msra.mxu1 %v7778_v35 }
 0x146   :  { %2112 = vmatprep.subr.mxu0 %v6400_v18  ;;  %2224 = vmatprep.subr.mxu1 %v7779_v32 }
 0x147   :  { %2115 = vmatpush1.msra.mxu0 %v6394_v41  ;;  %2226 = vmatpush1.msra.mxu1 %v7780_v10 }
 0x148   :  { %2118 = vmatprep.subr.mxu0 %v7781_v39  ;;  %2228 = vmatprep.subr.mxu1 %v7782_v28 }
 0x149   :  { %2121 = vmatpush1.msra.mxu0 %v6405_v13  ;;  %2230 = vmatpush1.msra.mxu1 %v7783_v62  ;;  %v7788_v62 = vld [vmem:[#allocation33_spill] sm:$0xff] }
 0x14a   :  { %2124 = vmatprep.subr.mxu0 %v6448_v7  ;;  %2232 = vmatprep.subr.mxu1 %v7784_v61  ;;  %v7787_v7 = vld [vmem:[#allocation25_spill] sm:$0xff] }
 0x14b   :  { %2127 = vmatpush1.msra.mxu0 %v6429_v4  ;;  %2234 = vmatpush1.msra.mxu1 %v7785_v58  ;;  %v634_v53 = vpop.f32.mrf.mxu0  ;;  %v7789_v58 = vld [vmem:[#allocation35_spill] sm:$0xff] }
 0x14c   :  { %2130 = vmatprep.subr.mxu0 %v6464_v27  ;;  %2236 = vmatprep.subr.mxu1 %v7786_v5  ;;  %v635_v13 = vadd.f32 %v634_v53, %v6580_v2  ;;  %v7790_v5 = vld [vmem:[#allocation26_spill] sm:$0xff]  ;;  %v7791_v2 = vld [vmem:[#allocation36_spill] sm:$0xff] }
 0x14d   :  { %2133 = vmatpush1.msra.mxu0 %v6458_v23  ;;  %2238 = vmatpush1.msra.mxu1 %v7787_v7  ;;  %v636_v61 = vpop.f32.mrf.mxu0 }
 0x14e   :  { %2136 = vmatprep.subr.mxu0 %v6481_v48  ;;  %2240 = vmatprep.subr.mxu1 %v7788_v62  ;;  %v637_v4 = vadd.f32 %v636_v61, %v6590_v12 }
 0x14f   :  { %2139 = vmatpush1.msra.mxu0 %v6469_v54  ;;  %2242 = vmatpush1.msra.mxu1 %v7789_v58 }
 0x150   :  { %2142 = vmatprep.subr.mxu0 %v6511_v51  ;;  %2244 = vmatprep.subr.mxu1 %v7790_v5 }
 0x151   :  { %1811 = vmatprep.mubr.f32.mxu0 %v7667_v34  ;;  %2145 = vmatpush1.msra.mxu0 %v6498_v6 }
 0x152   :  { %2246 = vmatpush1.msra.mxu1 %v7791_v2  ;;  %1817 = vmatmul.mubr.f32.gmra.mxu0 %v1816_v60 }
 0x153   :  { %2148 = vmatprep.subr.mxu0 %v6526_v20  ;;  %2248 = vmatprep.subr.mxu1 %v7792_v56  ;;  %v740_v12 = vpop.f32.mrf.mxu1 }
 0x154   :  { %2151 = vmatpush1.msra.mxu0 %v6530_v43  ;;  %2250 = vmatpush1.msra.mxu1 %v6389_v11  ;;  %v741_v61 = vadd.f32 %v740_v12, %v635_v13  ;;  %v7793_v13 = vand.u32 4294901760, %v6189_v37  ;;  %v7794_v12 = vld [vmem:[#allocation29_spill] sm:$0xff]  ;;  %v7799_v37 = vand.u32 4294901760, %v6212_v31  ;;  %v7804_v31 = vand.u32 4294901760, %v6491_v16 }
 0x155   :  { %2154 = vmatprep.subr.mxu0 %v6542_v19  ;;  %2252 = vmatprep.subr.mxu1 %v6419_v46  ;;  %v742_v53 = vpop.f32.mrf.mxu1 }
 0x156   :  { %2157 = vmatpush1.msra.mxu0 %v6546_v1  ;;  %2190 = vmatprep.mubr.f32.mxu0 %v7667_v34  ;;  %v743_v60 = vadd.f32 %v742_v53, %v637_v4  ;;  %v7795_v1 = vand.u32 4294901760, %v6184_v38  ;;  %v7796_v4 = vand.u32 4294901760, %v6195_v30  ;;  %v7797_v53 = vld [vmem:[#allocation41_spill] sm:$0xff]  ;;  %v7800_v38 = vld [vmem:[#allocation42_spill] sm:$0xff]  ;;  %v7802_v30 = vand.u32 4294901760, %v6236_v42 }
 0x157   :  { %2254 = vmatpush1.msra.mxu1 %v6421_v47  ;;  %2054 = vmatprep.mubr.f32.mxu1 %v7667_v34  ;;  %v7807_v42 = vand.u32 4294901760, %v6299_v17  ;;  %v7816_v17 = vand.u32 4294901760, %v7781_v39  ;;  %v7827_v39 = vld [vmem:[#allocation30_spill] sm:$0xff] }
 0x158   :  { %2193 = vmatmul.mubr.f32.vlgmr.msra.gmra.mxu0 %v6491_v16  ;;  %2256 = vmatprep.subr.mxu1 %v6444_v59  ;;  %v7798_v59 = vand.u32 4294901760, %v6200_v55  ;;  %v7803_v55 = vand.u32 4294901760, %v6230_v9  ;;  %v7808_v9 = vand.u32 4294901760, %v6279_v8  ;;  %v7815_v8 = vand.u32 4294901760, %v6394_v41  ;;  %v7817_v16 = vld [vmem:[#allocation37_spill] sm:$0xff]  ;;  %v7822_v41 = vld [vmem:[#allocation23_spill] sm:$0xff] }
 0x159   :  { %2325 = vmatprep.subr.mxu0 %v7793_v13  ;;  %2056 = vmatmul.mubr.f32.gmra.mxu1 %v6604_v36 }
 0x15a   :  { %2258 = vmatpush1.msra.mxu1 %v7794_v12  ;;  %2329 = vmatpush1.msra.mxu0 %v7795_v1  ;;  %v7801_v1 = vand.u32 4294901760, %v6217_v25  ;;  %v7806_v25 = vand.u32 4294901760, %v6265_v15  ;;  %v7814_v15 = vand.u32 4294901760, %v6400_v18  ;;  %v7819_v18 = vld [vmem:[#allocation21_spill] sm:$0xff] }
 0x15b   :  { %2260 = vmatprep.subr.mxu1 %v6471_v45  ;;  %2333 = vmatprep.subr.mxu0 %v7796_v4 }
 0x15c   :  { %2198 = vmatprep.mubr.f32.mxu0 %v7667_v34  ;;  %2262 = vmatpush1.msra.mxu1 %v7797_v53 }
 0x15d   :  { %2337 = vmatpush1.msra.mxu0 %v7798_v59  ;;  %2264 = vmatprep.subr.mxu1 %v6487_v29  ;;  %v7805_v59 = vand.u32 4294901760, %v6245_v44  ;;  %v7809_v44 = vand.u32 4294901760, %v6320_v49 }
 0x15e   :  { %2201 = vmatmul.mubr.f32.gmra.mxu0 %v6615_v24  ;;  %2341 = vmatprep.subr.mxu0 %v7799_v37 }
 0x15f   :  { %2266 = vmatpush1.msra.mxu1 %v7800_v38  ;;  %2345 = vmatpush1.msra.mxu0 %v7801_v1 }
 0x160   :  { %2268 = vmatprep.subr.mxu1 %v6507_v0  ;;  %2349 = vmatprep.subr.mxu0 %v7802_v30  ;;  %v110_v30 = vld [vmem:[#allocation10 + $0x60] sm:$0xff] }
 0x161   :  { %2270 = vmatpush1.msra.mxu1 %v6517_v14  ;;  %2303 = vmatprep.mubr.f32.mxu1 %v7667_v34 }
 0x162   :  { %2353 = vmatpush1.msra.mxu0 %v7803_v55  ;;  %2307 = vmatmul.mubr.f32.vlgmr.msra.gmra.mxu1 %v7804_v31 }
 0x163   :  { %2357 = vmatprep.subr.mxu0 %v7805_v59  ;;  %2498 = vmatprep.subr.mxu1 %v6163_v50  ;;  %v7810_v50 = vand.u32 4294901760, %v6615_v24  ;;  %v7818_v24 = vand.u32 4294901760, %v7817_v16 }
 0x164   :  { %2361 = vmatpush1.msra.mxu0 %v7806_v25  ;;  %2500 = vmatpush1.msra.mxu1 %v6165_v63  ;;  %v7811_v63 = vand.u32 4294901760, %v7774_v3  ;;  %v6821_v25 = vand.u32 4294901760, %v110_v30 }
 0x165   :  { %2365 = vmatprep.subr.mxu0 %v7807_v42  ;;  %2502 = vmatprep.subr.mxu1 %v6170_v22  ;;  %v7812_v22 = vand.u32 4294901760, %v6356_v26  ;;  %v109_v42 = vld [vmem:[#allocation10 + $0x58] sm:$0xff] }
 0x166   :  { %2312 = vmatprep.mubr.f32.mxu1 %v7667_v34  ;;  %2369 = vmatpush1.msra.mxu0 %v7808_v9  ;;  %v108_v9 = vld [vmem:[#allocation10 + $0x50] sm:$0xff] }
 0x167   :  { %2504 = vmatpush1.msra.mxu1 %v6174_v52  ;;  %2373 = vmatprep.subr.mxu0 %v7809_v44  ;;  %v7813_v52 = vand.u32 4294901760, %v7777_v33  ;;  %v7823_v33 = vld [vmem:[#allocation34_spill] sm:$0xff]  ;;  %v107_v44 = vld [vmem:[#allocation10 + $0x48] sm:$0xff] }
 0x168   :  { %2316 = vmatmul.mubr.f32.gmra.mxu1 %v7810_v50  ;;  %2506 = vmatprep.subr.mxu1 %v6179_v57  ;;  %v6824_v50 = vand.u32 4294901760, %v109_v42 }
 0x169   :  { %2377 = vmatpush1.msra.mxu0 %v7811_v63  ;;  %2508 = vmatpush1.msra.mxu1 %v7775_v40  ;;  %v7820_v40 = vld [vmem:[#allocation39_spill] sm:$0xff]  ;;  %v6826_v63 = vand.u32 4294901760, %v108_v9 }
 0x16a   :  { %2381 = vmatprep.subr.mxu0 %v7812_v22  ;;  %2510 = vmatprep.subr.mxu1 %v7776_v21  ;;  %v7821_v21 = vand.u32 4294901760, %v7820_v40  ;;  %v6828_v22 = vand.u32 4294901760, %v107_v44 }
 0x16b   :  { %2385 = vmatpush1.msra.mxu0 %v7813_v52  ;;  %2512 = vmatpush1.msra.mxu1 %v7778_v35  ;;  %v7824_v35 = vand.u32 4294901760, %v7823_v33 }
 0x16c   :  { %2389 = vmatprep.subr.mxu0 %v7814_v15  ;;  %2514 = vmatprep.subr.mxu1 %v7779_v32  ;;  %v908_v57 = vpop.f32.mrf.mxu0  ;;  %v7825_v32 = vld [vmem:[#allocation24_spill] sm:$0xff] }
 0x16d   :  { %2393 = vmatpush1.msra.mxu0 %v7815_v8  ;;  %2516 = vmatpush1.msra.mxu1 %v7780_v10  ;;  %v909_v26 = vadd.f32 %v908_v57, %v741_v61  ;;  %v7826_v10 = vand.u32 4294901760, %v6464_v27  ;;  %v7829_v61 = vand.u32 4294901760, %v6481_v48  ;;  %v4087_v27 = vld [vmem:[%s7453_s4] ss:$0 sm:$0xff]  ;;  %v7832_v48 = vand.u32 4294901760, %v6498_v6 }
 0x16e   :  { %2397 = vmatprep.subr.mxu0 %v7816_v17  ;;  %2518 = vmatprep.subr.mxu1 %v7782_v28  ;;  %v910_v49 = vpop.f32.mrf.mxu0  ;;  %v7828_v28 = vand.u32 4294901760, %v6458_v23  ;;  %v7831_v23 = vand.u32 4294901760, %v6511_v51  ;;  %v7834_v51 = vand.u32 4294901760, %v6530_v43  ;;  %v7840_v43 = vld [vmem:[#allocation38_spill] sm:$0xff]  ;;  %v6839_v8 = vsub.f32 %v110_v30, %v6821_v25 }
 0x16f   :  { %2401 = vmatpush1.msra.mxu0 %v7818_v24  ;;  %2520 = vmatpush1.msra.mxu1 %v7819_v18  ;;  %v911_v3 = vadd.f32 %v910_v49, %v743_v60  ;;  %v7830_v60 = vand.u32 4294901760, %v6469_v54  ;;  %v6846_v17 = vsub.f32 %v108_v9, %v6826_v63  ;;  %v6849_v49 = vsub.f32 %v107_v44, %v6828_v22  ;;  %v101_v44 = vld [vmem:[#allocation10 + $0x18] sm:$0xff] }
 0x170   :  { %2405 = vmatprep.subr.mxu0 %v7821_v21  ;;  %2522 = vmatprep.subr.mxu1 %v7822_v41  ;;  %v6858_v18 = vand.u32 4294901760, %v6839_v8 }
 0x171   :  { %2409 = vmatpush1.msra.mxu0 %v7824_v35  ;;  %2524 = vmatpush1.msra.mxu1 %v7825_v32  ;;  %v6866_v21 = vand.u32 4294901760, %v6846_v17  ;;  %v6869_v41 = vand.u32 4294901760, %v6849_v49 }
 0x172   :  { %2413 = vmatprep.subr.mxu0 %v7826_v10  ;;  %2526 = vmatprep.subr.mxu1 %v7827_v39  ;;  %7845 = vst [vmem:[#allocation19_spill] sm:$0xff] %v6858_v18  ;;  %v2771_v32 = vsub.f32 %v6839_v8, %v6858_v18 }
 0x173   :  { %2417 = vmatpush1.msra.mxu0 %v7828_v28  ;;  %2528 = vmatpush1.msra.mxu1 %v7787_v7  ;;  %7847 = vst [vmem:[#allocation28_spill] sm:$0xff] %v6866_v21  ;;  %7848 = vst [vmem:[#allocation22_spill] sm:$0xff] %v6869_v41  ;;  %v2785_v28 = vsub.f32 %v6846_v17, %v6866_v21 }
 0x174   :  { %2421 = vmatprep.subr.mxu0 %v7829_v61  ;;  %2530 = vmatprep.subr.mxu1 %v7788_v62  ;;  %v7833_v62 = vand.u32 4294901760, %v6526_v20  ;;  %v7837_v20 = vld [vmem:[#allocation43_spill] sm:$0xff] }
 0x175   :  { %2425 = vmatpush1.msra.mxu0 %v7830_v60  ;;  %2532 = vmatpush1.msra.mxu1 %v7789_v58  ;;  %v1012_v13 = vpop.f32.mrf.mxu1  ;;  %v106_v61 = vld [vmem:[#allocation10 + $0x40] sm:$0xff]  ;;  %v6885_v60 = vand.u32 4294901760, %v2771_v32 }
 0x176   :  { %2429 = vmatprep.subr.mxu0 %v7831_v23  ;;  %2534 = vmatprep.subr.mxu1 %v7790_v5  ;;  %v1013_v7 = vadd.f32 %v1012_v13, %v909_v26  ;;  %v7835_v5 = vand.u32 4294901760, %v6542_v19  ;;  %v6843_v26 = vsub.f32 %v109_v42, %v6824_v50  ;;  %v6889_v13 = vand.u32 4294901760, %v106_v61 }
 0x177   :  { %2433 = vmatpush1.msra.mxu0 %v7832_v48  ;;  %2536 = vmatpush1.msra.mxu1 %v7791_v2  ;;  %v1014_v54 = vpop.f32.mrf.mxu1  ;;  %v7838_v2 = vand.u32 4294901760, %v7837_v20  ;;  %7850 = vst [vmem:[#allocation33_spill] sm:$0xff] %v6885_v60  ;;  %v6897_v48 = vand.u32 4294901760, %v2785_v28 }
 0x178   :  { %2437 = vmatprep.subr.mxu0 %v7833_v62  ;;  %2538 = vmatprep.subr.mxu1 %v7792_v56  ;;  %v6764_v58 = vadd.f32 %v4087_v27, %v1013_v7  ;;  %v1015_v4 = vadd.f32 %v1014_v54, %v911_v3  ;;  %v7839_v56 = vld [vmem:[#allocation40_spill] sm:$0xff]  ;;  %v6863_v40 = vand.u32 4294901760, %v6843_v26  ;;  %v2792_v27 = vsub.f32 %v6849_v49, %v6869_v41  ;;  %v105_v7 = vld [vmem:[#allocation10 + $0x38] sm:$0xff] }
 0x179   :  { %2441 = vmatpush1.msra.mxu0 %v7834_v51  ;;  %2540 = vmatpush1.msra.mxu1 %v6389_v11  ;;  %7852 = vst [vmem:[#allocation26_spill] sm:$0xff] %v6897_v48  ;;  %v6900_v54 = vsub.f32 %v106_v61, %v6889_v13  ;;  %v6902_v62 = vand.u32 4294901760, %v105_v7 }
 0x17a   :  { %2445 = vmatprep.subr.mxu0 %v7835_v5  ;;  %2542 = vmatprep.subr.mxu1 %v6419_v46  ;;  %v6773_v6 = vmul.f32 %v6764_v58, %v1015_v4  ;;  %7846 = vst [vmem:[#allocation20_spill] sm:$0xff] %v6863_v40  ;;  %v2778_v39 = vsub.f32 %v6843_v26, %v6863_v40  ;;  %v104_v4 = vld [vmem:[#allocation10 + $0x30] sm:$0xff]  ;;  %v6908_v51 = vand.u32 4294901760, %v2792_v27 }
 0x17b   :  { %2449 = vmatpush1.msra.mxu0 %v7838_v2  ;;  %2482 = vmatprep.mubr.f32.mxu0 %v7667_v34  ;;  %v6911_v5 = vand.u32 4294901760, %v6900_v54  ;;  %v6914_v20 = vsub.f32 %v105_v7, %v6902_v62  ;;  %v6916_v2 = vand.u32 4294901760, %v104_v4 }
 0x17c   :  { %7836 = vst [vmem:[#allocation31_spill] sm:$0xff] %v6773_v6  ;;  %2544 = vmatpush1.msra.mxu1 %v6421_v47  ;;  %2484 = vmatmul.mubr.f32.vlgmr.msra.gmra.mxu0 %v7839_v56  ;;  %v6893_v23 = vand.u32 4294901760, %v2778_v39  ;;  %7853 = vst [vmem:[#allocation36_spill] sm:$0xff] %v6908_v51 }
 0x17d   :  { %2546 = vmatprep.subr.mxu1 %v7840_v43  ;;  %2489 = vmatprep.mubr.f32.mxu0 %v7667_v34  ;;  %7854 = vst [vmem:[#allocation27_spill] sm:$0xff] %v6911_v5 }
 0x17e   :  { %2548 = vmatpush1.msra.mxu1 %v7794_v12  ;;  %2593 = vmatprep.mubr.f32.mxu1 %v7667_v34  ;;  %v113_v12 = vld [vmem:[#allocation10 + $0x78] sm:$0xff]  ;;  %7851 = vst [vmem:[#allocation35_spill] sm:$0xff] %v6893_v23 }
 0x17f   :  { %2550 = vmatprep.subr.mxu1 %v6471_v45 }
 0x180   :  { %2552 = vmatpush1.msra.mxu1 %v7797_v53  ;;  %2491 = vmatmul.mubr.f32.gmra.mxu0 %v6604_v36  ;;  %v6794_v53 = vand.u32 4294901760, %v113_v12 }
 0x181   :  { %2554 = vmatprep.subr.mxu1 %v6487_v29  ;;  %v112_v29 = vld [vmem:[#allocation10 + $0x70] sm:$0xff] }
 0x182   :  { %2556 = vmatpush1.msra.mxu1 %v7800_v38  ;;  %v6797_v37 = vsub.f32 %v113_v12, %v6794_v53  ;;  %4611 = vmatprep.subr.mxu0 %v6794_v53  ;;  %v102_v12 = vld [vmem:[#allocation10 + $0x20] sm:$0xff] }
 0x183   :  { %2558 = vmatprep.subr.mxu1 %v6507_v0  ;;  %v6799_v0 = vand.u32 4294901760, %v112_v29  ;;  %4612 = vmatpush3.msra.mxu0 %v6794_v53  ;;  %v6950_v9 = vand.u32 4294901760, %v102_v12 }
 0x184   :  { %2560 = vmatpush1.msra.mxu1 %v6517_v14  ;;  %v111_v14 = vld [vmem:[#allocation10 + $0x68] sm:$0xff] }
 0x185   :  { %2595 = vmatmul.mubr.f32.vlgmr.msra.gmra.mxu1 %v7839_v56  ;;  %v6807_v38 = vsub.f32 %v112_v29, %v6799_v0  ;;  %v6809_v1 = vand.u32 4294901760, %v111_v14  ;;  %4613 = vmatprep.subr.mxu0 %v6799_v0  ;;  %v103_v56 = vld [vmem:[#allocation10 + $0x28] sm:$0xff]  ;;  %v6965_v32 = vsub.f32 %v102_v12, %v6950_v9 }
 0x186   :  { %2600 = vmatprep.mubr.f32.mxu1 %v7667_v34  ;;  %4614 = vmatpush3.msra.mxu0 %v6799_v0 }
 0x187   :  { %v6816_v31 = vand.u32 4294901760, %v6807_v38  ;;  %v6819_v59 = vsub.f32 %v111_v14, %v6809_v1  ;;  %4615 = vmatprep.subr.mxu0 %v6809_v1  ;;  %v6981_v7 = vand.u32 4294901760, %v6965_v32 }
 0x188   :  { %4616 = vmatpush3.msra.mxu0 %v6809_v1 }
 0x189   :  { %2602 = vmatmul.mubr.f32.gmra.mxu1 %v6604_v36  ;;  %v6804_v36 = vand.u32 4294901760, %v6797_v37  ;;  %7841 = vst [vmem:[#allocation16_spill] sm:$0xff] %v6816_v31  ;;  %v2757_v15 = vsub.f32 %v6807_v38, %v6816_v31  ;;  %v6836_v57 = vand.u32 4294901760, %v6819_v59  ;;  %4617 = vmatprep.subr.mxu0 %v6821_v25  ;;  %7861 = vst [vmem:[#allocation23_spill] sm:$0xff] %v6981_v7 }
 0x18a   :  { %4618 = vmatpush3.msra.mxu0 %v6821_v25 }
 0x18b   :  { %v2750_v55 = vsub.f32 %v6797_v37, %v6804_v36  ;;  %7843 = vst [vmem:[#allocation32_spill] sm:$0xff] %v6836_v57  ;;  %v6853_v16 = vand.u32 4294901760, %v2757_v15  ;;  %v2764_v24 = vsub.f32 %v6819_v59, %v6836_v57  ;;  %4619 = vmatprep.subr.mxu0 %v6824_v50 }
 0x18c   :  { %4620 = vmatpush3.msra.mxu0 %v6824_v50 }
 0x18d   :  { %v6831_v52 = vand.u32 4294901760, %v2750_v55  ;;  %7844 = vst [vmem:[#allocation18_spill] sm:$0xff] %v6853_v16  ;;  %v6873_v35 = vand.u32 4294901760, %v2764_v24  ;;  %4621 = vmatprep.subr.mxu0 %v6826_v63 }
 0x18e   :  { %4622 = vmatpush3.msra.mxu0 %v6826_v63 }
 0x18f   :  { %v1104_v11 = vpop.f32.mrf.mxu0  ;;  %7842 = vst [vmem:[#allocation17_spill] sm:$0xff] %v6831_v52  ;;  %4646 = vmatprep.subr.mxu1 %v6831_v52  ;;  %7849 = vst [vmem:[#allocation25_spill] sm:$0xff] %v6873_v35  ;;  %4623 = vmatprep.subr.mxu0 %v6828_v22 }
 0x190   :  { %4647 = vmatpush3.msra.mxu1 %v6831_v52  ;;  %4624 = vmatpush3.msra.mxu0 %v6828_v22 }
 0x191   :  { %v4435_v46 = vpop.f32.mrf.mxu0  ;;  %4648 = vmatprep.subr.mxu1 %v6853_v16  ;;  %4625 = vmatprep.subr.mxu0 %v6889_v13 }
 0x192   :  { %4649 = vmatpush3.msra.mxu1 %v6853_v16  ;;  %4626 = vmatpush3.msra.mxu0 %v6889_v13  ;;  %v6925_v46 = vand.u32 4294901760, %v6914_v20 }
 0x193   :  { %4650 = vmatprep.subr.mxu1 %v6873_v35  ;;  %4627 = vmatprep.subr.mxu0 %v6902_v62 }
 0x194   :  { %4651 = vmatpush3.msra.mxu1 %v6873_v35  ;;  %4628 = vmatpush3.msra.mxu0 %v6902_v62  ;;  %7855 = vst [vmem:[#allocation29_spill] sm:$0xff] %v6925_v46  ;;  %v2806_v30 = vsub.f32 %v6914_v20, %v6925_v46  ;;  %v5197_v46 = vmov 1966171168  }
 0x195   :  { %4652 = vmatprep.subr.mxu1 %v6885_v60  ;;  %4629 = vmatprep.subr.mxu0 %v6916_v2 }
 0x196   :  { %4653 = vmatpush3.msra.mxu1 %v6885_v60  ;;  %4630 = vmatpush3.msra.mxu0 %v6916_v2  ;;  %v6954_v15 = vand.u32 4294901760, %v2806_v30  ;;  %v98_v30 = vld [vmem:[#allocation10] sm:$0xff] }
 0x197   :  { %v1255_v47 = vpop.f32.mrf.mxu1  ;;  %4654 = vmatprep.subr.mxu1 %v6893_v23 }
 0x198   :  { %v1256_v45 = vadd.f32 %v1255_v47, %v1104_v11  ;;  %4655 = vmatpush3.msra.mxu1 %v6893_v23  ;;  %v2799_v11 = vsub.f32 %v6900_v54, %v6911_v5  ;;  %v6928_v47 = vsub.f32 %v104_v4, %v6916_v2  ;;  %7858 = vst [vmem:[#allocation37_spill] sm:$0xff] %v6954_v15  ;;  %v99_v4 = vld [vmem:[#allocation10 + $0x8] sm:$0xff] }
 0x199   :  { %v4470_v19 = vpop.f32.mrf.mxu1  ;;  %4656 = vmatprep.subr.mxu1 %v6897_v48  ;;  %v6993_v12 = vand.u32 4294901760, %v99_v4 }
 0x19a   :  { %4657 = vmatpush3.msra.mxu1 %v6897_v48  ;;  %v6938_v14 = vand.u32 4294901760, %v2799_v11  ;;  %v6943_v55 = vand.u32 4294901760, %v6928_v47 }
 0x19b   :  { %4658 = vmatprep.subr.mxu1 %v6908_v51 }
 0x19c   :  { %7856 = vst [vmem:[#allocation41_spill] sm:$0xff] %v6938_v14  ;;  %7857 = vst [vmem:[#allocation42_spill] sm:$0xff] %v6943_v55  ;;  %4659 = vmatpush3.msra.mxu1 %v6908_v51  ;;  %v2813_v24 = vsub.f32 %v6928_v47, %v6943_v55 }
 0x19d   :  { %4660 = vmatprep.subr.mxu1 %v6938_v14 }
 0x19e   :  { %4661 = vmatpush3.msra.mxu1 %v6938_v14  ;;  %v6969_v39 = vand.u32 4294901760, %v2813_v24 }
 0x19f   :  { %4662 = vmatprep.subr.mxu1 %v6954_v15 }
 0x1a0   :  { %7860 = vst [vmem:[#allocation39_spill] sm:$0xff] %v6969_v39  ;;  %4663 = vmatpush3.msra.mxu1 %v6954_v15 }
 0x1a1   :  { %4664 = vmatprep.subr.mxu1 %v6969_v39 }
 0x1a2   :  { %4665 = vmatpush3.msra.mxu1 %v6969_v39 }
 0x1b0   :  { %v1359_v3 = vpop.f32.mrf.mxu0 }
 0x1b1   :  { %v1360_v33 = vadd.f32 %v1359_v3, %v1256_v45  ;;  %v6930_v45 = vand.u32 4294901760, %v103_v56 }
 0x1b2   :  { %v4505_v10 = vpop.f32.mrf.mxu0 }
 0x1b3   :  { %v6946_v42 = vsub.f32 %v103_v56, %v6930_v45  ;;  %4631 = vmatprep.subr.mxu0 %v6930_v45  ;;  %v100_v10 = vld [vmem:[#allocation10 + $0x10] sm:$0xff] }
 0x1b4   :  { %4632 = vmatpush3.msra.mxu0 %v6930_v45  ;;  %v6976_v27 = vand.u32 4294901760, %v100_v10 }
 0x1b5   :  { %v6959_v3 = vand.u32 4294901760, %v6946_v42  ;;  %4633 = vmatprep.subr.mxu0 %v6950_v9 }
 0x1b6   :  { %4634 = vmatpush3.msra.mxu0 %v6950_v9  ;;  %v6991_v11 = vsub.f32 %v100_v10, %v6976_v27  ;;  %v7007_v10 = vsub.f32 %v99_v4, %v6993_v12 }
 0x1b7   :  { %7859 = vst [vmem:[#allocation21_spill] sm:$0xff] %v6959_v3  ;;  %v2820_v28 = vsub.f32 %v6946_v42, %v6959_v3 }
 0x1b8   :  { %v7004_v24 = vand.u32 4294901760, %v6991_v11  ;;  %v7021_v14 = vand.u32 4294901760, %v7007_v10 }
 0x1b9   :  { %v1448_v43 = vpop.f32.mrf.mxu1  ;;  %v6985_v56 = vand.u32 4294901760, %v2820_v28  ;;  %v7009_v28 = vand.u32 4294901760, %v98_v30 }
 0x1ba   :  { %v6933_v19 = vadd.f32 %v1448_v43, %v1360_v33  ;;  %v6961_v33 = vand.u32 4294901760, %v101_v44  ;;  %7864 = vst [vmem:[#allocation30_spill] sm:$0xff] %v7004_v24  ;;  %v2841_v15 = vsub.f32 %v6991_v11, %v7004_v24  ;;  %7867 = vst [vmem:[#allocation38_spill] sm:$0xff] %v7021_v14 }
 0x1bb   :  { %v4540_v29 = vpop.f32.mrf.mxu1  ;;  %7862 = vst [vmem:[#allocation34_spill] sm:$0xff] %v6985_v56  ;;  %4666 = vmatprep.subr.mxu1 %v6985_v56  ;;  %v7024_v4 = vsub.f32 %v98_v30, %v7009_v28 }
 0x1bc   :  { %v6974_v61 = vsub.f32 %v101_v44, %v6961_v33  ;;  %4635 = vmatprep.subr.mxu0 %v6961_v33  ;;  %v2827_v29 = vsub.f32 %v6965_v32, %v6981_v7  ;;  %4667 = vmatpush3.msra.mxu1 %v6985_v56 }
 0x1bd   :  { %4636 = vmatpush3.msra.mxu0 %v6961_v33  ;;  %v7035_v56 = vand.u32 4294901760, %v7024_v4 }
 0x1be   :  { %v6988_v43 = vand.u32 4294901760, %v6974_v61  ;;  %4637 = vmatprep.subr.mxu0 %v6976_v27  ;;  %v7013_v6 = vand.u32 4294901760, %v2827_v29  ;;  %v7030_v29 = vand.u32 4294901760, %v2841_v15 }
 0x1bf   :  { %4638 = vmatpush3.msra.mxu0 %v6976_v27  ;;  %7869 = vst [vmem:[#allocation45_spill] sm:$0xff] %v7035_v56  ;;  %v2855_v15 = vsub.f32 %v7024_v4, %v7035_v56 }
 0x1c0   :  { %7863 = vst [vmem:[#allocation24_spill] sm:$0xff] %v6988_v43  ;;  %v2834_v44 = vsub.f32 %v6974_v61, %v6988_v43  ;;  %7865 = vst [vmem:[#allocation43_spill] sm:$0xff] %v7013_v6  ;;  %4639 = vmatprep.subr.mxu0 %v6993_v12  ;;  %4668 = vmatprep.subr.mxu1 %v7013_v6 }
 0x1c1   :  { %4640 = vmatpush3.msra.mxu0 %v6993_v12  ;;  %4669 = vmatpush3.msra.mxu1 %v7013_v6  ;;  %7868 = vst [vmem:[#allocation44_spill] sm:$0xff] %v7030_v29  ;;  %v7047_v6 = vand.u32 4294901760, %v2855_v15 }
 0x1c2   :  { %v7016_v39 = vand.u32 4294901760, %v2834_v44  ;;  %4641 = vmatprep.subr.mxu0 %v7009_v28  ;;  %v2848_v44 = vsub.f32 %v7007_v10, %v7021_v14 }
 0x1c3   :  { %4642 = vmatpush3.msra.mxu0 %v7009_v28  ;;  %7871 = vst [vmem:[#allocation47_spill] sm:$0xff] %v7047_v6 }
 0x1c4   :  { %7866 = vst [vmem:[#allocation40_spill] sm:$0xff] %v7016_v39  ;;  %4670 = vmatprep.subr.mxu1 %v7016_v39  ;;  %4681 = vmatprep.subr.mxu0 %v6797_v37  ;;  %v7041_v30 = vand.u32 4294901760, %v2848_v44 }
 0x1c5   :  { %4671 = vmatpush3.msra.mxu1 %v7016_v39 }
 0x1c6   :  { %7870 = vst [vmem:[#allocation46_spill] sm:$0xff] %v7041_v30  ;;  %4672 = vmatprep.subr.mxu1 %v7030_v29 }
 0x1c7   :  { %4673 = vmatpush3.msra.mxu1 %v7030_v29 }
 0x1c8   :  { %4674 = vmatprep.subr.mxu1 %v7041_v30 }
 0x1c9   :  { %4675 = vmatpush3.msra.mxu1 %v7041_v30 }
 0x1ca   :  { %4676 = vmatprep.subr.mxu1 %v7047_v6 }
 0x1cb   :  { %4677 = vmatpush3.msra.mxu1 %v7047_v6 }
 0x1cc   :  { %4716 = vmatprep.subr.mxu1 %v6794_v53 }
 0x1d2   :  { %v1567_v44 = vpop.f32.mrf.mxu0 }
 0x1d3   :  { %v1568_v39 = vadd.f32 %v1567_v44, %v6933_v19 }
 0x1d4   :  { %v4575_v51 = vpop.f32.mrf.mxu0 }
 0x1db   :  { %v1654_v48 = vpop.f32.mrf.mxu1 }
 0x1dc   :  { %v7055_v23 = vadd.f32 %v1654_v48, %v1568_v39 }
 0x1dd   :  { %v4610_v29 = vpop.f32.mrf.mxu1 }
 0x1de   :  { %7872 = vst [vmem:[#allocation48_spill] sm:$0xff] %v7055_v23 }
 0x1f5   :  { %v1807_v15 = vpop.f32.mrf.mxu0 }
 0x1f7   :  { %v1809_v56 = vpop.f32.mrf.mxu0 }
 0x1fd   :  { %v2050_v60 = vpop.f32.mrf.mxu1 }
 0x1ff   :  { %v2052_v35 = vpop.f32.mrf.mxu1 }
 0x200   :  { %v2053_v14 = vadd.f32 %v2052_v35, %v1809_v56  ;;  %v2612_v35 = vunpack.c.l.s4 %v5197_v46  ;;  %v2614_v56 = vlaneseq }
 0x202   :  { %v2613_v5 = vunpack.c.0.s8 %v2612_v35  ;;  %v2615_v41 = vshrl.u32 %v2614_v56, 7 }
 0x204   :  { %v2616_v21 = vsub.s32 %v2613_v5, %v2615_v41  ;;  %v7060_v57 = vsub.s32 0, %v2615_v41 }
 0x212   :  { %v1818_v30 = vpop.f32.mrf.mxu0 }
 0x214   :  { %v1820_v16 = vpop.f32.mrf.mxu0 }
 0x218   :  { %v2194_v24 = vpop.f32.mrf.mxu0 }
 0x219   :  { %v2057_v52 = vpop.f32.mrf.mxu1 }
 0x21a   :  { %v2196_v6 = vpop.f32.mrf.mxu0 }
 0x21b   :  { %v2197_v34 = vadd.f32 %v2196_v6, %v2053_v14  ;;  %v2059_v43 = vpop.f32.mrf.mxu1  ;;  %v2617_v6 = vrot.slane %v6764_v58, %v2616_v21 }
 0x21c   :  { %v2060_v7 = vadd.f32 %v2059_v43, %v1820_v16  ;;  %v2051_v16 = vadd.f32 %v2050_v60, %v1807_v15 }
 0x21d   :  { %v2618_v18 = vcombine.high %v2617_v6, %v2617_v6 }
 0x21e   :  { %v2202_v3 = vpop.f32.mrf.mxu0 }
 0x21f   :  { %v2632_v31 = vrot.slane %v2618_v18, %v2616_v21 }
 0x220   :  { %v2204_v19 = vpop.f32.mrf.mxu0 }
 0x221   :  { %v2205_v51 = vadd.f32 %v2204_v19, %v2060_v7  ;;  %v2195_v7 = vadd.f32 %v2194_v24, %v2051_v16  ;;  %v2058_v19 = vadd.f32 %v2057_v52, %v1818_v30  ;;  %v2640_v41 = vrot.slane %v2632_v31, %v7060_v57 }
 0x222   :  { %v2308_v44 = vpop.f32.mrf.mxu1 }
 0x224   :  { %v2310_v48 = vpop.f32.mrf.mxu1 }
 0x225   :  { %v2311_v39 = vadd.f32 %v2310_v48, %v2197_v34  ;;  %v2309_v34 = vadd.f32 %v2308_v44, %v2195_v7  ;;  %v2625_v48 = vrot.slane %v2617_v6, %v2616_v21  ;;  %v7876_v7 = vld [vmem:[#allocation19_spill] sm:$0xff] }
 0x227   :  { %v2636_v5 = vrot.slane %v2625_v48, %v7060_v57  ;;  %v7879_v48 = vld [vmem:[#allocation22_spill] sm:$0xff] }
 0x228   :  { %v2317_v29 = vpop.f32.mrf.mxu1 }
 0x22a   :  { %v2319_v23 = vpop.f32.mrf.mxu1 }
 0x22b   :  { %v7057_v55 = vadd.f32 %v2319_v23, %v2205_v51  ;;  %v2203_v23 = vadd.f32 %v2202_v3, %v2058_v19  ;;  %v7877_v19 = vld [vmem:[#allocation20_spill] sm:$0xff] }
 0x22d   :  { %7873 = vst [vmem:[#allocation49_spill] sm:$0xff] %v7057_v55  ;;  %v2318_v35 = vadd.f32 %v2317_v29, %v2203_v23  ;;  %v7880_v23 = vld [vmem:[#allocation27_spill] sm:$0xff] }
 0x23c   :  { %v2485_v40 = vpop.f32.mrf.mxu0 }
 0x23d   :  { %v2486_v51 = vadd.f32 %v2485_v40, %v2309_v34  ;;  %v7878_v34 = vld [vmem:[#allocation28_spill] sm:$0xff] }
 0x23e   :  { %v2487_v14 = vpop.f32.mrf.mxu0 }
 0x23f   :  { %v2488_v43 = vadd.f32 %v2487_v14, %v2311_v39  ;;  %v7874_v14 = vld [vmem:[#allocation16_spill] sm:$0xff] }
 0x240   :  { %v2492_v46 = vpop.f32.mrf.mxu0 }
 0x241   :  { %v2493_v60 = vadd.f32 %v2492_v46, %v2318_v35  ;;  %v7882_v46 = vld [vmem:[#allocation42_spill] sm:$0xff]  ;;  %v7883_v35 = vld [vmem:[#allocation21_spill] sm:$0xff] }
 0x245   :  { %v2596_v55 = vpop.f32.mrf.mxu1 }
 0x246   :  { %v2597_v56 = vadd.f32 %v2596_v55, %v2486_v51  ;;  %v7881_v51 = vld [vmem:[#allocation29_spill] sm:$0xff] }
 0x247   :  { %v2598_v58 = vpop.f32.mrf.mxu1 }
 0x248   :  { %v2643_v15 = vmul.f32 %v2636_v5, %v2597_v56  ;;  %v7063_v39 = vadd.f32 %v2598_v58, %v2488_v43  ;;  %v7875_v43 = vld [vmem:[#allocation32_spill] sm:$0xff]  ;;  %v7884_v56 = vld [vmem:[#allocation23_spill] sm:$0xff]  ;;  %v7886_v58 = vmov 0.0  }
 0x249   :  { %v2603_v52 = vpop.f32.mrf.mxu1  ;;  %v7885_v5 = vld [vmem:[#allocation24_spill] sm:$0xff] }
 0x24a   :  { %v7065_v24 = vand.u32 4294901760, %v2643_v15  ;;  %v2604_v30 = vadd.f32 %v2603_v52, %v2493_v60  ;;  %v7887_v60 = vld [vmem:[#allocation17_spill] sm:$0xff]  ;;  %v7889_v52 = vld [vmem:[#allocation18_spill] sm:$0xff] }
 0x24c   :  { %v2727_v40 = vsub.f32 %v2643_v15, %v7065_v24  ;;  %v2644_v3 = vmul.f32 %v2640_v41, %v2604_v30  ;;  %4678 = vmatprep.mubr.f32.mxu1 %v7065_v24  ;;  %v7888_v15 = vld [vmem:[#allocation30_spill] sm:$0xff]  ;;  %v7891_v30 = vld [vmem:[#allocation25_spill] sm:$0xff] }
 0x24d   :  { %v7892_v41 = vld [vmem:[#allocation45_spill] sm:$0xff] }
 0x24e   :  { %v7070_v55 = vand.u32 4294901760, %v2644_v3  ;;  %v2728_v44 = vand.u32 4294901760, %v2727_v40 }
 0x250   :  { %v7073_v18 = vsub.f32 %v2644_v3, %v7070_v55  ;;  %4679 = vmatmul.mubr.f32.vlgmr.msra.gmra.mxu1 %v7070_v55  ;;  %v2729_v21 = vsub.f32 %v2727_v40, %v2728_v44  ;;  %v7894_v3 = vld [vmem:[#allocation35_spill] sm:$0xff] }
 0x251   :  { %4717 = vmatpush3.msra.mxu1 %v6794_v53  ;;  %4748 = vmatprep.mubr.f32.mxu1 %v2728_v44  ;;  %v7895_v44 = vld [vmem:[#allocation26_spill] sm:$0xff] }
 0x252   :  { %v2738_v29 = vand.u32 4294901760, %v7073_v18  ;;  %4718 = vmatprep.subr.mxu1 %v6799_v0  ;;  %v2730_v31 = vand.u32 4294901760, %v2729_v21  ;;  %v7898_v21 = vld [vmem:[#allocation37_spill] sm:$0xff] }
 0x253   :  { %4719 = vmatpush3.msra.mxu1 %v6799_v0 }
 0x254   :  { %v2739_v6 = vsub.f32 %v7073_v18, %v2738_v29  ;;  %4720 = vmatprep.subr.mxu1 %v6809_v1  ;;  %4643 = vmatprep.mubr.f32.mxu0 %v2730_v31  ;;  %v7900_v31 = vld [vmem:[#allocation34_spill] sm:$0xff] }
 0x255   :  { %4721 = vmatpush3.msra.mxu1 %v6809_v1 }
 0x256   :  { %v2740_v16 = vand.u32 4294901760, %v2739_v6  ;;  %4722 = vmatprep.subr.mxu1 %v6821_v25  ;;  %v7901_v6 = vld [vmem:[#allocation31_spill] sm:$0xff] }
 0x257   :  { %4723 = vmatpush3.msra.mxu1 %v6821_v25 }
 0x258   :  { %4724 = vmatprep.subr.mxu1 %v6824_v50  ;;  %4644 = vmatmul.mubr.f32.vlgmr.msra.gmra.mxu0 %v2740_v16  ;;  %v7249_v16 = vand.u32 4294901760, %v7901_v6 }
 0x259   :  { %4682 = vmatpush3.msra.mxu0 %v6797_v37  ;;  %4725 = vmatpush3.msra.mxu1 %v6824_v50 }
 0x25a   :  { %4683 = vmatprep.subr.mxu0 %v6807_v38  ;;  %4713 = vmatprep.mubr.f32.mxu0 %v2727_v40  ;;  %v7893_v40 = vld [vmem:[#allocation33_spill] sm:$0xff] }
 0x25b   :  { %4726 = vmatprep.subr.mxu1 %v6826_v63  ;;  %4684 = vmatpush3.msra.mxu0 %v6807_v38 }
 0x25c   :  { %4727 = vmatpush3.msra.mxu1 %v6826_v63  ;;  %4685 = vmatprep.subr.mxu0 %v6819_v59 }
 0x25d   :  { %4728 = vmatprep.subr.mxu1 %v6828_v22  ;;  %4686 = vmatpush3.msra.mxu0 %v6819_v59 }
 0x25e   :  { %4729 = vmatpush3.msra.mxu1 %v6828_v22  ;;  %4687 = vmatprep.subr.mxu0 %v6839_v8 }
 0x25f   :  { %4730 = vmatprep.subr.mxu1 %v6889_v13  ;;  %4688 = vmatpush3.msra.mxu0 %v6839_v8 }
 0x260   :  { %4731 = vmatpush3.msra.mxu1 %v6889_v13  ;;  %4689 = vmatprep.subr.mxu0 %v6843_v26 }
 0x261   :  { %4732 = vmatprep.subr.mxu1 %v6902_v62  ;;  %4690 = vmatpush3.msra.mxu0 %v6843_v26 }
 0x262   :  { %4733 = vmatpush3.msra.mxu1 %v6902_v62  ;;  %4691 = vmatprep.subr.mxu0 %v6846_v17 }
 0x263   :  { %4734 = vmatprep.subr.mxu1 %v6916_v2  ;;  %4692 = vmatpush3.msra.mxu0 %v6846_v17 }
 0x264   :  { %4735 = vmatpush3.msra.mxu1 %v6916_v2  ;;  %4693 = vmatprep.subr.mxu0 %v6849_v49 }
 0x265   :  { %4736 = vmatprep.subr.mxu1 %v6930_v45  ;;  %4694 = vmatpush3.msra.mxu0 %v6849_v49 }
 0x266   :  { %4737 = vmatpush3.msra.mxu1 %v6930_v45  ;;  %4695 = vmatprep.subr.mxu0 %v6900_v54 }
 0x267   :  { %4738 = vmatprep.subr.mxu1 %v6950_v9  ;;  %4696 = vmatpush3.msra.mxu0 %v6900_v54 }
 0x268   :  { %4739 = vmatpush3.msra.mxu1 %v6950_v9  ;;  %4697 = vmatprep.subr.mxu0 %v6914_v20 }
 0x269   :  { %4740 = vmatprep.subr.mxu1 %v6961_v33  ;;  %4698 = vmatpush3.msra.mxu0 %v6914_v20 }
 0x26a   :  { %4741 = vmatpush3.msra.mxu1 %v6961_v33  ;;  %4699 = vmatprep.subr.mxu0 %v6928_v47 }
 0x26b   :  { %4742 = vmatprep.subr.mxu1 %v6976_v27  ;;  %4700 = vmatpush3.msra.mxu0 %v6928_v47 }
 0x26c   :  { %4743 = vmatpush3.msra.mxu1 %v6976_v27  ;;  %4701 = vmatprep.subr.mxu0 %v6946_v42 }
 0x26d   :  { %4744 = vmatprep.subr.mxu1 %v6993_v12  ;;  %4702 = vmatpush3.msra.mxu0 %v6946_v42 }
 0x26e   :  { %4745 = vmatpush3.msra.mxu1 %v6993_v12  ;;  %4703 = vmatprep.subr.mxu0 %v6965_v32 }
 0x26f   :  { %4746 = vmatprep.subr.mxu1 %v7009_v28  ;;  %4704 = vmatpush3.msra.mxu0 %v6965_v32 }
 0x270   :  { %4747 = vmatpush3.msra.mxu1 %v7009_v28  ;;  %4705 = vmatprep.subr.mxu0 %v6974_v61 }
 0x271   :  { %4749 = vmatmul.mubr.f32.vlgmr.msra.gmra.mxu1 %v2738_v29  ;;  %4786 = vmatprep.subr.mxu1 %v6794_v53  ;;  %v7899_v29 = vld [vmem:[#allocation39_spill] sm:$0xff] }
 0x272   :  { %4706 = vmatpush3.msra.mxu0 %v6974_v61  ;;  %4787 = vmatpush3.msra.mxu1 %v6794_v53 }
 0x273   :  { %4818 = vmatprep.mubr.f32.mxu1 %v7065_v24  ;;  %4707 = vmatprep.subr.mxu0 %v6991_v11 }
 0x274   :  { %4788 = vmatprep.subr.mxu1 %v6799_v0  ;;  %4708 = vmatpush3.msra.mxu0 %v6991_v11 }
 0x275   :  { %4789 = vmatpush3.msra.mxu1 %v6799_v0  ;;  %4709 = vmatprep.subr.mxu0 %v7007_v10 }
 0x276   :  { %4790 = vmatprep.subr.mxu1 %v6809_v1  ;;  %4710 = vmatpush3.msra.mxu0 %v7007_v10 }
 0x277   :  { %4791 = vmatpush3.msra.mxu1 %v6809_v1  ;;  %4711 = vmatprep.subr.mxu0 %v7024_v4 }
 0x278   :  { %4792 = vmatprep.subr.mxu1 %v6821_v25  ;;  %4712 = vmatpush3.msra.mxu0 %v7024_v4 }
 0x279   :  { %4793 = vmatpush3.msra.mxu1 %v6821_v25  ;;  %4714 = vmatmul.mubr.f32.vlgmr.msra.gmra.mxu0 %v7073_v18  ;;  %v7897_v18 = vld [vmem:[#allocation41_spill] sm:$0xff] }
 0x27a   :  { %4751 = vmatprep.subr.mxu0 %v6804_v36  ;;  %4794 = vmatprep.subr.mxu1 %v6824_v50 }
 0x27b   :  { %4752 = vmatpush3.msra.mxu0 %v6804_v36  ;;  %4783 = vmatprep.mubr.f32.mxu0 %v7065_v24  ;;  %v7890_v24 = vld [vmem:[#allocation38_spill] sm:$0xff] }
 0x27c   :  { %4795 = vmatpush3.msra.mxu1 %v6824_v50  ;;  %4753 = vmatprep.subr.mxu0 %v7874_v14 }
 0x27d   :  { %4796 = vmatprep.subr.mxu1 %v6826_v63  ;;  %4754 = vmatpush3.msra.mxu0 %v7874_v14 }
 0x27e   :  { %4797 = vmatpush3.msra.mxu1 %v6826_v63  ;;  %4755 = vmatprep.subr.mxu0 %v7875_v43 }
 0x27f   :  { %4798 = vmatprep.subr.mxu1 %v6828_v22  ;;  %4756 = vmatpush3.msra.mxu0 %v7875_v43 }
 0x280   :  { %4799 = vmatpush3.msra.mxu1 %v6828_v22  ;;  %4757 = vmatprep.subr.mxu0 %v7876_v7 }
 0x281   :  { %4800 = vmatprep.subr.mxu1 %v6889_v13  ;;  %4758 = vmatpush3.msra.mxu0 %v7876_v7 }
 0x282   :  { %4801 = vmatpush3.msra.mxu1 %v6889_v13  ;;  %4759 = vmatprep.subr.mxu0 %v7877_v19 }
 0x283   :  { %4802 = vmatprep.subr.mxu1 %v6902_v62  ;;  %4760 = vmatpush3.msra.mxu0 %v7877_v19 }
 0x284   :  { %4803 = vmatpush3.msra.mxu1 %v6902_v62  ;;  %4761 = vmatprep.subr.mxu0 %v7878_v34 }
 0x285   :  { %4804 = vmatprep.subr.mxu1 %v6916_v2  ;;  %4762 = vmatpush3.msra.mxu0 %v7878_v34 }
 0x286   :  { %4805 = vmatpush3.msra.mxu1 %v6916_v2  ;;  %4763 = vmatprep.subr.mxu0 %v7879_v48 }
 0x287   :  { %4806 = vmatprep.subr.mxu1 %v6930_v45  ;;  %4764 = vmatpush3.msra.mxu0 %v7879_v48 }
 0x288   :  { %4807 = vmatpush3.msra.mxu1 %v6930_v45  ;;  %4765 = vmatprep.subr.mxu0 %v7880_v23 }
 0x289   :  { %4808 = vmatprep.subr.mxu1 %v6950_v9  ;;  %4766 = vmatpush3.msra.mxu0 %v7880_v23 }
 0x28a   :  { %4809 = vmatpush3.msra.mxu1 %v6950_v9  ;;  %4767 = vmatprep.subr.mxu0 %v7881_v51 }
 0x28b   :  { %4810 = vmatprep.subr.mxu1 %v6961_v33  ;;  %4768 = vmatpush3.msra.mxu0 %v7881_v51 }
 0x28c   :  { %4811 = vmatpush3.msra.mxu1 %v6961_v33  ;;  %4769 = vmatprep.subr.mxu0 %v7882_v46 }
 0x28d   :  { %4812 = vmatprep.subr.mxu1 %v6976_v27  ;;  %4770 = vmatpush3.msra.mxu0 %v7882_v46 }
 0x28e   :  { %4813 = vmatpush3.msra.mxu1 %v6976_v27  ;;  %4771 = vmatprep.subr.mxu0 %v7883_v35 }
 0x28f   :  { %4814 = vmatprep.subr.mxu1 %v6993_v12  ;;  %4772 = vmatpush3.msra.mxu0 %v7883_v35 }
 0x290   :  { %4815 = vmatpush3.msra.mxu1 %v6993_v12  ;;  %4773 = vmatprep.subr.mxu0 %v7884_v56 }
 0x291   :  { %4816 = vmatprep.subr.mxu1 %v7009_v28  ;;  %4774 = vmatpush3.msra.mxu0 %v7884_v56 }
 0x292   :  { %4817 = vmatpush3.msra.mxu1 %v7009_v28  ;;  %4775 = vmatprep.subr.mxu0 %v7885_v5 }
 0x293   :  { %4819 = vmatmul.mubr.f32.vlgmr.msra.gmra.mxu1 %v7070_v55  ;;  %4856 = vmatprep.subr.mxu1 %v7886_v58 }
 0x294   :  { %4776 = vmatpush3.msra.mxu0 %v7885_v5  ;;  %4857 = vmatpush3.msra.mxu1 %v7887_v60  ;;  %v7902_v60 = vld [vmem:[#allocation43_spill] sm:$0xff] }
 0x295   :  { %4777 = vmatprep.subr.mxu0 %v7888_v15  ;;  %4858 = vmatprep.subr.mxu1 %v7886_v58 }
 0x296   :  { %4778 = vmatpush3.msra.mxu0 %v7888_v15  ;;  %4859 = vmatpush3.msra.mxu1 %v7889_v52  ;;  %v7903_v52 = vld [vmem:[#allocation40_spill] sm:$0xff] }
 0x297   :  { %4779 = vmatprep.subr.mxu0 %v7890_v24  ;;  %4860 = vmatprep.subr.mxu1 %v7886_v58 }
 0x298   :  { %4780 = vmatpush3.msra.mxu0 %v7890_v24  ;;  %4861 = vmatpush3.msra.mxu1 %v7891_v30  ;;  %v7261_v30 = vsub.f32 %v7901_v6, %v7249_v16 }
 0x299   :  { %4781 = vmatprep.subr.mxu0 %v7892_v41  ;;  %4862 = vmatprep.subr.mxu1 %v7886_v58 }
 0x29a   :  { %4782 = vmatpush3.msra.mxu0 %v7892_v41  ;;  %4863 = vmatpush3.msra.mxu1 %v7893_v40  ;;  %v7904_v40 = vld [vmem:[#allocation44_spill] sm:$0xff] }
 0x29b   :  { %4784 = vmatmul.mubr.f32.vlgmr.msra.gmra.mxu0 %v7070_v55  ;;  %4821 = vmatprep.subr.mxu0 %v7886_v58  ;;  %v7896_v55 = vld [vmem:[#allocation36_spill] sm:$0xff] }
 0x29c   :  { %4864 = vmatprep.subr.mxu1 %v7886_v58  ;;  %4822 = vmatpush3.msra.mxu0 %v6794_v53 }
 0x29d   :  { %4865 = vmatpush3.msra.mxu1 %v7894_v3  ;;  %4823 = vmatprep.subr.mxu0 %v7886_v58  ;;  %v7905_v3 = vld [vmem:[#allocation46_spill] sm:$0xff] }
 0x29e   :  { %4866 = vmatprep.subr.mxu1 %v7886_v58  ;;  %4824 = vmatpush3.msra.mxu0 %v6799_v0 }
 0x29f   :  { %4867 = vmatpush3.msra.mxu1 %v7895_v44  ;;  %4825 = vmatprep.subr.mxu0 %v7886_v58  ;;  %v3415_v44 = vand.u32 4294901760, %v7261_v30 }
 0x2a0   :  { %4868 = vmatprep.subr.mxu1 %v7886_v58  ;;  %4826 = vmatpush3.msra.mxu0 %v6809_v1 }
 0x2a1   :  { %4869 = vmatpush3.msra.mxu1 %v7896_v55  ;;  %4827 = vmatprep.subr.mxu0 %v7886_v58  ;;  %v7906_v55 = vld [vmem:[#allocation47_spill] sm:$0xff] }
 0x2a2   :  { %4870 = vmatprep.subr.mxu1 %v7886_v58  ;;  %4828 = vmatpush3.msra.mxu0 %v6821_v25 }
 0x2a3   :  { %4871 = vmatpush3.msra.mxu1 %v7897_v18  ;;  %4829 = vmatprep.subr.mxu0 %v7886_v58  ;;  %v3416_v18 = vsub.f32 %v7261_v30, %v3415_v44 }
 0x2a4   :  { %4872 = vmatprep.subr.mxu1 %v7886_v58  ;;  %4830 = vmatpush3.msra.mxu0 %v6824_v50 }
 0x2a5   :  { %4873 = vmatpush3.msra.mxu1 %v7898_v21  ;;  %4831 = vmatprep.subr.mxu0 %v7886_v58  ;;  %v3417_v21 = vand.u32 4294901760, %v3416_v18 }
 0x2a6   :  { %4874 = vmatprep.subr.mxu1 %v7886_v58  ;;  %4832 = vmatpush3.msra.mxu0 %v6826_v63 }
 0x2a7   :  { %4875 = vmatpush3.msra.mxu1 %v7899_v29  ;;  %4833 = vmatprep.subr.mxu0 %v7886_v58 }
 0x2a8   :  { %4876 = vmatprep.subr.mxu1 %v7886_v58  ;;  %4834 = vmatpush3.msra.mxu0 %v6828_v22 }
 0x2a9   :  { %4877 = vmatpush3.msra.mxu1 %v7900_v31  ;;  %4835 = vmatprep.subr.mxu0 %v7886_v58 }
 0x2aa   :  { %4878 = vmatprep.subr.mxu1 %v7886_v58  ;;  %4836 = vmatpush3.msra.mxu0 %v6889_v13 }
 0x2ab   :  { %4879 = vmatpush3.msra.mxu1 %v7902_v60  ;;  %4837 = vmatprep.subr.mxu0 %v7886_v58 }
 0x2ac   :  { %4880 = vmatprep.subr.mxu1 %v7886_v58  ;;  %4838 = vmatpush3.msra.mxu0 %v6902_v62 }
 0x2ad   :  { %4881 = vmatpush3.msra.mxu1 %v7903_v52  ;;  %4839 = vmatprep.subr.mxu0 %v7886_v58 }
 0x2ae   :  { %4882 = vmatprep.subr.mxu1 %v7886_v58  ;;  %4840 = vmatpush3.msra.mxu0 %v6916_v2 }
 0x2af   :  { %4883 = vmatpush3.msra.mxu1 %v7904_v40  ;;  %4841 = vmatprep.subr.mxu0 %v7886_v58 }
 0x2b0   :  { %4884 = vmatprep.subr.mxu1 %v7886_v58  ;;  %4842 = vmatpush3.msra.mxu0 %v6930_v45 }
 0x2b1   :  { %4885 = vmatpush3.msra.mxu1 %v7905_v3  ;;  %4843 = vmatprep.subr.mxu0 %v7886_v58 }
 0x2b2   :  { %4886 = vmatprep.subr.mxu1 %v7886_v58  ;;  %4844 = vmatpush3.msra.mxu0 %v6950_v9 }
 0x2b3   :  { %4887 = vmatpush3.msra.mxu1 %v7906_v55  ;;  %4888 = vmatprep.mubr.msk.f32.mxu1 %vm5196_vm0, %v7886_v58 }
 0x2b4   :  { %4845 = vmatprep.subr.mxu0 %v7886_v58  ;;  %4889 = vmatmul.mubr.f32.vlgmr.msra.gmra.mxu1 %v7249_v16 }
 0x2b5   :  { %4926 = vmatprep.subr.mxu1 %v7886_v58  ;;  %4846 = vmatpush3.msra.mxu0 %v6961_v33 }
 0x2b6   :  { %4927 = vmatpush3.msra.mxu1 %v6794_v53  ;;  %4847 = vmatprep.subr.mxu0 %v7886_v58 }
 0x2b7   :  { %4928 = vmatprep.subr.mxu1 %v7886_v58  ;;  %4848 = vmatpush3.msra.mxu0 %v6976_v27 }
 0x2b8   :  { %4929 = vmatpush3.msra.mxu1 %v6799_v0  ;;  %4849 = vmatprep.subr.mxu0 %v7886_v58 }
 0x2b9   :  { %4930 = vmatprep.subr.mxu1 %v7886_v58  ;;  %4850 = vmatpush3.msra.mxu0 %v6993_v12 }
 0x2ba   :  { %4931 = vmatpush3.msra.mxu1 %v6809_v1  ;;  %4851 = vmatprep.subr.mxu0 %v7886_v58 }
 0x2bb   :  { %4932 = vmatprep.subr.mxu1 %v7886_v58  ;;  %4852 = vmatpush3.msra.mxu0 %v7009_v28 }
 0x2bc   :  { %4853 = vmatprep.mubr.msk.f32.mxu0 %vm5196_vm0, %v7886_v58  ;;  %4933 = vmatpush3.msra.mxu1 %v6821_v25 }
 0x2bd   :  { %4854 = vmatmul.mubr.f32.vlgmr.msra.gmra.mxu0 %v3417_v21  ;;  %4891 = vmatprep.subr.mxu0 %v7886_v58 }
 0x2be   :  { %4934 = vmatprep.subr.mxu1 %v7886_v58  ;;  %4892 = vmatpush3.msra.mxu0 %v6797_v37  ;;  %v7432_v37 = vpop.f32.mrf.mxu1 }
 0x2bf   :  { %4935 = vmatpush3.msra.mxu1 %v6824_v50  ;;  %4893 = vmatprep.subr.mxu0 %v7886_v58 }
 0x2c0   :  { %4936 = vmatprep.subr.mxu1 %v7886_v58  ;;  %4894 = vmatpush3.msra.mxu0 %v6807_v38 }
 0x2c1   :  { %4937 = vmatpush3.msra.mxu1 %v6826_v63  ;;  %4895 = vmatprep.subr.mxu0 %v7886_v58 }
 0x2c2   :  { %4938 = vmatprep.subr.mxu1 %v7886_v58  ;;  %4896 = vmatpush3.msra.mxu0 %v6819_v59 }
 0x2c3   :  { %4939 = vmatpush3.msra.mxu1 %v6828_v22  ;;  %4897 = vmatprep.subr.mxu0 %v7886_v58 }
 0x2c4   :  { %4940 = vmatprep.subr.mxu1 %v7886_v58  ;;  %4898 = vmatpush3.msra.mxu0 %v6839_v8 }
 0x2c5   :  { %4941 = vmatpush3.msra.mxu1 %v6889_v13  ;;  %4899 = vmatprep.subr.mxu0 %v7886_v58 }
 0x2c6   :  { %4942 = vmatprep.subr.mxu1 %v7886_v58  ;;  %4900 = vmatpush3.msra.mxu0 %v6843_v26 }
 0x2c7   :  { %4943 = vmatpush3.msra.mxu1 %v6902_v62  ;;  %4901 = vmatprep.subr.mxu0 %v7886_v58 }
 0x2c8   :  { %4944 = vmatprep.subr.mxu1 %v7886_v58  ;;  %4902 = vmatpush3.msra.mxu0 %v6846_v17 }
 0x2c9   :  { %4945 = vmatpush3.msra.mxu1 %v6916_v2  ;;  %4903 = vmatprep.subr.mxu0 %v7886_v58 }
 0x2ca   :  { %4946 = vmatprep.subr.mxu1 %v7886_v58  ;;  %4904 = vmatpush3.msra.mxu0 %v6849_v49 }
 0x2cb   :  { %4947 = vmatpush3.msra.mxu1 %v6930_v45  ;;  %4905 = vmatprep.subr.mxu0 %v7886_v58 }
 0x2cc   :  { %4948 = vmatprep.subr.mxu1 %v7886_v58  ;;  %4906 = vmatpush3.msra.mxu0 %v6900_v54 }
 0x2cd   :  { %4949 = vmatpush3.msra.mxu1 %v6950_v9  ;;  %4907 = vmatprep.subr.mxu0 %v7886_v58 }
 0x2ce   :  { %4950 = vmatprep.subr.mxu1 %v7886_v58  ;;  %4908 = vmatpush3.msra.mxu0 %v6914_v20 }
 0x2cf   :  { %4951 = vmatpush3.msra.mxu1 %v6961_v33  ;;  %4909 = vmatprep.subr.mxu0 %v7886_v58 }
 0x2d0   :  { %4952 = vmatprep.subr.mxu1 %v7886_v58  ;;  %4910 = vmatpush3.msra.mxu0 %v6928_v47 }
 0x2d1   :  { %4953 = vmatpush3.msra.mxu1 %v6976_v27  ;;  %4911 = vmatprep.subr.mxu0 %v7886_v58 }
 0x2d2   :  { %4954 = vmatprep.subr.mxu1 %v7886_v58  ;;  %4912 = vmatpush3.msra.mxu0 %v6946_v42 }
 0x2d3   :  { %4955 = vmatpush3.msra.mxu1 %v6993_v12  ;;  %4913 = vmatprep.subr.mxu0 %v7886_v58 }
 0x2d4   :  { %4956 = vmatprep.subr.mxu1 %v7886_v58  ;;  %4914 = vmatpush3.msra.mxu0 %v6965_v32 }
 0x2d5   :  { %4957 = vmatpush3.msra.mxu1 %v7009_v28  ;;  %4958 = vmatprep.mubr.msk.f32.mxu1 %vm5196_vm0, %v7886_v58 }
 0x2d6   :  { %4915 = vmatprep.subr.mxu0 %v7886_v58  ;;  %4959 = vmatmul.mubr.f32.vlgmr.msra.gmra.mxu1 %v3415_v44 }
 0x2d7   :  { %4996 = vmatprep.subr.mxu1 %v7886_v58  ;;  %4916 = vmatpush3.msra.mxu0 %v6974_v61 }
 0x2d8   :  { %4997 = vmatpush3.msra.mxu1 %v6794_v53  ;;  %4917 = vmatprep.subr.mxu0 %v7886_v58  ;;  %v7430_v53 = vpop.f32.mrf.mxu0 }
 0x2d9   :  { %4998 = vmatprep.subr.mxu1 %v7886_v58  ;;  %4918 = vmatpush3.msra.mxu0 %v6991_v11 }
 0x2da   :  { %4999 = vmatpush3.msra.mxu1 %v6799_v0  ;;  %4919 = vmatprep.subr.mxu0 %v7886_v58 }
 0x2db   :  { %5000 = vmatprep.subr.mxu1 %v7886_v58  ;;  %4920 = vmatpush3.msra.mxu0 %v7007_v10 }
 0x2dc   :  { %5001 = vmatpush3.msra.mxu1 %v6809_v1  ;;  %4921 = vmatprep.subr.mxu0 %v7886_v58 }
 0x2dd   :  { %5002 = vmatprep.subr.mxu1 %v7886_v58  ;;  %4922 = vmatpush3.msra.mxu0 %v7024_v4 }
 0x2de   :  { %4923 = vmatprep.mubr.msk.f32.mxu0 %vm5196_vm0, %v7886_v58  ;;  %5003 = vmatpush3.msra.mxu1 %v6821_v25 }
 0x2df   :  { %4924 = vmatmul.mubr.f32.vlgmr.msra.gmra.mxu0 %v7261_v30  ;;  %4961 = vmatprep.subr.mxu0 %v7886_v58 }
 0x2e0   :  { %5004 = vmatprep.subr.mxu1 %v7886_v58  ;;  %4962 = vmatpush3.msra.mxu0 %v6804_v36 }
 0x2e1   :  { %5005 = vmatpush3.msra.mxu1 %v6824_v50  ;;  %4963 = vmatprep.subr.mxu0 %v7886_v58 }
 0x2e2   :  { %5006 = vmatprep.subr.mxu1 %v7886_v58  ;;  %4964 = vmatpush3.msra.mxu0 %v7874_v14 }
 0x2e3   :  { %5007 = vmatpush3.msra.mxu1 %v6826_v63  ;;  %4965 = vmatprep.subr.mxu0 %v7886_v58 }
 0x2e4   :  { %5008 = vmatprep.subr.mxu1 %v7886_v58  ;;  %4966 = vmatpush3.msra.mxu0 %v7875_v43 }
 0x2e5   :  { %5009 = vmatpush3.msra.mxu1 %v6828_v22  ;;  %4967 = vmatprep.subr.mxu0 %v7886_v58 }
 0x2e6   :  { %5010 = vmatprep.subr.mxu1 %v7886_v58  ;;  %4968 = vmatpush3.msra.mxu0 %v7876_v7 }
 0x2e7   :  { %5011 = vmatpush3.msra.mxu1 %v6889_v13  ;;  %4969 = vmatprep.subr.mxu0 %v7886_v58 }
 0x2e8   :  { %5012 = vmatprep.subr.mxu1 %v7886_v58  ;;  %4970 = vmatpush3.msra.mxu0 %v7877_v19 }
 0x2e9   :  { %5013 = vmatpush3.msra.mxu1 %v6902_v62  ;;  %4971 = vmatprep.subr.mxu0 %v7886_v58 }
 0x2ea   :  { %5014 = vmatprep.subr.mxu1 %v7886_v58  ;;  %4972 = vmatpush3.msra.mxu0 %v7878_v34 }
 0x2eb   :  { %5015 = vmatpush3.msra.mxu1 %v6916_v2  ;;  %4973 = vmatprep.subr.mxu0 %v7886_v58 }
 0x2ec   :  { %5016 = vmatprep.subr.mxu1 %v7886_v58  ;;  %4974 = vmatpush3.msra.mxu0 %v7879_v48 }
 0x2ed   :  { %5017 = vmatpush3.msra.mxu1 %v6930_v45  ;;  %4975 = vmatprep.subr.mxu0 %v7886_v58 }
 0x2ee   :  { %5018 = vmatprep.subr.mxu1 %v7886_v58  ;;  %4976 = vmatpush3.msra.mxu0 %v7880_v23 }
 0x2ef   :  { %5019 = vmatpush3.msra.mxu1 %v6950_v9  ;;  %4977 = vmatprep.subr.mxu0 %v7886_v58 }
 0x2f0   :  { %5020 = vmatprep.subr.mxu1 %v7886_v58  ;;  %4978 = vmatpush3.msra.mxu0 %v7881_v51 }
 0x2f1   :  { %5021 = vmatpush3.msra.mxu1 %v6961_v33  ;;  %4979 = vmatprep.subr.mxu0 %v7886_v58 }
 0x2f2   :  { %5022 = vmatprep.subr.mxu1 %v7886_v58  ;;  %4980 = vmatpush3.msra.mxu0 %v7882_v46 }
 0x2f3   :  { %5023 = vmatpush3.msra.mxu1 %v6976_v27  ;;  %4981 = vmatprep.subr.mxu0 %v7886_v58 }
 0x2f4   :  { %5024 = vmatprep.subr.mxu1 %v7886_v58  ;;  %4982 = vmatpush3.msra.mxu0 %v7883_v35 }
 0x2f5   :  { %5025 = vmatpush3.msra.mxu1 %v6993_v12  ;;  %4983 = vmatprep.subr.mxu0 %v7886_v58 }
 0x2f6   :  { %5026 = vmatprep.subr.mxu1 %v7886_v58  ;;  %4984 = vmatpush3.msra.mxu0 %v7884_v56 }
 0x2f7   :  { %5027 = vmatpush3.msra.mxu1 %v7009_v28  ;;  %5028 = vmatprep.mubr.msk.f32.mxu1 %vm5196_vm0, %v7886_v58 }
 0x2f8   :  { %4985 = vmatprep.subr.mxu0 %v7886_v58  ;;  %5029 = vmatmul.mubr.f32.vlgmr.msra.gmra.mxu1 %v7249_v16 }
 0x2f9   :  { %4986 = vmatpush3.msra.mxu0 %v7885_v5  ;;  %4993 = vmatprep.mubr.msk.f32.mxu0 %vm5196_vm0, %v7886_v58 }
 0x2fa   :  { %4987 = vmatprep.subr.mxu0 %v7886_v58 }
 0x2fb   :  { %4988 = vmatpush3.msra.mxu0 %v7888_v15 }
 0x2fc   :  { %4989 = vmatprep.subr.mxu0 %v7886_v58 }
 0x2fd   :  { %4990 = vmatpush3.msra.mxu0 %v7890_v24 }
 0x2fe   :  { %4991 = vmatprep.subr.mxu0 %v7886_v58 }
 0x2ff   :  { %4992 = vmatpush3.msra.mxu0 %v7892_v41 }
 0x300   :  { %4994 = vmatmul.mubr.f32.vlgmr.msra.gmra.mxu0 %v7249_v16 }
 0x310   :  { %v4680_v0 = vpop.f32.mrf.mxu1 }
 0x312   :  { %v2893_v38 = vpop.f32.mrf.mxu1 }
 0x318   :  { %v4645_v36 = vpop.f32.mrf.mxu0 }
 0x319   :  { %v2900_v59 = vadd.f32 %v4680_v0, %v4645_v36 }
 0x31a   :  { %v2732_v1 = vpop.f32.mrf.mxu0 }
 0x31b   :  { %v2894_v63 = vadd.f32 %v2893_v38, %v2732_v1 }
 0x331   :  { %v4750_v25 = vpop.f32.mrf.mxu1 }
 0x333   :  { %v3099_v49 = vpop.f32.mrf.mxu1 }
 0x339   :  { %v4715_v50 = vpop.f32.mrf.mxu0 }
 0x33a   :  { %v3011_v22 = vadd.f32 %v4715_v50, %v2900_v59 }
 0x33b   :  { %v3003_v8 = vpop.f32.mrf.mxu0 }
 0x33c   :  { %v3004_v26 = vadd.f32 %v3003_v8, %v2894_v63  ;;  %v3108_v17 = vadd.f32 %v4750_v25, %v3011_v22  ;;  %v7907_v63 = vld [vmem:[#allocation49_spill] sm:$0xff] }
 0x33d   :  { %v2495_v22 = vadd.f32 %v7430_v53, %v7907_v63 }
 0x33e   :  { %v3100_v13 = vadd.f32 %v3099_v49, %v3004_v26 }
 0x33f   :  { %v2606_v8 = vadd.f32 %v7432_v37, %v2495_v22 }
 0x353   :  { %v4820_v54 = vpop.f32.mrf.mxu1 }
 0x355   :  { %v3319_v42 = vpop.f32.mrf.mxu1 }
 0x35b   :  { %v4785_v62 = vpop.f32.mrf.mxu0 }
 0x35c   :  { %v3233_v20 = vadd.f32 %v4785_v62, %v3108_v17 }
 0x35d   :  { %v3226_v2 = vpop.f32.mrf.mxu0 }
 0x35e   :  { %v3326_v47 = vadd.f32 %v4820_v54, %v3233_v20  ;;  %v3227_v45 = vadd.f32 %v3226_v2, %v3100_v13  ;;  %v7908_v20 = vld [vmem:[#allocation48_spill] sm:$0xff] }
 0x360   :  { %v3320_v9 = vadd.f32 %v3319_v42, %v3227_v45  ;;  %v3330_v14 = vmul.f32 0.35355338, %v3326_v47 }
 0x362   :  { %v3329_v4 = vmul.f32 0.35355338, %v3320_v9  ;;  %v3980_v7 = vrot.slane %v3330_v14, 4 }
 0x364   :  { %v3974_v43 = vrot.slane %v3329_v4, 4  ;;  %v3981_v34 = vmax.f32 %v3330_v14, %v3980_v7 }
 0x366   :  { %v3975_v19 = vmax.f32 %v3329_v4, %v3974_v43  ;;  %v3982_v35 = vrot.slane %v3981_v34, 2 }
 0x368   :  { %v3976_v23 = vrot.slane %v3975_v19, 2  ;;  %v3983_v58 = vmax.f32 %v3981_v34, %v3982_v35 }
 0x36a   :  { %v3977_v5 = vmax.f32 %v3975_v19, %v3976_v23  ;;  %v3984_v6 = vrot.slane %v3983_v58, 1 }
 0x36c   :  { %v3978_v29 = vrot.slane %v3977_v5, 1  ;;  %v3985_v30 = vmax.f32 %v3983_v58, %v3984_v6 }
 0x36e   :  { %v3979_v52 = vmax.f32 %v3977_v5, %v3978_v29 }
 0x374   :  { %v3570_v33 = vpop.f32.mrf.mxu1 }
 0x376   :  { %v4890_v32 = vpop.f32.mrf.mxu1 }
 0x37d   :  { %v3419_v61 = vpop.f32.mrf.mxu0 }
 0x37e   :  { %v3571_v51 = vadd.f32 %v3570_v33, %v3419_v61 }
 0x37f   :  { %v4855_v27 = vpop.f32.mrf.mxu0 }
 0x396   :  { %v3763_v11 = vpop.f32.mrf.mxu1 }
 0x398   :  { %v4960_v12 = vpop.f32.mrf.mxu1 }
 0x39f   :  { %v3674_v10 = vpop.f32.mrf.mxu0 }
 0x3a0   :  { %v3675_v56 = vadd.f32 %v3674_v10, %v3571_v51 }
 0x3a1   :  { %v4925_v28 = vpop.f32.mrf.mxu0 }
 0x3a2   :  { %v3764_v15 = vadd.f32 %v3763_v11, %v3675_v56 }
 0x3b8   :  { %v3969_v48 = vpop.f32.mrf.mxu1 }
 0x3ba   :  { %v5030_v46 = vpop.f32.mrf.mxu1 }
 0x3c0   :  { %v3882_v24 = vpop.f32.mrf.mxu0 }
 0x3c1   :  { %v3883_v41 = vadd.f32 %v3882_v24, %v3764_v15 }
 0x3c2   :  { %v4995_v31 = vpop.f32.mrf.mxu0 }
 0x3c3   :  { %v3970_v16 = vadd.f32 %v3969_v48, %v3883_v41 }
 0x3c5   :  { %v3973_v60 = vmul.f32 0.35355338, %v3970_v16 }
 0x3c7   :  { %v3987_v40 = vrot.slane %v3973_v60, 1  ;;  %v3990_v3 = vmax.f32 %v3979_v52, %v3973_v60 }
 0x3c9   :  { %v3991_v44 = vmax.f32 %v3985_v30, %v3987_v40  ;;  %v3995_v55 = vrot.slane %v3990_v3, %v7060_v57 }
 0x3cb   :  { %v3999_v18 = vrot.slane %v3991_v44, %v7060_v57  ;;  %v4000_v21 = vsub.f32 %v3329_v4, %v3995_v55  ;;  %v4008_v0 = vrot.slane %v3991_v44, 7  ;;  %v4088_v57 = vld [vmem:[%s7454_s5] ss:$0 sm:$0xff]  ;;  %s5198_s5 = smov [#allocation11]  }
 0x3cc   :  { %v2608_v26 = vadd.f32 %v4088_v57, %v7063_v39  ;;  %v2609_v49 = vadd.f32 %v4088_v57, %v2606_v8  ;;  %v1671_v2 = vadd.f32 %v4088_v57, %v7908_v20  ;;  %s4076_s28 = sshll.u32 %s5198_s5, 4  ;;  %s4077_s28 = int_to_ptr.vmem [resolvable:$true] %s4076_s28 }
 0x3cd   :  { %v4001_v36 = vsub.f32 %v3330_v14, %v3999_v18  ;;  %v4002_v38 = vmul.f32 1.442695, %v4000_v21  ;;  %v4010_v1 = vsel %vm4009_vm1, %v4008_v0, %v3990_v3  ;;  %s5156_s8 = scalar_lea.vmem %s4077_s28, 32  ;;  %p5161_p12 = scmp.lt.s32.totalorder %s4077_s28, %s4077_s28 }
 0x3ce   :  { %v4012_v59 = vsub.f32 %v3973_v60, %v4010_v1  ;;  %p5157_p11 = scmp.ne.s32.totalorder %s4077_s28, %s5156_s8  ;;  %p5162_p13 = scmp.lt.s32.totalorder %s5156_s8, %s5156_s8 }
 0x3cf   :  { %5046 = vpow2.f32 %v4002_v38  ;;  %v4004_v25 = vmul.f32 1.442695, %v4001_v36 }
 0x3d0   :  { %v4013_v50 = vmul.f32 1.442695, %v4012_v59  ;;  %p5163_p0 = por %p5162_p13, %p5161_p12 }
 0x3d1   :  { %5048 = vpow2.f32 %v4004_v25 }
 0x3d2   :  { %5050 = vpow2.f32 %v4013_v50  ;;  %p5164_p1 = pnand %p5163_p0, %p5157_p11 }
 0x3dc   :  { %v5047_v17 = vpop.eup %5046 }
 0x3dd   :  { %v4015_v13 = vrot.slane %v5047_v17, 4  ;;  %v4041_v54 = vmul.f32 %v5047_v17, %v2608_v26 }
 0x3de   :  { %v5049_v62 = vpop.eup %5048 }
 0x3df   :  { %v5051_v47 = vpop.eup %5050  ;;  %v4016_v45 = vadd.f32 %v5047_v17, %v4015_v13  ;;  %v4021_v42 = vrot.slane %v5049_v62, 4  ;;  %v4042_v9 = vmul.f32 %v5049_v62, %v2609_v49  ;;  %v4043_v53 = vrot.slane %v4041_v54, 4 }
 0x3e0   :  { %v4055_v33 = vmul.f32 %v5051_v47, %v1671_v2  ;;  %v4028_v23 = vrot.slane %v5051_v47, 1 }
 0x3e1   :  { %v4017_v37 = vrot.slane %v4016_v45, 2  ;;  %v4022_v32 = vadd.f32 %v5049_v62, %v4021_v42  ;;  %v4044_v61 = vadd.f32 %v4043_v53, %v4041_v54  ;;  %v4049_v27 = vrot.slane %v4042_v9, 4 }
 0x3e2   :  { %v4057_v5 = vrot.slane %v4055_v33, 1 }
 0x3e3   :  { %v4018_v11 = vadd.f32 %v4017_v37, %v4016_v45  ;;  %v4023_v12 = vrot.slane %v4022_v32, 2  ;;  %v4045_v39 = vrot.slane %v4044_v61, 2  ;;  %v4050_v10 = vadd.f32 %v4049_v27, %v4042_v9 }
 0x3e5   :  { %v4019_v28 = vrot.slane %v4018_v11, 1  ;;  %v4024_v4 = vadd.f32 %v4023_v12, %v4022_v32  ;;  %v4046_v14 = vadd.f32 %v4045_v39, %v4044_v61  ;;  %v4051_v43 = vrot.slane %v4050_v10, 2 }
 0x3e7   :  { %v4020_v7 = vadd.f32 %v4019_v28, %v4018_v11  ;;  %v4025_v19 = vrot.slane %v4024_v4, 1  ;;  %v4047_v34 = vrot.slane %v4046_v14, 1  ;;  %v4052_v48 = vadd.f32 %v4051_v43, %v4050_v10 }
 0x3e9   :  { %v4026_v51 = vadd.f32 %v4025_v19, %v4024_v4  ;;  %v4031_v46 = vadd.f32 %v5051_v47, %v4020_v7  ;;  %v4048_v35 = vadd.f32 %v4047_v34, %v4046_v14  ;;  %v4053_v56 = vrot.slane %v4052_v48, 1 }
 0x3eb   :  { %v4032_v58 = vadd.f32 %v4028_v23, %v4026_v51  ;;  %5052 = vrcp.f32 %v4031_v46  ;;  %v4054_v15 = vadd.f32 %v4053_v56, %v4052_v48  ;;  %v4060_v24 = vadd.f32 %v4055_v33, %v4048_v35 }
 0x3ed   :  { %5054 = vrcp.f32 %v4032_v58  ;;  %v4061_v41 = vadd.f32 %v4057_v5, %v4054_v15 }
 0x3f8   :  { %v5053_v29 = vpop.eup %5052 }
 0x3f9   :  { %v4035_v31 = vmul.f32 %v5053_v29, %v4031_v46 }
 0x3fa   :  { %v5055_v6 = vpop.eup %5054 }
 0x3fb   :  { %v4036_v16 = vmul.f32 %v5055_v6, %v4032_v58  ;;  %v4037_v60 = vsub.f32 2.0, %v4035_v31 }
 0x3fd   :  { %v4038_v52 = vsub.f32 2.0, %v4036_v16  ;;  %v4039_v30 = vmul.f32 %v5053_v29, %v4037_v60 }
 0x3ff   :  { %v4040_v40 = vmul.f32 %v5055_v6, %v4038_v52  ;;  %v4062_v3 = vmul.f32 %v4060_v24, %v4039_v30 }
 0x401   :  { %v4063_v44 = vmul.f32 %v4061_v41, %v4040_v40 }
 0x403   :  { %v4066_v55 = vrot.slane %v4063_v44, 7 }
 0x405   :  { %v4067_v18 = vsel %vm4009_vm1, %v4066_v55, %v4062_v3 }
 0x406   :  { %4069 = vst [vmem:[#allocation11] sm:$0x3] %v4067_v18 }
 0x407   :  { %5167 = shalt.err (!%p5164_p1)
}
 0x408   :  { %4079 = dma.vmem_to_hbm [thread:$0]  %s4077_s28, 32, %s7456_s7, [#allocation4]  }
 0x409   :  { %5182 = dma.done.wait [#allocation4], 32  }
 0x40a   :  { %5183 = vsyncadd [#allocation4], 4294967264 }
 0x40b   :  { %4083 = vsyncpa [#allocation3], 1 }
 0x40c   :  { %4084 = vsyncpa [#allocation6], 1 }
 0x40d   :  { %4085 = vsyncpa [#allocation9], 1 }
 0x40e   :  { %4086 = vsyncpa [#allocation4], 1 }

</bundles_post_ra>
